<compile_context>
chip_gen: v7x
topology: tpu7x:2x2x1
jax: 0.10.0
libtpu: 0.0.40
codegen_flags: <defaults>
</compile_context>

<pallas_src>
import functools

import jax
import jax.numpy as jnp
from jax import lax
from jax.experimental import pallas as pl
from jax.experimental.pallas import tpu as pltpu


def _vmem_limit_bytes():
    # ~2/3 of physical VMEM, capped at 100 MiB: ~85 MiB on v5e/v6e (128 MiB), ~42 MiB on v7x (64 MiB).
    try:
        cap = int(pltpu.get_tpu_info().vmem_capacity_bytes)
        return min(100 * 1024 * 1024, (cap * 2) // 3)
    except Exception:
        return 48 * 1024 * 1024


_VMEM_LIMIT = _vmem_limit_bytes()


def _pick_tile(dim, target, base):
    """Largest tile <= target that divides dim and is a multiple of base (or the full dim)."""
    if dim <= target:
        return dim
    t = (target // base) * base
    while t >= base:
        if dim % t == 0:
            return t
        t -= base
    return dim


# ----------------------------- kernels -------------------------------------------------

def _mm_kernel(x_ref, w_ref, b_ref, *rest, has_gate, has_res):
    """o = [gate *] (x @ w + b) [+ res]; K tiled on the last ('arbitrary') grid axis."""
    o_ref, acc_ref = rest[-2], rest[-1]
    kk = pl.program_id(3)

    @pl.when(kk == 0)
    def _():
        acc_ref[...] = jnp.zeros_like(acc_ref)

    x = x_ref[...]
    if x.dtype != jnp.bfloat16:
        x = x.astype(jnp.bfloat16)
    acc_ref[...] += jnp.dot(x, w_ref[...], preferred_element_type=jnp.float32)

    @pl.when(kk == pl.num_programs(3) - 1)
    def _():
        y = acc_ref[...] + b_ref[...]
        idx = 0
        if has_gate:
            y = y * rest[idx][...]
            idx += 1
        if has_res:
            y = y + rest[idx][...].astype(jnp.float32)
        o_ref[...] = y.astype(o_ref.dtype)


def _lnmod_mm_kernel(x_ref, sc_ref, sh_ref, w_ref, b_ref, o_ref, xm_sc, *, eps, gelu):
    """o = act( (LN(x) * (1+scale) + shift) @ w + b ).

    LN + modulation is computed once per row tile (at the first N tile, j==0) into a bf16 VMEM
    scratch and reused for all N tiles (j is the innermost, 'arbitrary' grid axis)."""
    @pl.when(pl.program_id(2) == 0)
    def _():
        x = x_ref[...].astype(jnp.float32)                    # (ts, D)
        mu = jnp.mean(x, axis=-1, keepdims=True)
        xc = x - mu
        var = jnp.mean(xc * xc, axis=-1, keepdims=True)
        xn = xc * lax.rsqrt(var + eps)
        xm = xn * (1.0 + sc_ref[...]) + sh_ref[...]           # AdaLN-single modulation
        xm_sc[...] = xm.astype(jnp.bfloat16)

    y = jnp.dot(xm_sc[...], w_ref[...], preferred_element_type=jnp.float32) + b_ref[...]
    if gelu:
        c = 0.7978845608028654                                # sqrt(2/pi), tanh-gelu
        y = 0.5 * y * (1.0 + jnp.tanh(c * (y + 0.044715 * y * y * y)))
    o_ref[...] = y.astype(o_ref.dtype)


def _flash_kernel(q_ref, k_ref, v_ref, o_ref, m_sc, l_sc, acc_sc, *, num_heads):
    """Flash attention over the Sk ('arbitrary') grid axis; heads packed in the lane dim.
    The 1/sqrt(head_dim) scale is already folded into the q projection weights."""
    ki = pl.program_id(2)
    H = num_heads
    Dh = q_ref.shape[1] // H

    @pl.when(ki == 0)
    def _():
        m_sc[...] = jnp.full_like(m_sc, -jnp.inf)
        l_sc[...] = jnp.zeros_like(l_sc)
        acc_sc[...] = jnp.zeros_like(acc_sc)

    q = q_ref[...]
    k = k_ref[...]
    v = v_ref[...]

    for h in range(H):                                        # static unroll over heads
        sl = slice(h * Dh, (h + 1) * Dh)
        s = lax.dot_general(q[:, sl], k[:, sl], (((1,), (1,)), ((), ())),
                            preferred_element_type=jnp.float32)          # (tq, tk)
        m_prev = m_sc[h]                                                  # (tq, 1)
        m_new = jnp.maximum(m_prev, jnp.max(s, axis=-1, keepdims=True))
        alpha = jnp.exp(m_prev - m_new)
        p = jnp.exp(s - m_new)
        l_sc[h] = alpha * l_sc[h] + jnp.sum(p, axis=-1, keepdims=True)
        acc_sc[h] = alpha * acc_sc[h] + jnp.dot(p.astype(jnp.bfloat16), v[:, sl],
                                                preferred_element_type=jnp.float32)
        m_sc[h] = m_new

    @pl.when(ki == pl.num_programs(2) - 1)
    def _():
        for h in range(H):
            inv = pl.reciprocal(l_sc[h], approx=True)
            o_ref[:, h * Dh:(h + 1) * Dh] = (acc_sc[h] * inv).astype(o_ref.dtype)


def _attn_single_kernel(q_ref, kv_ref, o_ref, *, num_heads, head_dim):
    """Single-pass attention (all keys in one tile): no online-softmax bookkeeping.
    q scale already folded into the q projection; K and V arrive as one fused (Sk, 2D) block."""
    H, Dh = num_heads, head_dim
    D = H * Dh
    q = q_ref[...]
    kv = kv_ref[...]
    for h in range(H):
        sl = slice(h * Dh, (h + 1) * Dh)
        k_h = kv[:, h * Dh:(h + 1) * Dh]
        v_h = kv[:, D + h * Dh:D + (h + 1) * Dh]
        s = lax.dot_general(q[:, sl], k_h, (((1,), (1,)), ((), ())),
                            preferred_element_type=jnp.float32)          # (tq, Sk)
        m = jnp.max(s, axis=-1, keepdims=True)
        p = jnp.exp(s - m)
        l = jnp.sum(p, axis=-1, keepdims=True)
        o = jnp.dot(p.astype(jnp.bfloat16), v_h, preferred_element_type=jnp.float32)
        o_ref[:, sl] = (o * pl.reciprocal(l, approx=True)).astype(o_ref.dtype)


def _ffdown_after_kernel(x_ref, w2_ref, b2_ref, g_ref, r_ref, aw_ref, ab_ref,
                         down_ref, left_ref, acc_ref):
    """down = gate * (x @ w2 + b2) + res ; left = down @ after_w + after_b  (fused epilogue)."""
    kk = pl.program_id(2)

    @pl.when(kk == 0)
    def _():
        acc_ref[...] = jnp.zeros_like(acc_ref)

    acc_ref[...] += jnp.dot(x_ref[...], w2_ref[...], preferred_element_type=jnp.float32)

    @pl.when(kk == pl.num_programs(2) - 1)
    def _():
        down = (acc_ref[...] + b2_ref[...]) * g_ref[...] + r_ref[...].astype(jnp.float32)
        down_ref[...] = down.astype(down_ref.dtype)
        left = jnp.dot(down.astype(jnp.bfloat16), aw_ref[...],
                       preferred_element_type=jnp.float32) + ab_ref[...]
        left_ref[...] = left.astype(left_ref.dtype)


# ----------------------------- pallas_call wrappers ------------------------------------

def matmul_bias(x, w, b, *, gate=None, res=None, out_dtype=jnp.float32,
                ts_target=512, tn_target=None, tk_target=512):
    """(B,S,K) @ (K,N) + b, with optional per-batch gate (B,1,N) and residual (B,S,N).
    tn_target=None => full-N accumulator (used for all D->D output projections)."""
    B, S, K = x.shape
    N = w.shape[1]
    ts = _pick_tile(S, ts_target, 8)
    tn = N if tn_target is None else _pick_tile(N, tn_target, 128)
    tk = _pick_tile(K, tk_target, 128)
    grid = (B, S // ts, N // tn, K // tk)

    in_specs = [
        pl.BlockSpec((pl.Squeezed(), ts, tk), lambda b_, i, j, k: (b_, i, k)),
        pl.BlockSpec((tk, tn), lambda b_, i, j, k: (k, j)),
        pl.BlockSpec((1, tn), lambda b_, i, j, k: (0, j)),
    ]
    args = [x, w, b.reshape(1, N)]
    if gate is not None:
        in_specs.append(pl.BlockSpec((pl.Squeezed(), 1, tn), lambda b_, i, j, k: (b_, 0, j)))
        args.append(gate)
    if res is not None:
        in_specs.append(pl.BlockSpec((pl.Squeezed(), ts, tn), lambda b_, i, j, k: (b_, i, j)))
        args.append(res)

    kernel = functools.partial(_mm_kernel, has_gate=gate is not None, has_res=res is not None)
    return pl.pallas_call(
        kernel,
        out_shape=jax.ShapeDtypeStruct((B, S, N), out_dtype),
        grid=grid,
        in_specs=in_specs,
        out_specs=pl.BlockSpec((pl.Squeezed(), ts, tn), lambda b_, i, j, k: (b_, i, j)),
        scratch_shapes=[pltpu.VMEM((ts, tn), jnp.float32)],
        compiler_params=pltpu.CompilerParams(
            dimension_semantics=("parallel", "parallel", "parallel", "arbitrary"),
            vmem_limit_bytes=_VMEM_LIMIT),
    )(*args)


def lnmod_matmul(x, scale, shift, w, b, *, eps, gelu, out_dtype=jnp.bfloat16,
                 ts_target=512, tn_target=512):
    """Fused LayerNorm + AdaLN-single modulation + matmul (+ optional tanh-gelu).
    LN/modulation is cached in VMEM and reused across N tiles."""
    B, S, D = x.shape
    N = w.shape[1]
    ts = _pick_tile(S, ts_target, 8)
    tn = _pick_tile(N, tn_target, 128)
    grid = (B, S // ts, N // tn)

    kernel = functools.partial(_lnmod_mm_kernel, eps=eps, gelu=gelu)
    return pl.pallas_call(
        kernel,
        out_shape=jax.ShapeDtypeStruct((B, S, N), out_dtype),
        grid=grid,
        in_specs=[
            pl.BlockSpec((pl.Squeezed(), ts, D), lambda b_, i, j: (b_, i, 0)),
            pl.BlockSpec((pl.Squeezed(), 1, D), lambda b_, i, j: (b_, 0, 0)),
            pl.BlockSpec((pl.Squeezed(), 1, D), lambda b_, i, j: (b_, 0, 0)),
            pl.BlockSpec((D, tn), lambda b_, i, j: (0, j)),
            pl.BlockSpec((1, tn), lambda b_, i, j: (0, j)),
        ],
        out_specs=pl.BlockSpec((pl.Squeezed(), ts, tn), lambda b_, i, j: (b_, i, j)),
        scratch_shapes=[pltpu.VMEM((ts, D), jnp.bfloat16)],
        compiler_params=pltpu.CompilerParams(
            dimension_semantics=("parallel", "parallel", "arbitrary"),
            vmem_limit_bytes=_VMEM_LIMIT),
    )(x, scale, shift, w, b.reshape(1, N))


def flash_attention(q_arr, kv_arr, *, num_heads, head_dim, q_block, k_block, v_block,
                    tq_target=256, tk_target=512):
    """q_arr: (B,Sq,nq*D); kv_arr: (B,Sk,nkv*D).  Heads stay packed as (S, H*Dh); width-D blocks
    along the last axis select q / k / v directly out of the fused-projection tensors."""
    B, Sq = q_arr.shape[0], q_arr.shape[1]
    Sk = kv_arr.shape[1]
    D = num_heads * head_dim
    tq = _pick_tile(Sq, tq_target, 8)
    tks = _pick_tile(Sk, tk_target, 8)
    grid = (B, Sq // tq, Sk // tks)

    # TODO(synk): head_dim=72 (real PixArt-Sigma) should pad Dh to 128 or move heads to a leading
    # axis; packed-lane per-head slicing is only layout-free when Dh is a multiple of 128.
    kernel = functools.partial(_flash_kernel, num_heads=num_heads)
    return pl.pallas_call(
        kernel,
        out_shape=jax.ShapeDtypeStruct((B, Sq, D), jnp.bfloat16),
        grid=grid,
        in_specs=[
            pl.BlockSpec((pl.Squeezed(), tq, D), lambda b_, i, k: (b_, i, q_block)),
            pl.BlockSpec((pl.Squeezed(), tks, D), lambda b_, i, k: (b_, k, k_block)),
            pl.BlockSpec((pl.Squeezed(), tks, D), lambda b_, i, k: (b_, k, v_block)),
        ],
        out_specs=pl.BlockSpec((pl.Squeezed(), tq, D), lambda b_, i, k: (b_, i, 0)),
        scratch_shapes=[pltpu.VMEM((num_heads, tq, 1), jnp.float32),
                        pltpu.VMEM((num_heads, tq, 1), jnp.float32),
                        pltpu.VMEM((num_heads, tq, head_dim), jnp.float32)],
        compiler_params=pltpu.CompilerParams(
            dimension_semantics=("parallel", "parallel", "arbitrary"),
            vmem_limit_bytes=_VMEM_LIMIT),
    )(q_arr, kv_arr, kv_arr)


def cross_attention(q_arr, kv_arr, *, num_heads, head_dim, tq_target=256, sk_single_max=1024):
    """Cross-attention: single full-Sk pass when the encoder sequence fits in one tile,
    otherwise fall back to the flash (online-softmax) path."""
    B, Sq = q_arr.shape[0], q_arr.shape[1]
    Sk, KV = kv_arr.shape[1], kv_arr.shape[2]
    D = num_heads * head_dim
    if Sk > sk_single_max:
        return flash_attention(q_arr, kv_arr, num_heads=num_heads, head_dim=head_dim,
                               q_block=0, k_block=0, v_block=1)
    tq = _pick_tile(Sq, tq_target, 8)
    grid = (B, Sq // tq)
    kernel = functools.partial(_attn_single_kernel, num_heads=num_heads, head_dim=head_dim)
    return pl.pallas_call(
        kernel,
        out_shape=jax.ShapeDtypeStruct((B, Sq, D), jnp.bfloat16),
        grid=grid,
        in_specs=[
            pl.BlockSpec((pl.Squeezed(), tq, D), lambda b_, i: (b_, i, 0)),
            pl.BlockSpec((pl.Squeezed(), Sk, KV), lambda b_, i: (b_, 0, 0)),   # fused K+V block
        ],
        out_specs=pl.BlockSpec((pl.Squeezed(), tq, D), lambda b_, i: (b_, i, 0)),
        compiler_params=pltpu.CompilerParams(
            dimension_semantics=("parallel", "parallel"),
            vmem_limit_bytes=_VMEM_LIMIT),
    )(q_arr, kv_arr)


def ff_down_after(x, w2, b2, gate, res, after_w, after_b, *, out_dtype=jnp.float32,
                  ts_target=512, tk_target=512):
    """Fused FF down-projection (+gate +residual) and after_proj; emits (down, left)."""
    B, S, K = x.shape
    D = w2.shape[1]
    ts = _pick_tile(S, ts_target, 8)
    tk = _pick_tile(K, tk_target, 128)
    grid = (B, S // ts, K // tk)
    return pl.pallas_call(
        _ffdown_after_kernel,
        out_shape=(jax.ShapeDtypeStruct((B, S, D), out_dtype),
                   jax.ShapeDtypeStruct((B, S, D), out_dtype)),
        grid=grid,
        in_specs=[
            pl.BlockSpec((pl.Squeezed(), ts, tk), lambda b_, i, k: (b_, i, k)),
            pl.BlockSpec((tk, D), lambda b_, i, k: (k, 0)),
            pl.BlockSpec((1, D), lambda b_, i, k: (0, 0)),
            pl.BlockSpec((pl.Squeezed(), 1, D), lambda b_, i, k: (b_, 0, 0)),
            pl.BlockSpec((pl.Squeezed(), ts, D), lambda b_, i, k: (b_, i, 0)),
            pl.BlockSpec((D, D), lambda b_, i, k: (0, 0)),
            pl.BlockSpec((1, D), lambda b_, i, k: (0, 0)),
        ],
        out_specs=(pl.BlockSpec((pl.Squeezed(), ts, D), lambda b_, i, k: (b_, i, 0)),
                   pl.BlockSpec((pl.Squeezed(), ts, D), lambda b_, i, k: (b_, i, 0))),
        scratch_shapes=[pltpu.VMEM((ts, D), jnp.float32)],
        compiler_params=pltpu.CompilerParams(
            dimension_semantics=("parallel", "parallel", "arbitrary"),
            vmem_limit_bytes=_VMEM_LIMIT),
    )(x, w2, b2.reshape(1, D), gate, res, after_w, after_b.reshape(1, D))


# ----------------------------- module forward ------------------------------------------

def pixart_controlnet_adapter_block(params, hidden_states, controlnet_states,
                                    encoder_hidden_states, timestep, *,
                                    block_index, num_heads, head_dim, eps=1e-6):
    B, S, D = hidden_states.shape
    hidden_states = hidden_states.astype(jnp.float32)
    controlnet_states = controlnet_states.astype(jnp.float32)
    scale = 1.0 / (head_dim ** 0.5)

    # ---- before_proj (block_index == 0): controlnet = hidden + before_proj(controlnet)
    if block_index == 0:
        cs = matmul_bias(controlnet_states, params["before_w"], params["before_b"],
                         res=hidden_states, out_dtype=jnp.float32)
    else:
        cs = controlnet_states

    # ---- ada_norm_single modulation (scale_shift_table + timestep embedding)
    mod = params["scale_shift_table"][None] + timestep.reshape(B, 6, D)
    shift_msa, scale_msa, gate_msa = mod[:, 0:1], mod[:, 1:2], mod[:, 2:3]
    shift_mlp, scale_mlp, gate_mlp = mod[:, 3:4], mod[:, 4:5], mod[:, 5:6]

    # ---- fold 1/sqrt(head_dim) into the q-projection weights (one-time param transform)
    qkv_w = params["attn1_qkv_w"].at[:, :D].multiply(scale)
    qkv_b = params["attn1_qkv_b"].at[:D].multiply(scale)
    q2_w = params["attn2_q_w"] * scale
    q2_b = params["attn2_q_b"] * scale

    # ---- 1. self-attention: fused LN+mod+QKV, flash attention, fused out-proj+gate+residual
    qkv = lnmod_matmul(cs, scale_msa, shift_msa, qkv_w, qkv_b, eps=eps, gelu=False)
    a1 = flash_attention(qkv, qkv, num_heads=num_heads, head_dim=head_dim,
                         q_block=0, k_block=1, v_block=2)
    hs = matmul_bias(a1, params["attn1_o_w"], params["attn1_o_b"],
                     gate=gate_msa, res=cs, out_dtype=jnp.float32)

    # ---- 2. cross-attention (ada_norm_single: no pre-norm before attn2)
    q2 = matmul_bias(hs, q2_w, q2_b, out_dtype=jnp.bfloat16)
    kv2 = matmul_bias(encoder_hidden_states.astype(jnp.float32),
                      params["attn2_kv_w"], params["attn2_kv_b"], out_dtype=jnp.bfloat16)
    a2 = cross_attention(q2, kv2, num_heads=num_heads, head_dim=head_dim)
    hs = matmul_bias(a2, params["attn2_o_w"], params["attn2_o_b"],
                     res=hs, out_dtype=jnp.float32)
    # TODO(synk): encoder_attention_mask (padded text tokens) is not implemented; inputs here are unpadded.

    # ---- 3. feed-forward: fused LN+mod+up-proj+gelu, then fused down-proj+gate+residual+after_proj
    ff_h = lnmod_matmul(hs, scale_mlp, shift_mlp,
                        params["ff_w1"], params["ff_b1"], eps=eps, gelu=True)
    down, left = ff_down_after(ff_h, params["ff_w2"], params["ff_b2"], gate_mlp, hs,
                               params["after_w"], params["after_b"])
    # TODO(synk): dropout (p=0.0, eval mode) is an identity and is intentionally omitted.
    return left, down


# ----------------------------- pure-JAX reference (for a loose correctness check) ------

def _reference_forward(params, hidden, control, enc, timestep, *, num_heads, head_dim, eps=1e-6):
    B, S, D = hidden.shape
    H, Dh = num_heads, head_dim
    f32 = jnp.float32

    def lin(x, w, b):
        return x.astype(f32) @ w.astype(f32) + b

    def ln_mod(x, sc, sh):
        mu = jnp.mean(x, -1, keepdims=True)
        xc = x - mu
        var = jnp.mean(xc * xc, -1, keepdims=True)
        return (xc / jnp.sqrt(var + eps)) * (1.0 + sc) + sh

    def mha(q, k, v):
        qh = q.reshape(B, -1, H, Dh).transpose(0, 2, 1, 3)
        kh = k.reshape(B, -1, H, Dh).transpose(0, 2, 1, 3)
        vh = v.reshape(B, -1, H, Dh).transpose(0, 2, 1, 3)
        s = jnp.einsum('bhqd,bhkd->bhqk', qh, kh) / (Dh ** 0.5)
        p = jax.nn.softmax(s, axis=-1)
        o = jnp.einsum('bhqk,bhkd->bhqd', p, vh)
        return o.transpose(0, 2, 1, 3).reshape(B, -1, D)

    cs = lin(control, params["before_w"], params["before_b"]) + hidden
    mod = params["scale_shift_table"][None] + timestep.reshape(B, 6, D)
    sh_msa, sc_msa, g_msa = mod[:, 0:1], mod[:, 1:2], mod[:, 2:3]
    sh_mlp, sc_mlp, g_mlp = mod[:, 3:4], mod[:, 4:5], mod[:, 5:6]

    qkv = lin(ln_mod(cs, sc_msa, sh_msa), params["attn1_qkv_w"], params["attn1_qkv_b"])
    a1 = mha(qkv[..., :D], qkv[..., D:2 * D], qkv[..., 2 * D:])
    hs = g_msa * lin(a1, params["attn1_o_w"], params["attn1_o_b"]) + cs

    q2 = lin(hs, params["attn2_q_w"], params["attn2_q_b"])
    kv2 = lin(enc, params["attn2_kv_w"], params["attn2_kv_b"])
    a2 = mha(q2, kv2[..., :D], kv2[..., D:])
    hs = lin(a2, params["attn2_o_w"], params["attn2_o_b"]) + hs

    h1 = lin(ln_mod(hs, sc_mlp, sh_mlp), params["ff_w1"], params["ff_b1"])
    c = 0.7978845608028654
    h1 = 0.5 * h1 * (1.0 + jnp.tanh(c * (h1 + 0.044715 * h1 ** 3)))
    down = g_mlp * lin(h1, params["ff_w2"], params["ff_b2"]) + hs
    left = lin(down, params["after_w"], params["after_b"])
    return left, down


# ----------------------------- deterministic param init --------------------------------

def init_params(key, D, C, ff_mult=4):
    keys = iter(jax.random.split(key, 24))

    def w(din, dout):
        return (jax.random.normal(next(keys), (din, dout), jnp.float32) * 0.02).astype(jnp.bfloat16)

    def b(dout):
        return jax.random.normal(next(keys), (dout,), jnp.float32) * 0.02

    p = {}
    # before_proj / after_proj are zero-initialized per the module's __init__
    p["before_w"] = jnp.zeros((D, D), jnp.bfloat16)
    p["before_b"] = jnp.zeros((D,), jnp.float32)
    p["after_w"] = jnp.zeros((D, D), jnp.bfloat16)
    p["after_b"] = jnp.zeros((D,), jnp.float32)
    # ada_norm_single scale/shift table: randn(6, D) / sqrt(D)
    p["scale_shift_table"] = jax.random.normal(next(keys), (6, D), jnp.float32) / (D ** 0.5)
    # self-attention: fused q/k/v projection (attention_bias=True)
    p["attn1_qkv_w"] = jnp.concatenate([w(D, D), w(D, D), w(D, D)], axis=1)
    p["attn1_qkv_b"] = jnp.concatenate([b(D), b(D), b(D)], axis=0)
    p["attn1_o_w"], p["attn1_o_b"] = w(D, D), b(D)
    # cross-attention: q from D, fused k/v from cross_attention_dim C
    p["attn2_q_w"], p["attn2_q_b"] = w(D, D), b(D)
    p["attn2_kv_w"] = jnp.concatenate([w(C, D), w(C, D)], axis=1)
    p["attn2_kv_b"] = jnp.concatenate([b(D), b(D)], axis=0)
    p["attn2_o_w"], p["attn2_o_b"] = w(D, D), b(D)
    # feed-forward (gelu-approximate), inner dim = 4*D
    p["ff_w1"], p["ff_b1"] = w(D, ff_mult * D), b(ff_mult * D)
    p["ff_w2"], p["ff_b2"] = w(ff_mult * D, D), b(D)
    return p


# ----------------------------- main -----------------------------------------------------

if __name__ == "__main__":
    # Small, TPU-friendly config: heads=2, head_dim=128 -> inner_dim=256, cross_attention_dim=256,
    # batch=2, 16 image tokens, 8 text tokens.
    B, S, Se = 2, 16, 8
    H, Dh = 2, 128
    D = H * Dh
    C = D

    key = jax.random.PRNGKey(0)
    k_h, k_c, k_e, k_t, k_p = jax.random.split(key, 5)
    hidden_states = jax.random.normal(k_h, (B, S, D), jnp.float32)
    controlnet_states = jax.random.normal(k_c, (B, S, D), jnp.float32)
    encoder_hidden_states = jax.random.normal(k_e, (B, Se, C), jnp.float32)
    # AdaLayerNormSingle embedding (B, 6*inner_dim), as fed to PixArt transformer blocks.
    timestep = jax.random.normal(k_t, (B, 6 * D), jnp.float32)

    params = init_params(k_p, D=D, C=C)

    fwd = jax.jit(functools.partial(pixart_controlnet_adapter_block,
                                    block_index=0, num_heads=H, head_dim=Dh))
    left, down = fwd(params, hidden_states, controlnet_states,
                     encoder_hidden_states, timestep)
    jax.block_until_ready((left, down))

    assert left.shape == (B, S, D) and down.shape == (B, S, D)
    assert left.dtype == jnp.float32 and down.dtype == jnp.float32
    assert bool(jnp.all(jnp.isfinite(left))) and bool(jnp.all(jnp.isfinite(down)))

    # Loose check against a pure-JAX reference (kernel uses bf16 MXU operands + approx reciprocal).
    ref_left, ref_down = _reference_forward(params, hidden_states, controlnet_states,
                                            encoder_hidden_states, timestep,
                                            num_heads=H, head_dim=Dh)
    err_down = float(jnp.max(jnp.abs(down - ref_down)))
    err_left = float(jnp.max(jnp.abs(left - ref_left)))
    assert err_down < 0.1 and err_left < 0.1, (err_down, err_left)

    print("KERNEL_OK")
</pallas_src>

<mosaic_0001>
module attributes {stable_mosaic.version = 11 : i64} {
  func.func @_mm_kernel(%arg0: i32, %arg1: i32, %arg2: i32, %arg3: i32, %arg4: memref<1x16x256xf32, #tpu.memory_space<vmem>>, %arg5: memref<256x256xbf16, #tpu.memory_space<vmem>>, %arg6: memref<1x256xf32, #tpu.memory_space<vmem>>, %arg7: memref<1x16x256xf32, #tpu.memory_space<vmem>>, %arg8: memref<1x16x256xf32, #tpu.memory_space<vmem>>, %arg9: memref<16x256xf32, #tpu.memory_space<vmem>>) attributes {dimension_semantics = [#tpu.dimension_semantics<parallel>, #tpu.dimension_semantics<parallel>, #tpu.dimension_semantics<parallel>, #tpu.dimension_semantics<arbitrary>], iteration_bounds = array<i64: 2, 1, 1, 1>, scalar_prefetch = 0 : i64, scratch_operands = 1 : i64, tpu.core_type = #tpu.core_type<tc>, window_params = [{transform_indices = @transform_0, window_bounds = array<i64: 1, 16, 256>}, {transform_indices = @transform_1, window_bounds = array<i64: 256, 256>}, {transform_indices = @transform_2, window_bounds = array<i64: 1, 256>}, {transform_indices = @transform_3, window_bounds = array<i64: 1, 16, 256>}, {transform_indices = @transform_4, window_bounds = array<i64: 1, 16, 256>}]} {
    %c0_i32 = arith.constant 0 : i32
    %0 = arith.cmpi eq, %arg3, %c0_i32 : i32
    %1 = arith.extui %0 : i1 to i32
    %c0_i32_0 = arith.constant 0 : i32
    %2 = arith.cmpi ne, %1, %c0_i32_0 : i32
    scf.if %2 {
      %cst_11 = arith.constant 0.000000e+00 : f32
      %14 = vector.broadcast %cst_11 : f32 to vector<16x256xf32>
      %c0_12 = arith.constant 0 : index
      %c0_13 = arith.constant 0 : index
      %15 = vector.load %arg9[%c0_12, %c0_13] : memref<16x256xf32, #tpu.memory_space<vmem>>, vector<16x256xf32>
      tpu.vector_store %arg9[%c0_12, %c0_13], %14 {strides = array<i32>} : memref<16x256xf32, #tpu.memory_space<vmem>>, vector<16x256xf32>,
    } else {
    }
    %c0 = arith.constant 0 : index
    %c0_1 = arith.constant 0 : index
    %c0_2 = arith.constant 0 : index
    %3 = vector.load %arg4[%c0, %c0_1, %c0_2] : memref<1x16x256xf32, #tpu.memory_space<vmem>>, vector<1x16x256xf32>
    %4 = vector.shape_cast %3 : vector<1x16x256xf32> to vector<16x256xf32>
    %5 = arith.truncf %4 : vector<16x256xf32> to vector<16x256xbf16>
    %c0_3 = arith.constant 0 : index
    %c0_4 = arith.constant 0 : index
    %6 = vector.load %arg9[%c0_3, %c0_4] : memref<16x256xf32, #tpu.memory_space<vmem>>, vector<16x256xf32>
    %c0_5 = arith.constant 0 : index
    %c0_6 = arith.constant 0 : index
    %7 = vector.load %arg5[%c0_5, %c0_6] : memref<256x256xbf16, #tpu.memory_space<vmem>>, vector<256x256xbf16>
    %cst = arith.constant dense<0.000000e+00> : vector<16x256xf32>
    %8 = tpu.matmul %5, %7, %cst {dimension_numbers = #tpu.dot_dimension_numbers<[1], [0], [0], [1], [0, 0, 1, 1], [], []>} : vector<16x256xbf16>, vector<256x256xbf16>, vector<16x256xf32> -> vector<16x256xf32>
    %9 = arith.addf %6, %8 : vector<16x256xf32>
    %c0_7 = arith.constant 0 : index
    %c0_8 = arith.constant 0 : index
    %10 = vector.load %arg9[%c0_7, %c0_8] : memref<16x256xf32, #tpu.memory_space<vmem>>, vector<16x256xf32>
    tpu.vector_store %arg9[%c0_7, %c0_8], %9 {strides = array<i32>} : memref<16x256xf32, #tpu.memory_space<vmem>>, vector<16x256xf32>,
    %c0_i32_9 = arith.constant 0 : i32
    %11 = arith.cmpi eq, %arg3, %c0_i32_9 : i32
    %12 = arith.extui %11 : i1 to i32
    %c0_i32_10 = arith.constant 0 : i32
    %13 = arith.cmpi ne, %12, %c0_i32_10 : i32
    scf.if %13 {
      %c0_11 = arith.constant 0 : index
      %c0_12 = arith.constant 0 : index
      %14 = vector.load %arg9[%c0_11, %c0_12] : memref<16x256xf32, #tpu.memory_space<vmem>>, vector<16x256xf32>
      %c0_13 = arith.constant 0 : index
      %c0_14 = arith.constant 0 : index
      %15 = vector.load %arg6[%c0_13, %c0_14] : memref<1x256xf32, #tpu.memory_space<vmem>>, vector<1x256xf32>
      %16 = vector.broadcast %15 : vector<1x256xf32> to vector<16x256xf32>
      %17 = arith.addf %14, %16 : vector<16x256xf32>
      %c0_15 = arith.constant 0 : index
      %c0_16 = arith.constant 0 : index
      %c0_17 = arith.constant 0 : index
      %18 = vector.load %arg7[%c0_15, %c0_16, %c0_17] : memref<1x16x256xf32, #tpu.memory_space<vmem>>, vector<1x16x256xf32>
      %19 = vector.shape_cast %18 : vector<1x16x256xf32> to vector<16x256xf32>
      %20 = arith.addf %17, %19 : vector<16x256xf32>
      %c0_18 = arith.constant 0 : index
      %c0_19 = arith.constant 0 : index
      %c0_20 = arith.constant 0 : index
      %21 = vector.load %arg8[%c0_18, %c0_19, %c0_20] : memref<1x16x256xf32, #tpu.memory_space<vmem>>, vector<1x16x256xf32>
      %22 = vector.shape_cast %21 : vector<1x16x256xf32> to vector<16x256xf32>
      %23 = vector.shape_cast %20 : vector<16x256xf32> to vector<1x16x256xf32>
      tpu.vector_store %arg8[%c0_18, %c0_19, %c0_20], %23 {strides = array<i32>} : memref<1x16x256xf32, #tpu.memory_space<vmem>>, vector<1x16x256xf32>,
    } else {
    }
    return
  }
  func.func @transform_0(%arg0: i32, %arg1: i32, %arg2: i32, %arg3: i32) -> (i32, i32, i32) {
    %c0_i32 = arith.constant 0 : i32
    return %arg0, %arg1, %arg3 : i32, i32, i32
  }
  func.func @transform_1(%arg0: i32, %arg1: i32, %arg2: i32, %arg3: i32) -> (i32, i32) {
    %c0_i32 = arith.constant 0 : i32
    return %arg3, %arg2 : i32, i32
  }
  func.func @transform_2(%arg0: i32, %arg1: i32, %arg2: i32, %arg3: i32) -> (i32, i32) {
    %c0_i32 = arith.constant 0 : i32
    %c0_i32_0 = arith.constant 0 : i32
    return %c0_i32, %arg2 : i32, i32
  }
  func.func @transform_3(%arg0: i32, %arg1: i32, %arg2: i32, %arg3: i32) -> (i32, i32, i32) {
    %c0_i32 = arith.constant 0 : i32
    return %arg0, %arg1, %arg2 : i32, i32, i32
  }
  func.func @transform_4(%arg0: i32, %arg1: i32, %arg2: i32, %arg3: i32) -> (i32, i32, i32) {
    %c0_i32 = arith.constant 0 : i32
    return %arg0, %arg1, %arg2 : i32, i32, i32
  }
}

module attributes {stable_mosaic.version = 11 : i64} {
  func.func @_lnmod_mm_kernel(%arg0: i32, %arg1: i32, %arg2: i32, %arg3: memref<1x16x256xf32, #tpu.memory_space<vmem>>, %arg4: memref<1x1x256xf32, #tpu.memory_space<vmem>>, %arg5: memref<1x1x256xf32, #tpu.memory_space<vmem>>, %arg6: memref<256x384xbf16, #tpu.memory_space<vmem>>, %arg7: memref<1x384xf32, #tpu.memory_space<vmem>>, %arg8: memref<1x16x384xbf16, #tpu.memory_space<vmem>>, %arg9: memref<16x256xbf16, #tpu.memory_space<vmem>>) attributes {dimension_semantics = [#tpu.dimension_semantics<parallel>, #tpu.dimension_semantics<parallel>, #tpu.dimension_semantics<arbitrary>], iteration_bounds = array<i64: 2, 1, 2>, scalar_prefetch = 0 : i64, scratch_operands = 1 : i64, tpu.core_type = #tpu.core_type<tc>, window_params = [{transform_indices = @transform_0, window_bounds = array<i64: 1, 16, 256>}, {transform_indices = @transform_1, window_bounds = array<i64: 1, 1, 256>}, {transform_indices = @transform_2, window_bounds = array<i64: 1, 1, 256>}, {transform_indices = @transform_3, window_bounds = array<i64: 256, 384>}, {transform_indices = @transform_4, window_bounds = array<i64: 1, 384>}, {transform_indices = @transform_5, window_bounds = array<i64: 1, 16, 384>}]} {
    %c0_i32 = arith.constant 0 : i32
    %0 = arith.cmpi eq, %arg2, %c0_i32 : i32
    %1 = arith.extui %0 : i1 to i32
    %c0_i32_0 = arith.constant 0 : i32
    %2 = arith.cmpi ne, %1, %c0_i32_0 : i32
    scf.if %2 {
      %c0_9 = arith.constant 0 : index
      %c0_10 = arith.constant 0 : index
      %c0_11 = arith.constant 0 : index
      %13 = vector.load %arg3[%c0_9, %c0_10, %c0_11] : memref<1x16x256xf32, #tpu.memory_space<vmem>>, vector<1x16x256xf32>
      %14 = vector.shape_cast %13 : vector<1x16x256xf32> to vector<16x256xf32>
      %cst_12 = arith.constant dense<0.000000e+00> : vector<16xf32>
      %15 = vector.multi_reduction <add>, %14, %cst_12 [1] : vector<16x256xf32> to vector<16xf32>
      %16 = vector.shape_cast %15 : vector<16xf32> to vector<16x1xf32>
      %cst_13 = arith.constant 2.560000e+02 : f32
      %17 = vector.broadcast %cst_13 : f32 to vector<16x1xf32>
      %18 = arith.divf %16, %17 : vector<16x1xf32>
      %19 = vector.broadcast %18 : vector<16x1xf32> to vector<16x256xf32>
      %20 = arith.subf %14, %19 : vector<16x256xf32>
      %21 = arith.mulf %20, %20 : vector<16x256xf32>
      %cst_14 = arith.constant dense<0.000000e+00> : vector<16xf32>
      %22 = vector.multi_reduction <add>, %21, %cst_14 [1] : vector<16x256xf32> to vector<16xf32>
      %23 = vector.shape_cast %22 : vector<16xf32> to vector<16x1xf32>
      %cst_15 = arith.constant 2.560000e+02 : f32
      %24 = vector.broadcast %cst_15 : f32 to vector<16x1xf32>
      %25 = arith.divf %23, %24 : vector<16x1xf32>
      %cst_16 = arith.constant 9.99999997E-7 : f32
      %26 = vector.broadcast %cst_16 : f32 to vector<16x1xf32>
      %27 = arith.addf %25, %26 : vector<16x1xf32>
      %28 = math.rsqrt %27 : vector<16x1xf32>
      %29 = vector.broadcast %28 : vector<16x1xf32> to vector<16x256xf32>
      %30 = arith.mulf %20, %29 : vector<16x256xf32>
      %c0_17 = arith.constant 0 : index
      %c0_18 = arith.constant 0 : index
      %c0_19 = arith.constant 0 : index
      %31 = vector.load %arg4[%c0_17, %c0_18, %c0_19] : memref<1x1x256xf32, #tpu.memory_space<vmem>>, vector<1x1x256xf32>
      %32 = vector.shape_cast %31 : vector<1x1x256xf32> to vector<1x256xf32>
      %cst_20 = arith.constant 1.000000e+00 : f32
      %33 = vector.broadcast %cst_20 : f32 to vector<1x256xf32>
      %34 = arith.addf %33, %32 : vector<1x256xf32>
      %35 = vector.broadcast %34 : vector<1x256xf32> to vector<16x256xf32>
      %36 = arith.mulf %30, %35 : vector<16x256xf32>
      %c0_21 = arith.constant 0 : index
      %c0_22 = arith.constant 0 : index
      %c0_23 = arith.constant 0 : index
      %37 = vector.load %arg5[%c0_21, %c0_22, %c0_23] : memref<1x1x256xf32, #tpu.memory_space<vmem>>, vector<1x1x256xf32>
      %38 = vector.shape_cast %37 : vector<1x1x256xf32> to vector<1x256xf32>
      %39 = vector.broadcast %38 : vector<1x256xf32> to vector<16x256xf32>
      %40 = arith.addf %36, %39 : vector<16x256xf32>
      %41 = arith.truncf %40 : vector<16x256xf32> to vector<16x256xbf16>
      %c0_24 = arith.constant 0 : index
      %c0_25 = arith.constant 0 : index
      %42 = vector.load %arg9[%c0_24, %c0_25] : memref<16x256xbf16, #tpu.memory_space<vmem>>, vector<16x256xbf16>
      tpu.vector_store %arg9[%c0_24, %c0_25], %41 {strides = array<i32>} : memref<16x256xbf16, #tpu.memory_space<vmem>>, vector<16x256xbf16>,
    } else {
    }
    %c0 = arith.constant 0 : index
    %c0_1 = arith.constant 0 : index
    %3 = vector.load %arg9[%c0, %c0_1] : memref<16x256xbf16, #tpu.memory_space<vmem>>, vector<16x256xbf16>
    %c0_2 = arith.constant 0 : index
    %c0_3 = arith.constant 0 : index
    %4 = vector.load %arg6[%c0_2, %c0_3] : memref<256x384xbf16, #tpu.memory_space<vmem>>, vector<256x384xbf16>
    %cst = arith.constant dense<0.000000e+00> : vector<16x384xf32>
    %5 = tpu.matmul %3, %4, %cst {dimension_numbers = #tpu.dot_dimension_numbers<[1], [0], [0], [1], [0, 0, 1, 1], [], []>} : vector<16x256xbf16>, vector<256x384xbf16>, vector<16x384xf32> -> vector<16x384xf32>
    %c0_4 = arith.constant 0 : index
    %c0_5 = arith.constant 0 : index
    %6 = vector.load %arg7[%c0_4, %c0_5] : memref<1x384xf32, #tpu.memory_space<vmem>>, vector<1x384xf32>
    %7 = vector.broadcast %6 : vector<1x384xf32> to vector<16x384xf32>
    %8 = arith.addf %5, %7 : vector<16x384xf32>
    %9 = arith.truncf %8 : vector<16x384xf32> to vector<16x384xbf16>
    %c0_6 = arith.constant 0 : index
    %c0_7 = arith.constant 0 : index
    %c0_8 = arith.constant 0 : index
    %10 = vector.load %arg8[%c0_6, %c0_7, %c0_8] : memref<1x16x384xbf16, #tpu.memory_space<vmem>>, vector<1x16x384xbf16>
    %11 = vector.shape_cast %10 : vector<1x16x384xbf16> to vector<16x384xbf16>
    %12 = vector.shape_cast %9 : vector<16x384xbf16> to vector<1x16x384xbf16>
    tpu.vector_store %arg8[%c0_6, %c0_7, %c0_8], %12 {strides = array<i32>} : memref<1x16x384xbf16, #tpu.memory_space<vmem>>, vector<1x16x384xbf16>,
    return
  }
  func.func @transform_0(%arg0: i32, %arg1: i32, %arg2: i32) -> (i32, i32, i32) {
    %c0_i32 = arith.constant 0 : i32
    %c0_i32_0 = arith.constant 0 : i32
    return %arg0, %arg1, %c0_i32 : i32, i32, i32
  }
  func.func @transform_1(%arg0: i32, %arg1: i32, %arg2: i32) -> (i32, i32, i32) {
    %c0_i32 = arith.constant 0 : i32
    %c0_i32_0 = arith.constant 0 : i32
    %c0_i32_1 = arith.constant 0 : i32
    return %arg0, %c0_i32, %c0_i32_0 : i32, i32, i32
  }
  func.func @transform_2(%arg0: i32, %arg1: i32, %arg2: i32) -> (i32, i32, i32) {
    %c0_i32 = arith.constant 0 : i32
    %c0_i32_0 = arith.constant 0 : i32
    %c0_i32_1 = arith.constant 0 : i32
    return %arg0, %c0_i32, %c0_i32_0 : i32, i32, i32
  }
  func.func @transform_3(%arg0: i32, %arg1: i32, %arg2: i32) -> (i32, i32) {
    %c0_i32 = arith.constant 0 : i32
    %c0_i32_0 = arith.constant 0 : i32
    return %c0_i32, %arg2 : i32, i32
  }
  func.func @transform_4(%arg0: i32, %arg1: i32, %arg2: i32) -> (i32, i32) {
    %c0_i32 = arith.constant 0 : i32
    %c0_i32_0 = arith.constant 0 : i32
    return %c0_i32, %arg2 : i32, i32
  }
  func.func @transform_5(%arg0: i32, %arg1: i32, %arg2: i32) -> (i32, i32, i32) {
    %c0_i32 = arith.constant 0 : i32
    return %arg0, %arg1, %arg2 : i32, i32, i32
  }
}

module attributes {stable_mosaic.version = 11 : i64} {
  func.func @_flash_kernel(%arg0: i32, %arg1: i32, %arg2: i32, %arg3: memref<1x16x256xbf16, #tpu.memory_space<vmem>>, %arg4: memref<1x16x256xbf16, #tpu.memory_space<vmem>>, %arg5: memref<1x16x256xbf16, #tpu.memory_space<vmem>>, %arg6: memref<1x16x256xbf16, #tpu.memory_space<vmem>>, %arg7: memref<2x16x1xf32, #tpu.memory_space<vmem>>, %arg8: memref<2x16x1xf32, #tpu.memory_space<vmem>>, %arg9: memref<2x16x128xf32, #tpu.memory_space<vmem>>) attributes {dimension_semantics = [#tpu.dimension_semantics<parallel>, #tpu.dimension_semantics<parallel>, #tpu.dimension_semantics<arbitrary>], iteration_bounds = array<i64: 2, 1, 1>, scalar_prefetch = 0 : i64, scratch_operands = 3 : i64, tpu.core_type = #tpu.core_type<tc>, window_params = [{transform_indices = @transform_0, window_bounds = array<i64: 1, 16, 256>}, {transform_indices = @transform_1, window_bounds = array<i64: 1, 16, 256>}, {transform_indices = @transform_2, window_bounds = array<i64: 1, 16, 256>}, {transform_indices = @transform_3, window_bounds = array<i64: 1, 16, 256>}]} {
    %c0_i32 = arith.constant 0 : i32
    %0 = arith.cmpi eq, %arg2, %c0_i32 : i32
    %1 = arith.extui %0 : i1 to i32
    %c0_i32_0 = arith.constant 0 : i32
    %2 = arith.cmpi ne, %1, %c0_i32_0 : i32
    scf.if %2 {
      %cst_53 = arith.constant 0xFF800000 : f32
      %84 = vector.broadcast %cst_53 : f32 to vector<2x16x1xf32>
      %c0_54 = arith.constant 0 : index
      %c0_55 = arith.constant 0 : index
      %c0_56 = arith.constant 0 : index
      %85 = vector.load %arg7[%c0_54, %c0_55, %c0_56] : memref<2x16x1xf32, #tpu.memory_space<vmem>>, vector<2x16x1xf32>
      tpu.vector_store %arg7[%c0_54, %c0_55, %c0_56], %84 {strides = array<i32>} : memref<2x16x1xf32, #tpu.memory_space<vmem>>, vector<2x16x1xf32>,
      %cst_57 = arith.constant 0.000000e+00 : f32
      %86 = vector.broadcast %cst_57 : f32 to vector<2x16x1xf32>
      %c0_58 = arith.constant 0 : index
      %c0_59 = arith.constant 0 : index
      %c0_60 = arith.constant 0 : index
      %87 = vector.load %arg8[%c0_58, %c0_59, %c0_60] : memref<2x16x1xf32, #tpu.memory_space<vmem>>, vector<2x16x1xf32>
      tpu.vector_store %arg8[%c0_58, %c0_59, %c0_60], %86 {strides = array<i32>} : memref<2x16x1xf32, #tpu.memory_space<vmem>>, vector<2x16x1xf32>,
      %cst_61 = arith.constant 0.000000e+00 : f32
      %88 = vector.broadcast %cst_61 : f32 to vector<2x16x128xf32>
      %c0_62 = arith.constant 0 : index
      %c0_63 = arith.constant 0 : index
      %c0_64 = arith.constant 0 : index
      %89 = vector.load %arg9[%c0_62, %c0_63, %c0_64] : memref<2x16x128xf32, #tpu.memory_space<vmem>>, vector<2x16x128xf32>
      tpu.vector_store %arg9[%c0_62, %c0_63, %c0_64], %88 {strides = array<i32>} : memref<2x16x128xf32, #tpu.memory_space<vmem>>, vector<2x16x128xf32>,
    } else {
    }
    %c0 = arith.constant 0 : index
    %c0_1 = arith.constant 0 : index
    %c0_2 = arith.constant 0 : index
    %3 = vector.load %arg3[%c0, %c0_1, %c0_2] : memref<1x16x256xbf16, #tpu.memory_space<vmem>>, vector<1x16x256xbf16>
    %4 = vector.shape_cast %3 : vector<1x16x256xbf16> to vector<16x256xbf16>
    %c0_3 = arith.constant 0 : index
    %c0_4 = arith.constant 0 : index
    %c0_5 = arith.constant 0 : index
    %5 = vector.load %arg4[%c0_3, %c0_4, %c0_5] : memref<1x16x256xbf16, #tpu.memory_space<vmem>>, vector<1x16x256xbf16>
    %6 = vector.shape_cast %5 : vector<1x16x256xbf16> to vector<16x256xbf16>
    %c0_6 = arith.constant 0 : index
    %c0_7 = arith.constant 0 : index
    %c0_8 = arith.constant 0 : index
    %7 = vector.load %arg5[%c0_6, %c0_7, %c0_8] : memref<1x16x256xbf16, #tpu.memory_space<vmem>>, vector<1x16x256xbf16>
    %8 = vector.shape_cast %7 : vector<1x16x256xbf16> to vector<16x256xbf16>
    %9 = vector.extract_strided_slice %4 {offsets = [0, 0], sizes = [16, 128], strides = [1, 1]} : vector<16x256xbf16> to vector<16x128xbf16>
    %10 = vector.extract_strided_slice %6 {offsets = [0, 0], sizes = [16, 128], strides = [1, 1]} : vector<16x256xbf16> to vector<16x128xbf16>
    %cst = arith.constant dense<0.000000e+00> : vector<16x16xf32>
    %11 = tpu.matmul %9, %10, %cst {dimension_numbers = #tpu.dot_dimension_numbers<[1], [1], [0], [0], [0, 0, 1, 0], [], []>} : vector<16x128xbf16>, vector<16x128xbf16>, vector<16x16xf32> -> vector<16x16xf32>
    %c0_9 = arith.constant 0 : index
    %c0_10 = arith.constant 0 : index
    %c0_11 = arith.constant 0 : index
    %12 = vector.load %arg7[%c0_9, %c0_10, %c0_11] : memref<2x16x1xf32, #tpu.memory_space<vmem>>, vector<1x16x1xf32>
    %13 = vector.shape_cast %12 : vector<1x16x1xf32> to vector<16x1xf32>
    %cst_12 = arith.constant dense<0xFF800000> : vector<16xf32>
    %14 = vector.multi_reduction <maximumf>, %11, %cst_12 [1] : vector<16x16xf32> to vector<16xf32>
    %15 = vector.shape_cast %14 : vector<16xf32> to vector<16x1xf32>
    %16 = arith.maximumf %13, %15 : vector<16x1xf32>
    %17 = arith.subf %13, %16 : vector<16x1xf32>
    %18 = math.exp %17 : vector<16x1xf32>
    %19 = vector.broadcast %16 : vector<16x1xf32> to vector<16x16xf32>
    %20 = arith.subf %11, %19 : vector<16x16xf32>
    %21 = math.exp %20 : vector<16x16xf32>
    %c0_13 = arith.constant 0 : index
    %c0_14 = arith.constant 0 : index
    %c0_15 = arith.constant 0 : index
    %22 = vector.load %arg8[%c0_13, %c0_14, %c0_15] : memref<2x16x1xf32, #tpu.memory_space<vmem>>, vector<1x16x1xf32>
    %23 = vector.shape_cast %22 : vector<1x16x1xf32> to vector<16x1xf32>
    %24 = arith.mulf %18, %23 : vector<16x1xf32>
    %cst_16 = arith.constant dense<0.000000e+00> : vector<16xf32>
    %25 = vector.multi_reduction <add>, %21, %cst_16 [1] : vector<16x16xf32> to vector<16xf32>
    %26 = vector.shape_cast %25 : vector<16xf32> to vector<16x1xf32>
    %27 = arith.addf %24, %26 : vector<16x1xf32>
    %c0_17 = arith.constant 0 : index
    %c0_18 = arith.constant 0 : index
    %c0_19 = arith.constant 0 : index
    %28 = vector.load %arg8[%c0_17, %c0_18, %c0_19] : memref<2x16x1xf32, #tpu.memory_space<vmem>>, vector<1x16x1xf32>
    %29 = vector.shape_cast %28 : vector<1x16x1xf32> to vector<16x1xf32>
    %30 = vector.shape_cast %27 : vector<16x1xf32> to vector<1x16x1xf32>
    tpu.vector_store %arg8[%c0_17, %c0_18, %c0_19], %30 {strides = array<i32>} : memref<2x16x1xf32, #tpu.memory_space<vmem>>, vector<1x16x1xf32>,
    %c0_20 = arith.constant 0 : index
    %c0_21 = arith.constant 0 : index
    %c0_22 = arith.constant 0 : index
    %31 = vector.load %arg9[%c0_20, %c0_21, %c0_22] : memref<2x16x128xf32, #tpu.memory_space<vmem>>, vector<1x16x128xf32>
    %32 = vector.shape_cast %31 : vector<1x16x128xf32> to vector<16x128xf32>
    %33 = vector.broadcast %18 : vector<16x1xf32> to vector<16x128xf32>
    %34 = arith.mulf %33, %32 : vector<16x128xf32>
    %35 = arith.truncf %21 : vector<16x16xf32> to vector<16x16xbf16>
    %36 = vector.extract_strided_slice %8 {offsets = [0, 0], sizes = [16, 128], strides = [1, 1]} : vector<16x256xbf16> to vector<16x128xbf16>
    %cst_23 = arith.constant dense<0.000000e+00> : vector<16x128xf32>
    %37 = tpu.matmul %35, %36, %cst_23 {dimension_numbers = #tpu.dot_dimension_numbers<[1], [0], [0], [1], [0, 0, 1, 1], [], []>} : vector<16x16xbf16>, vector<16x128xbf16>, vector<16x128xf32> -> vector<16x128xf32>
    %38 = arith.addf %34, %37 : vector<16x128xf32>
    %c0_24 = arith.constant 0 : index
    %c0_25 = arith.constant 0 : index
    %c0_26 = arith.constant 0 : index
    %39 = vector.load %arg9[%c0_24, %c0_25, %c0_26] : memref<2x16x128xf32, #tpu.memory_space<vmem>>, vector<1x16x128xf32>
    %40 = vector.shape_cast %39 : vector<1x16x128xf32> to vector<16x128xf32>
    %41 = vector.shape_cast %38 : vector<16x128xf32> to vector<1x16x128xf32>
    tpu.vector_store %arg9[%c0_24, %c0_25, %c0_26], %41 {strides = array<i32>} : memref<2x16x128xf32, #tpu.memory_space<vmem>>, vector<1x16x128xf32>,
    %c0_27 = arith.constant 0 : index
    %c0_28 = arith.constant 0 : index
    %c0_29 = arith.constant 0 : index
    %42 = vector.load %arg7[%c0_27, %c0_28, %c0_29] : memref<2x16x1xf32, #tpu.memory_space<vmem>>, vector<1x16x1xf32>
    %43 = vector.shape_cast %42 : vector<1x16x1xf32> to vector<16x1xf32>
    %44 = vector.shape_cast %16 : vector<16x1xf32> to vector<1x16x1xf32>
    tpu.vector_store %arg7[%c0_27, %c0_28, %c0_29], %44 {strides = array<i32>} : memref<2x16x1xf32, #tpu.memory_space<vmem>>, vector<1x16x1xf32>,
    %45 = vector.extract_strided_slice %4 {offsets = [0, 128], sizes = [16, 128], strides = [1, 1]} : vector<16x256xbf16> to vector<16x128xbf16>
    %46 = vector.extract_strided_slice %6 {offsets = [0, 128], sizes = [16, 128], strides = [1, 1]} : vector<16x256xbf16> to vector<16x128xbf16>
    %cst_30 = arith.constant dense<0.000000e+00> : vector<16x16xf32>
    %47 = tpu.matmul %45, %46, %cst_30 {dimension_numbers = #tpu.dot_dimension_numbers<[1], [1], [0], [0], [0, 0, 1, 0], [], []>} : vector<16x128xbf16>, vector<16x128xbf16>, vector<16x16xf32> -> vector<16x16xf32>
    %c1 = arith.constant 1 : index
    %c0_31 = arith.constant 0 : index
    %c0_32 = arith.constant 0 : index
    %48 = vector.load %arg7[%c1, %c0_31, %c0_32] : memref<2x16x1xf32, #tpu.memory_space<vmem>>, vector<1x16x1xf32>
    %49 = vector.shape_cast %48 : vector<1x16x1xf32> to vector<16x1xf32>
    %cst_33 = arith.constant dense<0xFF800000> : vector<16xf32>
    %50 = vector.multi_reduction <maximumf>, %47, %cst_33 [1] : vector<16x16xf32> to vector<16xf32>
    %51 = vector.shape_cast %50 : vector<16xf32> to vector<16x1xf32>
    %52 = arith.maximumf %49, %51 : vector<16x1xf32>
    %53 = arith.subf %49, %52 : vector<16x1xf32>
    %54 = math.exp %53 : vector<16x1xf32>
    %55 = vector.broadcast %52 : vector<16x1xf32> to vector<16x16xf32>
    %56 = arith.subf %47, %55 : vector<16x16xf32>
    %57 = math.exp %56 : vector<16x16xf32>
    %c1_34 = arith.constant 1 : index
    %c0_35 = arith.constant 0 : index
    %c0_36 = arith.constant 0 : index
    %58 = vector.load %arg8[%c1_34, %c0_35, %c0_36] : memref<2x16x1xf32, #tpu.memory_space<vmem>>, vector<1x16x1xf32>
    %59 = vector.shape_cast %58 : vector<1x16x1xf32> to vector<16x1xf32>
    %60 = arith.mulf %54, %59 : vector<16x1xf32>
    %cst_37 = arith.constant dense<0.000000e+00> : vector<16xf32>
    %61 = vector.multi_reduction <add>, %57, %cst_37 [1] : vector<16x16xf32> to vector<16xf32>
    %62 = vector.shape_cast %61 : vector<16xf32> to vector<16x1xf32>
    %63 = arith.addf %60, %62 : vector<16x1xf32>
    %c1_38 = arith.constant 1 : index
    %c0_39 = arith.constant 0 : index
    %c0_40 = arith.constant 0 : index
    %64 = vector.load %arg8[%c1_38, %c0_39, %c0_40] : memref<2x16x1xf32, #tpu.memory_space<vmem>>, vector<1x16x1xf32>
    %65 = vector.shape_cast %64 : vector<1x16x1xf32> to vector<16x1xf32>
    %66 = vector.shape_cast %63 : vector<16x1xf32> to vector<1x16x1xf32>
    tpu.vector_store %arg8[%c1_38, %c0_39, %c0_40], %66 {strides = array<i32>} : memref<2x16x1xf32, #tpu.memory_space<vmem>>, vector<1x16x1xf32>,
    %c1_41 = arith.constant 1 : index
    %c0_42 = arith.constant 0 : index
    %c0_43 = arith.constant 0 : index
    %67 = vector.load %arg9[%c1_41, %c0_42, %c0_43] : memref<2x16x128xf32, #tpu.memory_space<vmem>>, vector<1x16x128xf32>
    %68 = vector.shape_cast %67 : vector<1x16x128xf32> to vector<16x128xf32>
    %69 = vector.broadcast %54 : vector<16x1xf32> to vector<16x128xf32>
    %70 = arith.mulf %69, %68 : vector<16x128xf32>
    %71 = arith.truncf %57 : vector<16x16xf32> to vector<16x16xbf16>
    %72 = vector.extract_strided_slice %8 {offsets = [0, 128], sizes = [16, 128], strides = [1, 1]} : vector<16x256xbf16> to vector<16x128xbf16>
    %cst_44 = arith.constant dense<0.000000e+00> : vector<16x128xf32>
    %73 = tpu.matmul %71, %72, %cst_44 {dimension_numbers = #tpu.dot_dimension_numbers<[1], [0], [0], [1], [0, 0, 1, 1], [], []>} : vector<16x16xbf16>, vector<16x128xbf16>, vector<16x128xf32> -> vector<16x128xf32>
    %74 = arith.addf %70, %73 : vector<16x128xf32>
    %c1_45 = arith.constant 1 : index
    %c0_46 = arith.constant 0 : index
    %c0_47 = arith.constant 0 : index
    %75 = vector.load %arg9[%c1_45, %c0_46, %c0_47] : memref<2x16x128xf32, #tpu.memory_space<vmem>>, vector<1x16x128xf32>
    %76 = vector.shape_cast %75 : vector<1x16x128xf32> to vector<16x128xf32>
    %77 = vector.shape_cast %74 : vector<16x128xf32> to vector<1x16x128xf32>
    tpu.vector_store %arg9[%c1_45, %c0_46, %c0_47], %77 {strides = array<i32>} : memref<2x16x128xf32, #tpu.memory_space<vmem>>, vector<1x16x128xf32>,
    %c1_48 = arith.constant 1 : index
    %c0_49 = arith.constant 0 : index
    %c0_50 = arith.constant 0 : index
    %78 = vector.load %arg7[%c1_48, %c0_49, %c0_50] : memref<2x16x1xf32, #tpu.memory_space<vmem>>, vector<1x16x1xf32>
    %79 = vector.shape_cast %78 : vector<1x16x1xf32> to vector<16x1xf32>
    %80 = vector.shape_cast %52 : vector<16x1xf32> to vector<1x16x1xf32>
    tpu.vector_store %arg7[%c1_48, %c0_49, %c0_50], %80 {strides = array<i32>} : memref<2x16x1xf32, #tpu.memory_space<vmem>>, vector<1x16x1xf32>,
    %c0_i32_51 = arith.constant 0 : i32
    %81 = arith.cmpi eq, %arg2, %c0_i32_51 : i32
    %82 = arith.extui %81 : i1 to i32
    %c0_i32_52 = arith.constant 0 : i32
    %83 = arith.cmpi ne, %82, %c0_i32_52 : i32
    scf.if %83 {
      %c0_53 = arith.constant 0 : index
      %c0_54 = arith.constant 0 : index
      %c0_55 = arith.constant 0 : index
      %84 = vector.load %arg8[%c0_53, %c0_54, %c0_55] : memref<2x16x1xf32, #tpu.memory_space<vmem>>, vector<1x16x1xf32>
      %85 = vector.shape_cast %84 : vector<1x16x1xf32> to vector<16x1xf32>
      %86 = tpu.reciprocal %85 {approx = true} : vector<16x1xf32> -> vector<16x1xf32>
      %c0_56 = arith.constant 0 : index
      %c0_57 = arith.constant 0 : index
      %c0_58 = arith.constant 0 : index
      %87 = vector.load %arg9[%c0_56, %c0_57, %c0_58] : memref<2x16x128xf32, #tpu.memory_space<vmem>>, vector<1x16x128xf32>
      %88 = vector.shape_cast %87 : vector<1x16x128xf32> to vector<16x128xf32>
      %89 = vector.broadcast %86 : vector<16x1xf32> to vector<16x128xf32>
      %90 = arith.mulf %88, %89 : vector<16x128xf32>
      %91 = arith.truncf %90 : vector<16x128xf32> to vector<16x128xbf16>
      %c0_59 = arith.constant 0 : index
      %c0_60 = arith.constant 0 : index
      %c0_61 = arith.constant 0 : index
      %92 = vector.load %arg6[%c0_59, %c0_60, %c0_61] : memref<1x16x256xbf16, #tpu.memory_space<vmem>>, vector<1x16x128xbf16>
      %93 = vector.shape_cast %92 : vector<1x16x128xbf16> to vector<16x128xbf16>
      %94 = vector.shape_cast %91 : vector<16x128xbf16> to vector<1x16x128xbf16>
      tpu.vector_store %arg6[%c0_59, %c0_60, %c0_61], %94 {strides = array<i32>} : memref<1x16x256xbf16, #tpu.memory_space<vmem>>, vector<1x16x128xbf16>,
      %c1_62 = arith.constant 1 : index
      %c0_63 = arith.constant 0 : index
      %c0_64 = arith.constant 0 : index
      %95 = vector.load %arg8[%c1_62, %c0_63, %c0_64] : memref<2x16x1xf32, #tpu.memory_space<vmem>>, vector<1x16x1xf32>
      %96 = vector.shape_cast %95 : vector<1x16x1xf32> to vector<16x1xf32>
      %97 = tpu.reciprocal %96 {approx = true} : vector<16x1xf32> -> vector<16x1xf32>
      %c1_65 = arith.constant 1 : index
      %c0_66 = arith.constant 0 : index
      %c0_67 = arith.constant 0 : index
      %98 = vector.load %arg9[%c1_65, %c0_66, %c0_67] : memref<2x16x128xf32, #tpu.memory_space<vmem>>, vector<1x16x128xf32>
      %99 = vector.shape_cast %98 : vector<1x16x128xf32> to vector<16x128xf32>
      %100 = vector.broadcast %97 : vector<16x1xf32> to vector<16x128xf32>
      %101 = arith.mulf %99, %100 : vector<16x128xf32>
      %102 = arith.truncf %101 : vector<16x128xf32> to vector<16x128xbf16>
      %c0_68 = arith.constant 0 : index
      %c0_69 = arith.constant 0 : index
      %c128 = arith.constant 128 : index
      %103 = vector.load %arg6[%c0_68, %c0_69, %c128] : memref<1x16x256xbf16, #tpu.memory_space<vmem>>, vector<1x16x128xbf16>
      %104 = vector.shape_cast %103 : vector<1x16x128xbf16> to vector<16x128xbf16>
      %105 = vector.shape_cast %102 : vector<16x128xbf16> to vector<1x16x128xbf16>
      tpu.vector_store %arg6[%c0_68, %c0_69, %c128], %105 {strides = array<i32>} : memref<1x16x256xbf16, #tpu.memory_space<vmem>>, vector<1x16x128xbf16>,
    } else {
    }
    return
  }
  func.func @transform_0(%arg0: i32, %arg1: i32, %arg2: i32) -> (i32, i32, i32) {
    %c0_i32 = arith.constant 0 : i32
    %c0_i32_0 = arith.constant 0 : i32
    return %arg0, %arg1, %c0_i32 : i32, i32, i32
  }
  func.func @transform_1(%arg0: i32, %arg1: i32, %arg2: i32) -> (i32, i32, i32) {
    %c1_i32 = arith.constant 1 : i32
    %c0_i32 = arith.constant 0 : i32
    return %arg0, %arg2, %c1_i32 : i32, i32, i32
  }
  func.func @transform_2(%arg0: i32, %arg1: i32, %arg2: i32) -> (i32, i32, i32) {
    %c2_i32 = arith.constant 2 : i32
    %c0_i32 = arith.constant 0 : i32
    return %arg0, %arg2, %c2_i32 : i32, i32, i32
  }
  func.func @transform_3(%arg0: i32, %arg1: i32, %arg2: i32) -> (i32, i32, i32) {
    %c0_i32 = arith.constant 0 : i32
    %c0_i32_0 = arith.constant 0 : i32
    return %arg0, %arg1, %c0_i32 : i32, i32, i32
  }
}

module attributes {stable_mosaic.version = 11 : i64} {
  func.func @_mm_kernel(%arg0: i32, %arg1: i32, %arg2: i32, %arg3: i32, %arg4: memref<1x16x256xbf16, #tpu.memory_space<vmem>>, %arg5: memref<256x256xbf16, #tpu.memory_space<vmem>>, %arg6: memref<1x256xf32, #tpu.memory_space<vmem>>, %arg7: memref<1x1x256xf32, #tpu.memory_space<vmem>>, %arg8: memref<1x16x256xf32, #tpu.memory_space<vmem>>, %arg9: memref<1x16x256xf32, #tpu.memory_space<vmem>>, %arg10: memref<16x256xf32, #tpu.memory_space<vmem>>) attributes {dimension_semantics = [#tpu.dimension_semantics<parallel>, #tpu.dimension_semantics<parallel>, #tpu.dimension_semantics<parallel>, #tpu.dimension_semantics<arbitrary>], iteration_bounds = array<i64: 2, 1, 1, 1>, scalar_prefetch = 0 : i64, scratch_operands = 1 : i64, tpu.core_type = #tpu.core_type<tc>, window_params = [{transform_indices = @transform_0, window_bounds = array<i64: 1, 16, 256>}, {transform_indices = @transform_1, window_bounds = array<i64: 256, 256>}, {transform_indices = @transform_2, window_bounds = array<i64: 1, 256>}, {transform_indices = @transform_3, window_bounds = array<i64: 1, 1, 256>}, {transform_indices = @transform_4, window_bounds = array<i64: 1, 16, 256>}, {transform_indices = @transform_5, window_bounds = array<i64: 1, 16, 256>}]} {
    %c0_i32 = arith.constant 0 : i32
    %0 = arith.cmpi eq, %arg3, %c0_i32 : i32
    %1 = arith.extui %0 : i1 to i32
    %c0_i32_0 = arith.constant 0 : i32
    %2 = arith.cmpi ne, %1, %c0_i32_0 : i32
    scf.if %2 {
      %cst_11 = arith.constant 0.000000e+00 : f32
      %13 = vector.broadcast %cst_11 : f32 to vector<16x256xf32>
      %c0_12 = arith.constant 0 : index
      %c0_13 = arith.constant 0 : index
      %14 = vector.load %arg10[%c0_12, %c0_13] : memref<16x256xf32, #tpu.memory_space<vmem>>, vector<16x256xf32>
      tpu.vector_store %arg10[%c0_12, %c0_13], %13 {strides = array<i32>} : memref<16x256xf32, #tpu.memory_space<vmem>>, vector<16x256xf32>,
    } else {
    }
    %c0 = arith.constant 0 : index
    %c0_1 = arith.constant 0 : index
    %c0_2 = arith.constant 0 : index
    %3 = vector.load %arg4[%c0, %c0_1, %c0_2] : memref<1x16x256xbf16, #tpu.memory_space<vmem>>, vector<1x16x256xbf16>
    %4 = vector.shape_cast %3 : vector<1x16x256xbf16> to vector<16x256xbf16>
    %c0_3 = arith.constant 0 : index
    %c0_4 = arith.constant 0 : index
    %5 = vector.load %arg10[%c0_3, %c0_4] : memref<16x256xf32, #tpu.memory_space<vmem>>, vector<16x256xf32>
    %c0_5 = arith.constant 0 : index
    %c0_6 = arith.constant 0 : index
    %6 = vector.load %arg5[%c0_5, %c0_6] : memref<256x256xbf16, #tpu.memory_space<vmem>>, vector<256x256xbf16>
    %cst = arith.constant dense<0.000000e+00> : vector<16x256xf32>
    %7 = tpu.matmul %4, %6, %cst {dimension_numbers = #tpu.dot_dimension_numbers<[1], [0], [0], [1], [0, 0, 1, 1], [], []>} : vector<16x256xbf16>, vector<256x256xbf16>, vector<16x256xf32> -> vector<16x256xf32>
    %8 = arith.addf %5, %7 : vector<16x256xf32>
    %c0_7 = arith.constant 0 : index
    %c0_8 = arith.constant 0 : index
    %9 = vector.load %arg10[%c0_7, %c0_8] : memref<16x256xf32, #tpu.memory_space<vmem>>, vector<16x256xf32>
    tpu.vector_store %arg10[%c0_7, %c0_8], %8 {strides = array<i32>} : memref<16x256xf32, #tpu.memory_space<vmem>>, vector<16x256xf32>,
    %c0_i32_9 = arith.constant 0 : i32
    %10 = arith.cmpi eq, %arg3, %c0_i32_9 : i32
    %11 = arith.extui %10 : i1 to i32
    %c0_i32_10 = arith.constant 0 : i32
    %12 = arith.cmpi ne, %11, %c0_i32_10 : i32
    scf.if %12 {
      %c0_11 = arith.constant 0 : index
      %c0_12 = arith.constant 0 : index
      %13 = vector.load %arg10[%c0_11, %c0_12] : memref<16x256xf32, #tpu.memory_space<vmem>>, vector<16x256xf32>
      %c0_13 = arith.constant 0 : index
      %c0_14 = arith.constant 0 : index
      %14 = vector.load %arg6[%c0_13, %c0_14] : memref<1x256xf32, #tpu.memory_space<vmem>>, vector<1x256xf32>
      %15 = vector.broadcast %14 : vector<1x256xf32> to vector<16x256xf32>
      %16 = arith.addf %13, %15 : vector<16x256xf32>
      %c0_15 = arith.constant 0 : index
      %c0_16 = arith.constant 0 : index
      %c0_17 = arith.constant 0 : index
      %17 = vector.load %arg7[%c0_15, %c0_16, %c0_17] : memref<1x1x256xf32, #tpu.memory_space<vmem>>, vector<1x1x256xf32>
      %18 = vector.shape_cast %17 : vector<1x1x256xf32> to vector<1x256xf32>
      %19 = vector.broadcast %18 : vector<1x256xf32> to vector<16x256xf32>
      %20 = arith.mulf %16, %19 : vector<16x256xf32>
      %c0_18 = arith.constant 0 : index
      %c0_19 = arith.constant 0 : index
      %c0_20 = arith.constant 0 : index
      %21 = vector.load %arg8[%c0_18, %c0_19, %c0_20] : memref<1x16x256xf32, #tpu.memory_space<vmem>>, vector<1x16x256xf32>
      %22 = vector.shape_cast %21 : vector<1x16x256xf32> to vector<16x256xf32>
      %23 = arith.addf %20, %22 : vector<16x256xf32>
      %c0_21 = arith.constant 0 : index
      %c0_22 = arith.constant 0 : index
      %c0_23 = arith.constant 0 : index
      %24 = vector.load %arg9[%c0_21, %c0_22, %c0_23] : memref<1x16x256xf32, #tpu.memory_space<vmem>>, vector<1x16x256xf32>
      %25 = vector.shape_cast %24 : vector<1x16x256xf32> to vector<16x256xf32>
      %26 = vector.shape_cast %23 : vector<16x256xf32> to vector<1x16x256xf32>
      tpu.vector_store %arg9[%c0_21, %c0_22, %c0_23], %26 {strides = array<i32>} : memref<1x16x256xf32, #tpu.memory_space<vmem>>, vector<1x16x256xf32>,
    } else {
    }
    return
  }
  func.func @transform_0(%arg0: i32, %arg1: i32, %arg2: i32, %arg3: i32) -> (i32, i32, i32) {
    %c0_i32 = arith.constant 0 : i32
    return %arg0, %arg1, %arg3 : i32, i32, i32
  }
  func.func @transform_1(%arg0: i32, %arg1: i32, %arg2: i32, %arg3: i32) -> (i32, i32) {
    %c0_i32 = arith.constant 0 : i32
    return %arg3, %arg2 : i32, i32
  }
  func.func @transform_2(%arg0: i32, %arg1: i32, %arg2: i32, %arg3: i32) -> (i32, i32) {
    %c0_i32 = arith.constant 0 : i32
    %c0_i32_0 = arith.constant 0 : i32
    return %c0_i32, %arg2 : i32, i32
  }
  func.func @transform_3(%arg0: i32, %arg1: i32, %arg2: i32, %arg3: i32) -> (i32, i32, i32) {
    %c0_i32 = arith.constant 0 : i32
    %c0_i32_0 = arith.constant 0 : i32
    return %arg0, %c0_i32, %arg2 : i32, i32, i32
  }
  func.func @transform_4(%arg0: i32, %arg1: i32, %arg2: i32, %arg3: i32) -> (i32, i32, i32) {
    %c0_i32 = arith.constant 0 : i32
    return %arg0, %arg1, %arg2 : i32, i32, i32
  }
  func.func @transform_5(%arg0: i32, %arg1: i32, %arg2: i32, %arg3: i32) -> (i32, i32, i32) {
    %c0_i32 = arith.constant 0 : i32
    return %arg0, %arg1, %arg2 : i32, i32, i32
  }
}

module attributes {stable_mosaic.version = 11 : i64} {
  func.func @_mm_kernel(%arg0: i32, %arg1: i32, %arg2: i32, %arg3: i32, %arg4: memref<1x16x256xf32, #tpu.memory_space<vmem>>, %arg5: memref<256x256xbf16, #tpu.memory_space<vmem>>, %arg6: memref<1x256xf32, #tpu.memory_space<vmem>>, %arg7: memref<1x16x256xbf16, #tpu.memory_space<vmem>>, %arg8: memref<16x256xf32, #tpu.memory_space<vmem>>) attributes {dimension_semantics = [#tpu.dimension_semantics<parallel>, #tpu.dimension_semantics<parallel>, #tpu.dimension_semantics<parallel>, #tpu.dimension_semantics<arbitrary>], iteration_bounds = array<i64: 2, 1, 1, 1>, scalar_prefetch = 0 : i64, scratch_operands = 1 : i64, tpu.core_type = #tpu.core_type<tc>, window_params = [{transform_indices = @transform_0, window_bounds = array<i64: 1, 16, 256>}, {transform_indices = @transform_1, window_bounds = array<i64: 256, 256>}, {transform_indices = @transform_2, window_bounds = array<i64: 1, 256>}, {transform_indices = @transform_3, window_bounds = array<i64: 1, 16, 256>}]} {
    %c0_i32 = arith.constant 0 : i32
    %0 = arith.cmpi eq, %arg3, %c0_i32 : i32
    %1 = arith.extui %0 : i1 to i32
    %c0_i32_0 = arith.constant 0 : i32
    %2 = arith.cmpi ne, %1, %c0_i32_0 : i32
    scf.if %2 {
      %cst_11 = arith.constant 0.000000e+00 : f32
      %14 = vector.broadcast %cst_11 : f32 to vector<16x256xf32>
      %c0_12 = arith.constant 0 : index
      %c0_13 = arith.constant 0 : index
      %15 = vector.load %arg8[%c0_12, %c0_13] : memref<16x256xf32, #tpu.memory_space<vmem>>, vector<16x256xf32>
      tpu.vector_store %arg8[%c0_12, %c0_13], %14 {strides = array<i32>} : memref<16x256xf32, #tpu.memory_space<vmem>>, vector<16x256xf32>,
    } else {
    }
    %c0 = arith.constant 0 : index
    %c0_1 = arith.constant 0 : index
    %c0_2 = arith.constant 0 : index
    %3 = vector.load %arg4[%c0, %c0_1, %c0_2] : memref<1x16x256xf32, #tpu.memory_space<vmem>>, vector<1x16x256xf32>
    %4 = vector.shape_cast %3 : vector<1x16x256xf32> to vector<16x256xf32>
    %5 = arith.truncf %4 : vector<16x256xf32> to vector<16x256xbf16>
    %c0_3 = arith.constant 0 : index
    %c0_4 = arith.constant 0 : index
    %6 = vector.load %arg8[%c0_3, %c0_4] : memref<16x256xf32, #tpu.memory_space<vmem>>, vector<16x256xf32>
    %c0_5 = arith.constant 0 : index
    %c0_6 = arith.constant 0 : index
    %7 = vector.load %arg5[%c0_5, %c0_6] : memref<256x256xbf16, #tpu.memory_space<vmem>>, vector<256x256xbf16>
    %cst = arith.constant dense<0.000000e+00> : vector<16x256xf32>
    %8 = tpu.matmul %5, %7, %cst {dimension_numbers = #tpu.dot_dimension_numbers<[1], [0], [0], [1], [0, 0, 1, 1], [], []>} : vector<16x256xbf16>, vector<256x256xbf16>, vector<16x256xf32> -> vector<16x256xf32>
    %9 = arith.addf %6, %8 : vector<16x256xf32>
    %c0_7 = arith.constant 0 : index
    %c0_8 = arith.constant 0 : index
    %10 = vector.load %arg8[%c0_7, %c0_8] : memref<16x256xf32, #tpu.memory_space<vmem>>, vector<16x256xf32>
    tpu.vector_store %arg8[%c0_7, %c0_8], %9 {strides = array<i32>} : memref<16x256xf32, #tpu.memory_space<vmem>>, vector<16x256xf32>,
    %c0_i32_9 = arith.constant 0 : i32
    %11 = arith.cmpi eq, %arg3, %c0_i32_9 : i32
    %12 = arith.extui %11 : i1 to i32
    %c0_i32_10 = arith.constant 0 : i32
    %13 = arith.cmpi ne, %12, %c0_i32_10 : i32
    scf.if %13 {
      %c0_11 = arith.constant 0 : index
      %c0_12 = arith.constant 0 : index
      %14 = vector.load %arg8[%c0_11, %c0_12] : memref<16x256xf32, #tpu.memory_space<vmem>>, vector<16x256xf32>
      %c0_13 = arith.constant 0 : index
      %c0_14 = arith.constant 0 : index
      %15 = vector.load %arg6[%c0_13, %c0_14] : memref<1x256xf32, #tpu.memory_space<vmem>>, vector<1x256xf32>
      %16 = vector.broadcast %15 : vector<1x256xf32> to vector<16x256xf32>
      %17 = arith.addf %14, %16 : vector<16x256xf32>
      %18 = arith.truncf %17 : vector<16x256xf32> to vector<16x256xbf16>
      %c0_15 = arith.constant 0 : index
      %c0_16 = arith.constant 0 : index
      %c0_17 = arith.constant 0 : index
      %19 = vector.load %arg7[%c0_15, %c0_16, %c0_17] : memref<1x16x256xbf16, #tpu.memory_space<vmem>>, vector<1x16x256xbf16>
      %20 = vector.shape_cast %19 : vector<1x16x256xbf16> to vector<16x256xbf16>
      %21 = vector.shape_cast %18 : vector<16x256xbf16> to vector<1x16x256xbf16>
      tpu.vector_store %arg7[%c0_15, %c0_16, %c0_17], %21 {strides = array<i32>} : memref<1x16x256xbf16, #tpu.memory_space<vmem>>, vector<1x16x256xbf16>,
    } else {
    }
    return
  }
  func.func @transform_0(%arg0: i32, %arg1: i32, %arg2: i32, %arg3: i32) -> (i32, i32, i32) {
    %c0_i32 = arith.constant 0 : i32
    return %arg0, %arg1, %arg3 : i32, i32, i32
  }
  func.func @transform_1(%arg0: i32, %arg1: i32, %arg2: i32, %arg3: i32) -> (i32, i32) {
    %c0_i32 = arith.constant 0 : i32
    return %arg3, %arg2 : i32, i32
  }
  func.func @transform_2(%arg0: i32, %arg1: i32, %arg2: i32, %arg3: i32) -> (i32, i32) {
    %c0_i32 = arith.constant 0 : i32
    %c0_i32_0 = arith.constant 0 : i32
    return %c0_i32, %arg2 : i32, i32
  }
  func.func @transform_3(%arg0: i32, %arg1: i32, %arg2: i32, %arg3: i32) -> (i32, i32, i32) {
    %c0_i32 = arith.constant 0 : i32
    return %arg0, %arg1, %arg2 : i32, i32, i32
  }
}

module attributes {stable_mosaic.version = 11 : i64} {
  func.func @_mm_kernel(%arg0: i32, %arg1: i32, %arg2: i32, %arg3: i32, %arg4: memref<1x16x256xbf16, #tpu.memory_space<vmem>>, %arg5: memref<256x256xbf16, #tpu.memory_space<vmem>>, %arg6: memref<1x256xf32, #tpu.memory_space<vmem>>, %arg7: memref<1x16x256xf32, #tpu.memory_space<vmem>>, %arg8: memref<1x16x256xf32, #tpu.memory_space<vmem>>, %arg9: memref<16x256xf32, #tpu.memory_space<vmem>>) attributes {dimension_semantics = [#tpu.dimension_semantics<parallel>, #tpu.dimension_semantics<parallel>, #tpu.dimension_semantics<parallel>, #tpu.dimension_semantics<arbitrary>], iteration_bounds = array<i64: 2, 1, 1, 1>, scalar_prefetch = 0 : i64, scratch_operands = 1 : i64, tpu.core_type = #tpu.core_type<tc>, window_params = [{transform_indices = @transform_0, window_bounds = array<i64: 1, 16, 256>}, {transform_indices = @transform_1, window_bounds = array<i64: 256, 256>}, {transform_indices = @transform_2, window_bounds = array<i64: 1, 256>}, {transform_indices = @transform_3, window_bounds = array<i64: 1, 16, 256>}, {transform_indices = @transform_4, window_bounds = array<i64: 1, 16, 256>}]} {
    %c0_i32 = arith.constant 0 : i32
    %0 = arith.cmpi eq, %arg3, %c0_i32 : i32
    %1 = arith.extui %0 : i1 to i32
    %c0_i32_0 = arith.constant 0 : i32
    %2 = arith.cmpi ne, %1, %c0_i32_0 : i32
    scf.if %2 {
      %cst_11 = arith.constant 0.000000e+00 : f32
      %13 = vector.broadcast %cst_11 : f32 to vector<16x256xf32>
      %c0_12 = arith.constant 0 : index
      %c0_13 = arith.constant 0 : index
      %14 = vector.load %arg9[%c0_12, %c0_13] : memref<16x256xf32, #tpu.memory_space<vmem>>, vector<16x256xf32>
      tpu.vector_store %arg9[%c0_12, %c0_13], %13 {strides = array<i32>} : memref<16x256xf32, #tpu.memory_space<vmem>>, vector<16x256xf32>,
    } else {
    }
    %c0 = arith.constant 0 : index
    %c0_1 = arith.constant 0 : index
    %c0_2 = arith.constant 0 : index
    %3 = vector.load %arg4[%c0, %c0_1, %c0_2] : memref<1x16x256xbf16, #tpu.memory_space<vmem>>, vector<1x16x256xbf16>
    %4 = vector.shape_cast %3 : vector<1x16x256xbf16> to vector<16x256xbf16>
    %c0_3 = arith.constant 0 : index
    %c0_4 = arith.constant 0 : index
    %5 = vector.load %arg9[%c0_3, %c0_4] : memref<16x256xf32, #tpu.memory_space<vmem>>, vector<16x256xf32>
    %c0_5 = arith.constant 0 : index
    %c0_6 = arith.constant 0 : index
    %6 = vector.load %arg5[%c0_5, %c0_6] : memref<256x256xbf16, #tpu.memory_space<vmem>>, vector<256x256xbf16>
    %cst = arith.constant dense<0.000000e+00> : vector<16x256xf32>
    %7 = tpu.matmul %4, %6, %cst {dimension_numbers = #tpu.dot_dimension_numbers<[1], [0], [0], [1], [0, 0, 1, 1], [], []>} : vector<16x256xbf16>, vector<256x256xbf16>, vector<16x256xf32> -> vector<16x256xf32>
    %8 = arith.addf %5, %7 : vector<16x256xf32>
    %c0_7 = arith.constant 0 : index
    %c0_8 = arith.constant 0 : index
    %9 = vector.load %arg9[%c0_7, %c0_8] : memref<16x256xf32, #tpu.memory_space<vmem>>, vector<16x256xf32>
    tpu.vector_store %arg9[%c0_7, %c0_8], %8 {strides = array<i32>} : memref<16x256xf32, #tpu.memory_space<vmem>>, vector<16x256xf32>,
    %c0_i32_9 = arith.constant 0 : i32
    %10 = arith.cmpi eq, %arg3, %c0_i32_9 : i32
    %11 = arith.extui %10 : i1 to i32
    %c0_i32_10 = arith.constant 0 : i32
    %12 = arith.cmpi ne, %11, %c0_i32_10 : i32
    scf.if %12 {
      %c0_11 = arith.constant 0 : index
      %c0_12 = arith.constant 0 : index
      %13 = vector.load %arg9[%c0_11, %c0_12] : memref<16x256xf32, #tpu.memory_space<vmem>>, vector<16x256xf32>
      %c0_13 = arith.constant 0 : index
      %c0_14 = arith.constant 0 : index
      %14 = vector.load %arg6[%c0_13, %c0_14] : memref<1x256xf32, #tpu.memory_space<vmem>>, vector<1x256xf32>
      %15 = vector.broadcast %14 : vector<1x256xf32> to vector<16x256xf32>
      %16 = arith.addf %13, %15 : vector<16x256xf32>
      %c0_15 = arith.constant 0 : index
      %c0_16 = arith.constant 0 : index
      %c0_17 = arith.constant 0 : index
      %17 = vector.load %arg7[%c0_15, %c0_16, %c0_17] : memref<1x16x256xf32, #tpu.memory_space<vmem>>, vector<1x16x256xf32>
      %18 = vector.shape_cast %17 : vector<1x16x256xf32> to vector<16x256xf32>
      %19 = arith.addf %16, %18 : vector<16x256xf32>
      %c0_18 = arith.constant 0 : index
      %c0_19 = arith.constant 0 : index
      %c0_20 = arith.constant 0 : index
      %20 = vector.load %arg8[%c0_18, %c0_19, %c0_20] : memref<1x16x256xf32, #tpu.memory_space<vmem>>, vector<1x16x256xf32>
      %21 = vector.shape_cast %20 : vector<1x16x256xf32> to vector<16x256xf32>
      %22 = vector.shape_cast %19 : vector<16x256xf32> to vector<1x16x256xf32>
      tpu.vector_store %arg8[%c0_18, %c0_19, %c0_20], %22 {strides = array<i32>} : memref<1x16x256xf32, #tpu.memory_space<vmem>>, vector<1x16x256xf32>,
    } else {
    }
    return
  }
  func.func @transform_0(%arg0: i32, %arg1: i32, %arg2: i32, %arg3: i32) -> (i32, i32, i32) {
    %c0_i32 = arith.constant 0 : i32
    return %arg0, %arg1, %arg3 : i32, i32, i32
  }
  func.func @transform_1(%arg0: i32, %arg1: i32, %arg2: i32, %arg3: i32) -> (i32, i32) {
    %c0_i32 = arith.constant 0 : i32
    return %arg3, %arg2 : i32, i32
  }
  func.func @transform_2(%arg0: i32, %arg1: i32, %arg2: i32, %arg3: i32) -> (i32, i32) {
    %c0_i32 = arith.constant 0 : i32
    %c0_i32_0 = arith.constant 0 : i32
    return %c0_i32, %arg2 : i32, i32
  }
  func.func @transform_3(%arg0: i32, %arg1: i32, %arg2: i32, %arg3: i32) -> (i32, i32, i32) {
    %c0_i32 = arith.constant 0 : i32
    return %arg0, %arg1, %arg2 : i32, i32, i32
  }
  func.func @transform_4(%arg0: i32, %arg1: i32, %arg2: i32, %arg3: i32) -> (i32, i32, i32) {
    %c0_i32 = arith.constant 0 : i32
    return %arg0, %arg1, %arg2 : i32, i32, i32
  }
}

module attributes {stable_mosaic.version = 11 : i64} {
  func.func @_attn_single_kernel(%arg0: i32, %arg1: i32, %arg2: memref<1x16x256xbf16, #tpu.memory_space<vmem>>, %arg3: memref<1x8x512xbf16, #tpu.memory_space<vmem>>, %arg4: memref<1x16x256xbf16, #tpu.memory_space<vmem>>) attributes {dimension_semantics = [#tpu.dimension_semantics<parallel>, #tpu.dimension_semantics<parallel>], iteration_bounds = array<i64: 2, 1>, scalar_prefetch = 0 : i64, scratch_operands = 0 : i64, tpu.core_type = #tpu.core_type<tc>, window_params = [{transform_indices = @transform_0, window_bounds = array<i64: 1, 16, 256>}, {transform_indices = @transform_1, window_bounds = array<i64: 1, 8, 512>}, {transform_indices = @transform_2, window_bounds = array<i64: 1, 16, 256>}]} {
    %c0 = arith.constant 0 : index
    %c0_0 = arith.constant 0 : index
    %c0_1 = arith.constant 0 : index
    %0 = vector.load %arg2[%c0, %c0_0, %c0_1] : memref<1x16x256xbf16, #tpu.memory_space<vmem>>, vector<1x16x256xbf16>
    %1 = vector.shape_cast %0 : vector<1x16x256xbf16> to vector<16x256xbf16>
    %c0_2 = arith.constant 0 : index
    %c0_3 = arith.constant 0 : index
    %c0_4 = arith.constant 0 : index
    %2 = vector.load %arg3[%c0_2, %c0_3, %c0_4] : memref<1x8x512xbf16, #tpu.memory_space<vmem>>, vector<1x8x512xbf16>
    %3 = vector.shape_cast %2 : vector<1x8x512xbf16> to vector<8x512xbf16>
    %4 = vector.extract_strided_slice %3 {offsets = [0, 0], sizes = [8, 128], strides = [1, 1]} : vector<8x512xbf16> to vector<8x128xbf16>
    %5 = vector.extract_strided_slice %3 {offsets = [0, 256], sizes = [8, 128], strides = [1, 1]} : vector<8x512xbf16> to vector<8x128xbf16>
    %6 = vector.extract_strided_slice %1 {offsets = [0, 0], sizes = [16, 128], strides = [1, 1]} : vector<16x256xbf16> to vector<16x128xbf16>
    %cst = arith.constant dense<0.000000e+00> : vector<16x8xf32>
    %7 = tpu.matmul %6, %4, %cst {dimension_numbers = #tpu.dot_dimension_numbers<[1], [1], [0], [0], [0, 0, 1, 0], [], []>} : vector<16x128xbf16>, vector<8x128xbf16>, vector<16x8xf32> -> vector<16x8xf32>
    %cst_5 = arith.constant dense<0xFF800000> : vector<16xf32>
    %8 = vector.multi_reduction <maximumf>, %7, %cst_5 [1] : vector<16x8xf32> to vector<16xf32>
    %9 = vector.shape_cast %8 : vector<16xf32> to vector<16x1xf32>
    %10 = vector.broadcast %9 : vector<16x1xf32> to vector<16x8xf32>
    %11 = arith.subf %7, %10 : vector<16x8xf32>
    %12 = math.exp %11 : vector<16x8xf32>
    %cst_6 = arith.constant dense<0.000000e+00> : vector<16xf32>
    %13 = vector.multi_reduction <add>, %12, %cst_6 [1] : vector<16x8xf32> to vector<16xf32>
    %14 = vector.shape_cast %13 : vector<16xf32> to vector<16x1xf32>
    %15 = arith.truncf %12 : vector<16x8xf32> to vector<16x8xbf16>
    %cst_7 = arith.constant dense<0.000000e+00> : vector<16x128xf32>
    %16 = tpu.matmul %15, %5, %cst_7 {dimension_numbers = #tpu.dot_dimension_numbers<[1], [0], [0], [1], [0, 0, 1, 1], [], []>} : vector<16x8xbf16>, vector<8x128xbf16>, vector<16x128xf32> -> vector<16x128xf32>
    %17 = tpu.reciprocal %14 {approx = true} : vector<16x1xf32> -> vector<16x1xf32>
    %18 = vector.broadcast %17 : vector<16x1xf32> to vector<16x128xf32>
    %19 = arith.mulf %16, %18 : vector<16x128xf32>
    %20 = arith.truncf %19 : vector<16x128xf32> to vector<16x128xbf16>
    %c0_8 = arith.constant 0 : index
    %c0_9 = arith.constant 0 : index
    %c0_10 = arith.constant 0 : index
    %21 = vector.load %arg4[%c0_8, %c0_9, %c0_10] : memref<1x16x256xbf16, #tpu.memory_space<vmem>>, vector<1x16x128xbf16>
    %22 = vector.shape_cast %21 : vector<1x16x128xbf16> to vector<16x128xbf16>
    %23 = vector.shape_cast %20 : vector<16x128xbf16> to vector<1x16x128xbf16>
    tpu.vector_store %arg4[%c0_8, %c0_9, %c0_10], %23 {strides = array<i32>} : memref<1x16x256xbf16, #tpu.memory_space<vmem>>, vector<1x16x128xbf16>,
    %24 = vector.extract_strided_slice %3 {offsets = [0, 128], sizes = [8, 128], strides = [1, 1]} : vector<8x512xbf16> to vector<8x128xbf16>
    %25 = vector.extract_strided_slice %3 {offsets = [0, 384], sizes = [8, 128], strides = [1, 1]} : vector<8x512xbf16> to vector<8x128xbf16>
    %26 = vector.extract_strided_slice %1 {offsets = [0, 128], sizes = [16, 128], strides = [1, 1]} : vector<16x256xbf16> to vector<16x128xbf16>
    %cst_11 = arith.constant dense<0.000000e+00> : vector<16x8xf32>
    %27 = tpu.matmul %26, %24, %cst_11 {dimension_numbers = #tpu.dot_dimension_numbers<[1], [1], [0], [0], [0, 0, 1, 0], [], []>} : vector<16x128xbf16>, vector<8x128xbf16>, vector<16x8xf32> -> vector<16x8xf32>
    %cst_12 = arith.constant dense<0xFF800000> : vector<16xf32>
    %28 = vector.multi_reduction <maximumf>, %27, %cst_12 [1] : vector<16x8xf32> to vector<16xf32>
    %29 = vector.shape_cast %28 : vector<16xf32> to vector<16x1xf32>
    %30 = vector.broadcast %29 : vector<16x1xf32> to vector<16x8xf32>
    %31 = arith.subf %27, %30 : vector<16x8xf32>
    %32 = math.exp %31 : vector<16x8xf32>
    %cst_13 = arith.constant dense<0.000000e+00> : vector<16xf32>
    %33 = vector.multi_reduction <add>, %32, %cst_13 [1] : vector<16x8xf32> to vector<16xf32>
    %34 = vector.shape_cast %33 : vector<16xf32> to vector<16x1xf32>
    %35 = arith.truncf %32 : vector<16x8xf32> to vector<16x8xbf16>
    %cst_14 = arith.constant dense<0.000000e+00> : vector<16x128xf32>
    %36 = tpu.matmul %35, %25, %cst_14 {dimension_numbers = #tpu.dot_dimension_numbers<[1], [0], [0], [1], [0, 0, 1, 1], [], []>} : vector<16x8xbf16>, vector<8x128xbf16>, vector<16x128xf32> -> vector<16x128xf32>
    %37 = tpu.reciprocal %34 {approx = true} : vector<16x1xf32> -> vector<16x1xf32>
    %38 = vector.broadcast %37 : vector<16x1xf32> to vector<16x128xf32>
    %39 = arith.mulf %36, %38 : vector<16x128xf32>
    %40 = arith.truncf %39 : vector<16x128xf32> to vector<16x128xbf16>
    %c0_15 = arith.constant 0 : index
    %c0_16 = arith.constant 0 : index
    %c128 = arith.constant 128 : index
    %41 = vector.load %arg4[%c0_15, %c0_16, %c128] : memref<1x16x256xbf16, #tpu.memory_space<vmem>>, vector<1x16x128xbf16>
    %42 = vector.shape_cast %41 : vector<1x16x128xbf16> to vector<16x128xbf16>
    %43 = vector.shape_cast %40 : vector<16x128xbf16> to vector<1x16x128xbf16>
    tpu.vector_store %arg4[%c0_15, %c0_16, %c128], %43 {strides = array<i32>} : memref<1x16x256xbf16, #tpu.memory_space<vmem>>, vector<1x16x128xbf16>,
    return
  }
  func.func @transform_0(%arg0: i32, %arg1: i32) -> (i32, i32, i32) {
    %c0_i32 = arith.constant 0 : i32
    %c0_i32_0 = arith.constant 0 : i32
    return %arg0, %arg1, %c0_i32 : i32, i32, i32
  }
  func.func @transform_1(%arg0: i32, %arg1: i32) -> (i32, i32, i32) {
    %c0_i32 = arith.constant 0 : i32
    %c0_i32_0 = arith.constant 0 : i32
    %c0_i32_1 = arith.constant 0 : i32
    return %arg0, %c0_i32, %c0_i32_0 : i32, i32, i32
  }
  func.func @transform_2(%arg0: i32, %arg1: i32) -> (i32, i32, i32) {
    %c0_i32 = arith.constant 0 : i32
    %c0_i32_0 = arith.constant 0 : i32
    return %arg0, %arg1, %c0_i32 : i32, i32, i32
  }
}

module attributes {stable_mosaic.version = 11 : i64} {
  func.func @_mm_kernel(%arg0: i32, %arg1: i32, %arg2: i32, %arg3: i32, %arg4: memref<1x8x256xf32, #tpu.memory_space<vmem>>, %arg5: memref<256x512xbf16, #tpu.memory_space<vmem>>, %arg6: memref<1x512xf32, #tpu.memory_space<vmem>>, %arg7: memref<1x8x512xbf16, #tpu.memory_space<vmem>>, %arg8: memref<8x512xf32, #tpu.memory_space<vmem>>) attributes {dimension_semantics = [#tpu.dimension_semantics<parallel>, #tpu.dimension_semantics<parallel>, #tpu.dimension_semantics<parallel>, #tpu.dimension_semantics<arbitrary>], iteration_bounds = array<i64: 2, 1, 1, 1>, scalar_prefetch = 0 : i64, scratch_operands = 1 : i64, tpu.core_type = #tpu.core_type<tc>, window_params = [{transform_indices = @transform_0, window_bounds = array<i64: 1, 8, 256>}, {transform_indices = @transform_1, window_bounds = array<i64: 256, 512>}, {transform_indices = @transform_2, window_bounds = array<i64: 1, 512>}, {transform_indices = @transform_3, window_bounds = array<i64: 1, 8, 512>}]} {
    %c0_i32 = arith.constant 0 : i32
    %0 = arith.cmpi eq, %arg3, %c0_i32 : i32
    %1 = arith.extui %0 : i1 to i32
    %c0_i32_0 = arith.constant 0 : i32
    %2 = arith.cmpi ne, %1, %c0_i32_0 : i32
    scf.if %2 {
      %cst_11 = arith.constant 0.000000e+00 : f32
      %14 = vector.broadcast %cst_11 : f32 to vector<8x512xf32>
      %c0_12 = arith.constant 0 : index
      %c0_13 = arith.constant 0 : index
      %15 = vector.load %arg8[%c0_12, %c0_13] : memref<8x512xf32, #tpu.memory_space<vmem>>, vector<8x512xf32>
      tpu.vector_store %arg8[%c0_12, %c0_13], %14 {strides = array<i32>} : memref<8x512xf32, #tpu.memory_space<vmem>>, vector<8x512xf32>,
    } else {
    }
    %c0 = arith.constant 0 : index
    %c0_1 = arith.constant 0 : index
    %c0_2 = arith.constant 0 : index
    %3 = vector.load %arg4[%c0, %c0_1, %c0_2] : memref<1x8x256xf32, #tpu.memory_space<vmem>>, vector<1x8x256xf32>
    %4 = vector.shape_cast %3 : vector<1x8x256xf32> to vector<8x256xf32>
    %5 = arith.truncf %4 : vector<8x256xf32> to vector<8x256xbf16>
    %c0_3 = arith.constant 0 : index
    %c0_4 = arith.constant 0 : index
    %6 = vector.load %arg8[%c0_3, %c0_4] : memref<8x512xf32, #tpu.memory_space<vmem>>, vector<8x512xf32>
    %c0_5 = arith.constant 0 : index
    %c0_6 = arith.constant 0 : index
    %7 = vector.load %arg5[%c0_5, %c0_6] : memref<256x512xbf16, #tpu.memory_space<vmem>>, vector<256x512xbf16>
    %cst = arith.constant dense<0.000000e+00> : vector<8x512xf32>
    %8 = tpu.matmul %5, %7, %cst {dimension_numbers = #tpu.dot_dimension_numbers<[1], [0], [0], [1], [0, 0, 1, 1], [], []>} : vector<8x256xbf16>, vector<256x512xbf16>, vector<8x512xf32> -> vector<8x512xf32>
    %9 = arith.addf %6, %8 : vector<8x512xf32>
    %c0_7 = arith.constant 0 : index
    %c0_8 = arith.constant 0 : index
    %10 = vector.load %arg8[%c0_7, %c0_8] : memref<8x512xf32, #tpu.memory_space<vmem>>, vector<8x512xf32>
    tpu.vector_store %arg8[%c0_7, %c0_8], %9 {strides = array<i32>} : memref<8x512xf32, #tpu.memory_space<vmem>>, vector<8x512xf32>,
    %c0_i32_9 = arith.constant 0 : i32
    %11 = arith.cmpi eq, %arg3, %c0_i32_9 : i32
    %12 = arith.extui %11 : i1 to i32
    %c0_i32_10 = arith.constant 0 : i32
    %13 = arith.cmpi ne, %12, %c0_i32_10 : i32
    scf.if %13 {
      %c0_11 = arith.constant 0 : index
      %c0_12 = arith.constant 0 : index
      %14 = vector.load %arg8[%c0_11, %c0_12] : memref<8x512xf32, #tpu.memory_space<vmem>>, vector<8x512xf32>
      %c0_13 = arith.constant 0 : index
      %c0_14 = arith.constant 0 : index
      %15 = vector.load %arg6[%c0_13, %c0_14] : memref<1x512xf32, #tpu.memory_space<vmem>>, vector<1x512xf32>
      %16 = vector.broadcast %15 : vector<1x512xf32> to vector<8x512xf32>
      %17 = arith.addf %14, %16 : vector<8x512xf32>
      %18 = arith.truncf %17 : vector<8x512xf32> to vector<8x512xbf16>
      %c0_15 = arith.constant 0 : index
      %c0_16 = arith.constant 0 : index
      %c0_17 = arith.constant 0 : index
      %19 = vector.load %arg7[%c0_15, %c0_16, %c0_17] : memref<1x8x512xbf16, #tpu.memory_space<vmem>>, vector<1x8x512xbf16>
      %20 = vector.shape_cast %19 : vector<1x8x512xbf16> to vector<8x512xbf16>
      %21 = vector.shape_cast %18 : vector<8x512xbf16> to vector<1x8x512xbf16>
      tpu.vector_store %arg7[%c0_15, %c0_16, %c0_17], %21 {strides = array<i32>} : memref<1x8x512xbf16, #tpu.memory_space<vmem>>, vector<1x8x512xbf16>,
    } else {
    }
    return
  }
  func.func @transform_0(%arg0: i32, %arg1: i32, %arg2: i32, %arg3: i32) -> (i32, i32, i32) {
    %c0_i32 = arith.constant 0 : i32
    return %arg0, %arg1, %arg3 : i32, i32, i32
  }
  func.func @transform_1(%arg0: i32, %arg1: i32, %arg2: i32, %arg3: i32) -> (i32, i32) {
    %c0_i32 = arith.constant 0 : i32
    return %arg3, %arg2 : i32, i32
  }
  func.func @transform_2(%arg0: i32, %arg1: i32, %arg2: i32, %arg3: i32) -> (i32, i32) {
    %c0_i32 = arith.constant 0 : i32
    %c0_i32_0 = arith.constant 0 : i32
    return %c0_i32, %arg2 : i32, i32
  }
  func.func @transform_3(%arg0: i32, %arg1: i32, %arg2: i32, %arg3: i32) -> (i32, i32, i32) {
    %c0_i32 = arith.constant 0 : i32
    return %arg0, %arg1, %arg2 : i32, i32, i32
  }
}

module attributes {stable_mosaic.version = 11 : i64} {
  func.func @_lnmod_mm_kernel(%arg0: i32, %arg1: i32, %arg2: i32, %arg3: memref<1x16x256xf32, #tpu.memory_space<vmem>>, %arg4: memref<1x1x256xf32, #tpu.memory_space<vmem>>, %arg5: memref<1x1x256xf32, #tpu.memory_space<vmem>>, %arg6: memref<256x512xbf16, #tpu.memory_space<vmem>>, %arg7: memref<1x512xf32, #tpu.memory_space<vmem>>, %arg8: memref<1x16x512xbf16, #tpu.memory_space<vmem>>, %arg9: memref<16x256xbf16, #tpu.memory_space<vmem>>) attributes {dimension_semantics = [#tpu.dimension_semantics<parallel>, #tpu.dimension_semantics<parallel>, #tpu.dimension_semantics<arbitrary>], iteration_bounds = array<i64: 2, 1, 2>, scalar_prefetch = 0 : i64, scratch_operands = 1 : i64, tpu.core_type = #tpu.core_type<tc>, window_params = [{transform_indices = @transform_0, window_bounds = array<i64: 1, 16, 256>}, {transform_indices = @transform_1, window_bounds = array<i64: 1, 1, 256>}, {transform_indices = @transform_2, window_bounds = array<i64: 1, 1, 256>}, {transform_indices = @transform_3, window_bounds = array<i64: 256, 512>}, {transform_indices = @transform_4, window_bounds = array<i64: 1, 512>}, {transform_indices = @transform_5, window_bounds = array<i64: 1, 16, 512>}]} {
    %c0_i32 = arith.constant 0 : i32
    %0 = arith.cmpi eq, %arg2, %c0_i32 : i32
    %1 = arith.extui %0 : i1 to i32
    %c0_i32_0 = arith.constant 0 : i32
    %2 = arith.cmpi ne, %1, %c0_i32_0 : i32
    scf.if %2 {
      %c0_13 = arith.constant 0 : index
      %c0_14 = arith.constant 0 : index
      %c0_15 = arith.constant 0 : index
      %26 = vector.load %arg3[%c0_13, %c0_14, %c0_15] : memref<1x16x256xf32, #tpu.memory_space<vmem>>, vector<1x16x256xf32>
      %27 = vector.shape_cast %26 : vector<1x16x256xf32> to vector<16x256xf32>
      %cst_16 = arith.constant dense<0.000000e+00> : vector<16xf32>
      %28 = vector.multi_reduction <add>, %27, %cst_16 [1] : vector<16x256xf32> to vector<16xf32>
      %29 = vector.shape_cast %28 : vector<16xf32> to vector<16x1xf32>
      %cst_17 = arith.constant 2.560000e+02 : f32
      %30 = vector.broadcast %cst_17 : f32 to vector<16x1xf32>
      %31 = arith.divf %29, %30 : vector<16x1xf32>
      %32 = vector.broadcast %31 : vector<16x1xf32> to vector<16x256xf32>
      %33 = arith.subf %27, %32 : vector<16x256xf32>
      %34 = arith.mulf %33, %33 : vector<16x256xf32>
      %cst_18 = arith.constant dense<0.000000e+00> : vector<16xf32>
      %35 = vector.multi_reduction <add>, %34, %cst_18 [1] : vector<16x256xf32> to vector<16xf32>
      %36 = vector.shape_cast %35 : vector<16xf32> to vector<16x1xf32>
      %cst_19 = arith.constant 2.560000e+02 : f32
      %37 = vector.broadcast %cst_19 : f32 to vector<16x1xf32>
      %38 = arith.divf %36, %37 : vector<16x1xf32>
      %cst_20 = arith.constant 9.99999997E-7 : f32
      %39 = vector.broadcast %cst_20 : f32 to vector<16x1xf32>
      %40 = arith.addf %38, %39 : vector<16x1xf32>
      %41 = math.rsqrt %40 : vector<16x1xf32>
      %42 = vector.broadcast %41 : vector<16x1xf32> to vector<16x256xf32>
      %43 = arith.mulf %33, %42 : vector<16x256xf32>
      %c0_21 = arith.constant 0 : index
      %c0_22 = arith.constant 0 : index
      %c0_23 = arith.constant 0 : index
      %44 = vector.load %arg4[%c0_21, %c0_22, %c0_23] : memref<1x1x256xf32, #tpu.memory_space<vmem>>, vector<1x1x256xf32>
      %45 = vector.shape_cast %44 : vector<1x1x256xf32> to vector<1x256xf32>
      %cst_24 = arith.constant 1.000000e+00 : f32
      %46 = vector.broadcast %cst_24 : f32 to vector<1x256xf32>
      %47 = arith.addf %46, %45 : vector<1x256xf32>
      %48 = vector.broadcast %47 : vector<1x256xf32> to vector<16x256xf32>
      %49 = arith.mulf %43, %48 : vector<16x256xf32>
      %c0_25 = arith.constant 0 : index
      %c0_26 = arith.constant 0 : index
      %c0_27 = arith.constant 0 : index
      %50 = vector.load %arg5[%c0_25, %c0_26, %c0_27] : memref<1x1x256xf32, #tpu.memory_space<vmem>>, vector<1x1x256xf32>
      %51 = vector.shape_cast %50 : vector<1x1x256xf32> to vector<1x256xf32>
      %52 = vector.broadcast %51 : vector<1x256xf32> to vector<16x256xf32>
      %53 = arith.addf %49, %52 : vector<16x256xf32>
      %54 = arith.truncf %53 : vector<16x256xf32> to vector<16x256xbf16>
      %c0_28 = arith.constant 0 : index
      %c0_29 = arith.constant 0 : index
      %55 = vector.load %arg9[%c0_28, %c0_29] : memref<16x256xbf16, #tpu.memory_space<vmem>>, vector<16x256xbf16>
      tpu.vector_store %arg9[%c0_28, %c0_29], %54 {strides = array<i32>} : memref<16x256xbf16, #tpu.memory_space<vmem>>, vector<16x256xbf16>,
    } else {
    }
    %c0 = arith.constant 0 : index
    %c0_1 = arith.constant 0 : index
    %3 = vector.load %arg9[%c0, %c0_1] : memref<16x256xbf16, #tpu.memory_space<vmem>>, vector<16x256xbf16>
    %c0_2 = arith.constant 0 : index
    %c0_3 = arith.constant 0 : index
    %4 = vector.load %arg6[%c0_2, %c0_3] : memref<256x512xbf16, #tpu.memory_space<vmem>>, vector<256x512xbf16>
    %cst = arith.constant dense<0.000000e+00> : vector<16x512xf32>
    %5 = tpu.matmul %3, %4, %cst {dimension_numbers = #tpu.dot_dimension_numbers<[1], [0], [0], [1], [0, 0, 1, 1], [], []>} : vector<16x256xbf16>, vector<256x512xbf16>, vector<16x512xf32> -> vector<16x512xf32>
    %c0_4 = arith.constant 0 : index
    %c0_5 = arith.constant 0 : index
    %6 = vector.load %arg7[%c0_4, %c0_5] : memref<1x512xf32, #tpu.memory_space<vmem>>, vector<1x512xf32>
    %7 = vector.broadcast %6 : vector<1x512xf32> to vector<16x512xf32>
    %8 = arith.addf %5, %7 : vector<16x512xf32>
    %cst_6 = arith.constant 5.000000e-01 : f32
    %9 = vector.broadcast %cst_6 : f32 to vector<16x512xf32>
    %10 = arith.mulf %9, %8 : vector<16x512xf32>
    %cst_7 = arith.constant 4.471500e-02 : f32
    %11 = vector.broadcast %cst_7 : f32 to vector<16x512xf32>
    %12 = arith.mulf %11, %8 : vector<16x512xf32>
    %13 = arith.mulf %12, %8 : vector<16x512xf32>
    %14 = arith.mulf %13, %8 : vector<16x512xf32>
    %15 = arith.addf %8, %14 : vector<16x512xf32>
    %cst_8 = arith.constant 0.797884583 : f32
    %16 = vector.broadcast %cst_8 : f32 to vector<16x512xf32>
    %17 = arith.mulf %16, %15 : vector<16x512xf32>
    %18 = math.tanh %17 : vector<16x512xf32>
    %cst_9 = arith.constant 1.000000e+00 : f32
    %19 = vector.broadcast %cst_9 : f32 to vector<16x512xf32>
    %20 = arith.addf %19, %18 : vector<16x512xf32>
    %21 = arith.mulf %10, %20 : vector<16x512xf32>
    %22 = arith.truncf %21 : vector<16x512xf32> to vector<16x512xbf16>
    %c0_10 = arith.constant 0 : index
    %c0_11 = arith.constant 0 : index
    %c0_12 = arith.constant 0 : index
    %23 = vector.load %arg8[%c0_10, %c0_11, %c0_12] : memref<1x16x512xbf16, #tpu.memory_space<vmem>>, vector<1x16x512xbf16>
    %24 = vector.shape_cast %23 : vector<1x16x512xbf16> to vector<16x512xbf16>
    %25 = vector.shape_cast %22 : vector<16x512xbf16> to vector<1x16x512xbf16>
    tpu.vector_store %arg8[%c0_10, %c0_11, %c0_12], %25 {strides = array<i32>} : memref<1x16x512xbf16, #tpu.memory_space<vmem>>, vector<1x16x512xbf16>,
    return
  }
  func.func @transform_0(%arg0: i32, %arg1: i32, %arg2: i32) -> (i32, i32, i32) {
    %c0_i32 = arith.constant 0 : i32
    %c0_i32_0 = arith.constant 0 : i32
    return %arg0, %arg1, %c0_i32 : i32, i32, i32
  }
  func.func @transform_1(%arg0: i32, %arg1: i32, %arg2: i32) -> (i32, i32, i32) {
    %c0_i32 = arith.constant 0 : i32
    %c0_i32_0 = arith.constant 0 : i32
    %c0_i32_1 = arith.constant 0 : i32
    return %arg0, %c0_i32, %c0_i32_0 : i32, i32, i32
  }
  func.func @transform_2(%arg0: i32, %arg1: i32, %arg2: i32) -> (i32, i32, i32) {
    %c0_i32 = arith.constant 0 : i32
    %c0_i32_0 = arith.constant 0 : i32
    %c0_i32_1 = arith.constant 0 : i32
    return %arg0, %c0_i32, %c0_i32_0 : i32, i32, i32
  }
  func.func @transform_3(%arg0: i32, %arg1: i32, %arg2: i32) -> (i32, i32) {
    %c0_i32 = arith.constant 0 : i32
    %c0_i32_0 = arith.constant 0 : i32
    return %c0_i32, %arg2 : i32, i32
  }
  func.func @transform_4(%arg0: i32, %arg1: i32, %arg2: i32) -> (i32, i32) {
    %c0_i32 = arith.constant 0 : i32
    %c0_i32_0 = arith.constant 0 : i32
    return %c0_i32, %arg2 : i32, i32
  }
  func.func @transform_5(%arg0: i32, %arg1: i32, %arg2: i32) -> (i32, i32, i32) {
    %c0_i32 = arith.constant 0 : i32
    return %arg0, %arg1, %arg2 : i32, i32, i32
  }
}

module attributes {stable_mosaic.version = 11 : i64} {
  func.func @_ffdown_after_kernel(%arg0: i32, %arg1: i32, %arg2: i32, %arg3: memref<1x16x512xbf16, #tpu.memory_space<vmem>>, %arg4: memref<512x256xbf16, #tpu.memory_space<vmem>>, %arg5: memref<1x256xf32, #tpu.memory_space<vmem>>, %arg6: memref<1x1x256xf32, #tpu.memory_space<vmem>>, %arg7: memref<1x16x256xf32, #tpu.memory_space<vmem>>, %arg8: memref<256x256xbf16, #tpu.memory_space<vmem>>, %arg9: memref<1x256xf32, #tpu.memory_space<vmem>>, %arg10: memref<1x16x256xf32, #tpu.memory_space<vmem>>, %arg11: memref<1x16x256xf32, #tpu.memory_space<vmem>>, %arg12: memref<16x256xf32, #tpu.memory_space<vmem>>) attributes {dimension_semantics = [#tpu.dimension_semantics<parallel>, #tpu.dimension_semantics<parallel>, #tpu.dimension_semantics<arbitrary>], iteration_bounds = array<i64: 2, 1, 2>, scalar_prefetch = 0 : i64, scratch_operands = 1 : i64, tpu.core_type = #tpu.core_type<tc>, window_params = [{transform_indices = @transform_0, window_bounds = array<i64: 1, 16, 512>}, {transform_indices = @transform_1, window_bounds = array<i64: 512, 256>}, {pipeline_mode = #tpu.pipeline_mode<synchronous>, transform_indices = @transform_2, window_bounds = array<i64: 1, 256>}, {transform_indices = @transform_3, window_bounds = array<i64: 1, 1, 256>}, {transform_indices = @transform_4, window_bounds = array<i64: 1, 16, 256>}, {pipeline_mode = #tpu.pipeline_mode<synchronous>, transform_indices = @transform_5, window_bounds = array<i64: 256, 256>}, {pipeline_mode = #tpu.pipeline_mode<synchronous>, transform_indices = @transform_6, window_bounds = array<i64: 1, 256>}, {transform_indices = @transform_7, window_bounds = array<i64: 1, 16, 256>}, {transform_indices = @transform_8, window_bounds = array<i64: 1, 16, 256>}]} {
    %c0_i32 = arith.constant 0 : i32
    %0 = arith.cmpi eq, %arg2, %c0_i32 : i32
    %1 = arith.extui %0 : i1 to i32
    %c0_i32_0 = arith.constant 0 : i32
    %2 = arith.cmpi ne, %1, %c0_i32_0 : i32
    scf.if %2 {
      %cst_10 = arith.constant 0.000000e+00 : f32
      %13 = vector.broadcast %cst_10 : f32 to vector<16x256xf32>
      %c0_11 = arith.constant 0 : index
      %c0_12 = arith.constant 0 : index
      %14 = vector.load %arg12[%c0_11, %c0_12] : memref<16x256xf32, #tpu.memory_space<vmem>>, vector<16x256xf32>
      tpu.vector_store %arg12[%c0_11, %c0_12], %13 {strides = array<i32>} : memref<16x256xf32, #tpu.memory_space<vmem>>, vector<16x256xf32>,
    } else {
    }
    %c0 = arith.constant 0 : index
    %c0_1 = arith.constant 0 : index
    %3 = vector.load %arg12[%c0, %c0_1] : memref<16x256xf32, #tpu.memory_space<vmem>>, vector<16x256xf32>
    %c0_2 = arith.constant 0 : index
    %c0_3 = arith.constant 0 : index
    %c0_4 = arith.constant 0 : index
    %4 = vector.load %arg3[%c0_2, %c0_3, %c0_4] : memref<1x16x512xbf16, #tpu.memory_space<vmem>>, vector<1x16x512xbf16>
    %5 = vector.shape_cast %4 : vector<1x16x512xbf16> to vector<16x512xbf16>
    %c0_5 = arith.constant 0 : index
    %c0_6 = arith.constant 0 : index
    %6 = vector.load %arg4[%c0_5, %c0_6] : memref<512x256xbf16, #tpu.memory_space<vmem>>, vector<512x256xbf16>
    %cst = arith.constant dense<0.000000e+00> : vector<16x256xf32>
    %7 = tpu.matmul %5, %6, %cst {dimension_numbers = #tpu.dot_dimension_numbers<[1], [0], [0], [1], [0, 0, 1, 1], [], []>} : vector<16x512xbf16>, vector<512x256xbf16>, vector<16x256xf32> -> vector<16x256xf32>
    %8 = arith.addf %3, %7 : vector<16x256xf32>
    %c0_7 = arith.constant 0 : index
    %c0_8 = arith.constant 0 : index
    %9 = vector.load %arg12[%c0_7, %c0_8] : memref<16x256xf32, #tpu.memory_space<vmem>>, vector<16x256xf32>
    tpu.vector_store %arg12[%c0_7, %c0_8], %8 {strides = array<i32>} : memref<16x256xf32, #tpu.memory_space<vmem>>, vector<16x256xf32>,
    %c1_i32 = arith.constant 1 : i32
    %10 = arith.cmpi eq, %arg2, %c1_i32 : i32
    %11 = arith.extui %10 : i1 to i32
    %c0_i32_9 = arith.constant 0 : i32
    %12 = arith.cmpi ne, %11, %c0_i32_9 : i32
    scf.if %12 {
      %c0_10 = arith.constant 0 : index
      %c0_11 = arith.constant 0 : index
      %13 = vector.load %arg12[%c0_10, %c0_11] : memref<16x256xf32, #tpu.memory_space<vmem>>, vector<16x256xf32>
      %c0_12 = arith.constant 0 : index
      %c0_13 = arith.constant 0 : index
      %14 = vector.load %arg5[%c0_12, %c0_13] : memref<1x256xf32, #tpu.memory_space<vmem>>, vector<1x256xf32>
      %15 = vector.broadcast %14 : vector<1x256xf32> to vector<16x256xf32>
      %16 = arith.addf %13, %15 : vector<16x256xf32>
      %c0_14 = arith.constant 0 : index
      %c0_15 = arith.constant 0 : index
      %c0_16 = arith.constant 0 : index
      %17 = vector.load %arg6[%c0_14, %c0_15, %c0_16] : memref<1x1x256xf32, #tpu.memory_space<vmem>>, vector<1x1x256xf32>
      %18 = vector.shape_cast %17 : vector<1x1x256xf32> to vector<1x256xf32>
      %19 = vector.broadcast %18 : vector<1x256xf32> to vector<16x256xf32>
      %20 = arith.mulf %16, %19 : vector<16x256xf32>
      %c0_17 = arith.constant 0 : index
      %c0_18 = arith.constant 0 : index
      %c0_19 = arith.constant 0 : index
      %21 = vector.load %arg7[%c0_17, %c0_18, %c0_19] : memref<1x16x256xf32, #tpu.memory_space<vmem>>, vector<1x16x256xf32>
      %22 = vector.shape_cast %21 : vector<1x16x256xf32> to vector<16x256xf32>
      %23 = arith.addf %20, %22 : vector<16x256xf32>
      %c0_20 = arith.constant 0 : index
      %c0_21 = arith.constant 0 : index
      %c0_22 = arith.constant 0 : index
      %24 = vector.load %arg10[%c0_20, %c0_21, %c0_22] : memref<1x16x256xf32, #tpu.memory_space<vmem>>, vector<1x16x256xf32>
      %25 = vector.shape_cast %24 : vector<1x16x256xf32> to vector<16x256xf32>
      %26 = vector.shape_cast %23 : vector<16x256xf32> to vector<1x16x256xf32>
      tpu.vector_store %arg10[%c0_20, %c0_21, %c0_22], %26 {strides = array<i32>} : memref<1x16x256xf32, #tpu.memory_space<vmem>>, vector<1x16x256xf32>,
      %27 = arith.truncf %23 : vector<16x256xf32> to vector<16x256xbf16>
      %c0_23 = arith.constant 0 : index
      %c0_24 = arith.constant 0 : index
      %28 = vector.load %arg8[%c0_23, %c0_24] : memref<256x256xbf16, #tpu.memory_space<vmem>>, vector<256x256xbf16>
      %cst_25 = arith.constant dense<0.000000e+00> : vector<16x256xf32>
      %29 = tpu.matmul %27, %28, %cst_25 {dimension_numbers = #tpu.dot_dimension_numbers<[1], [0], [0], [1], [0, 0, 1, 1], [], []>} : vector<16x256xbf16>, vector<256x256xbf16>, vector<16x256xf32> -> vector<16x256xf32>
      %c0_26 = arith.constant 0 : index
      %c0_27 = arith.constant 0 : index
      %30 = vector.load %arg9[%c0_26, %c0_27] : memref<1x256xf32, #tpu.memory_space<vmem>>, vector<1x256xf32>
      %31 = vector.broadcast %30 : vector<1x256xf32> to vector<16x256xf32>
      %32 = arith.addf %29, %31 : vector<16x256xf32>
      %c0_28 = arith.constant 0 : index
      %c0_29 = arith.constant 0 : index
      %c0_30 = arith.constant 0 : index
      %33 = vector.load %arg11[%c0_28, %c0_29, %c0_30] : memref<1x16x256xf32, #tpu.memory_space<vmem>>, vector<1x16x256xf32>
      %34 = vector.shape_cast %33 : vector<1x16x256xf32> to vector<16x256xf32>
      %35 = vector.shape_cast %32 : vector<16x256xf32> to vector<1x16x256xf32>
      tpu.vector_store %arg11[%c0_28, %c0_29, %c0_30], %35 {strides = array<i32>} : memref<1x16x256xf32, #tpu.memory_space<vmem>>, vector<1x16x256xf32>,
    } else {
    }
    return
  }
  func.func @transform_0(%arg0: i32, %arg1: i32, %arg2: i32) -> (i32, i32, i32) {
    %c0_i32 = arith.constant 0 : i32
    return %arg0, %arg1, %arg2 : i32, i32, i32
  }
  func.func @transform_1(%arg0: i32, %arg1: i32, %arg2: i32) -> (i32, i32) {
    %c0_i32 = arith.constant 0 : i32
    %c0_i32_0 = arith.constant 0 : i32
    return %arg2, %c0_i32 : i32, i32
  }
  func.func @transform_2(%arg0: i32, %arg1: i32, %arg2: i32) -> (i32, i32) {
    %c0_i32 = arith.constant 0 : i32
    %c0_i32_0 = arith.constant 0 : i32
    %c0_i32_1 = arith.constant 0 : i32
    return %c0_i32, %c0_i32_0 : i32, i32
  }
  func.func @transform_3(%arg0: i32, %arg1: i32, %arg2: i32) -> (i32, i32, i32) {
    %c0_i32 = arith.constant 0 : i32
    %c0_i32_0 = arith.constant 0 : i32
    %c0_i32_1 = arith.constant 0 : i32
    return %arg0, %c0_i32, %c0_i32_0 : i32, i32, i32
  }
  func.func @transform_4(%arg0: i32, %arg1: i32, %arg2: i32) -> (i32, i32, i32) {
    %c0_i32 = arith.constant 0 : i32
    %c0_i32_0 = arith.constant 0 : i32
    return %arg0, %arg1, %c0_i32 : i32, i32, i32
  }
  func.func @transform_5(%arg0: i32, %arg1: i32, %arg2: i32) -> (i32, i32) {
    %c0_i32 = arith.constant 0 : i32
    %c0_i32_0 = arith.constant 0 : i32
    %c0_i32_1 = arith.constant 0 : i32
    return %c0_i32, %c0_i32_0 : i32, i32
  }
  func.func @transform_6(%arg0: i32, %arg1: i32, %arg2: i32) -> (i32, i32) {
    %c0_i32 = arith.constant 0 : i32
    %c0_i32_0 = arith.constant 0 : i32
    %c0_i32_1 = arith.constant 0 : i32
    return %c0_i32, %c0_i32_0 : i32, i32
  }
  func.func @transform_7(%arg0: i32, %arg1: i32, %arg2: i32) -> (i32, i32, i32) {
    %c0_i32 = arith.constant 0 : i32
    %c0_i32_0 = arith.constant 0 : i32
    return %arg0, %arg1, %c0_i32 : i32, i32, i32
  }
  func.func @transform_8(%arg0: i32, %arg1: i32, %arg2: i32) -> (i32, i32, i32) {
    %c0_i32 = arith.constant 0 : i32
    %c0_i32_0 = arith.constant 0 : i32
    return %arg0, %arg1, %c0_i32 : i32, i32, i32
  }
}

</mosaic_0001>

<bundles_post_ra>
// kernel: pixart_controlnet_adapter_block.10
= control target key start
LH: loop header
LB: loop body
LE: loop exit
PB: predicated region body
PF: predicated region fallthrough
CT: control target
= control target key end

     0   :  { %s1040_s15 = smov 0   ;;  %s1042_s16 = smov 0   ;;  %s1186_s0 = inlined_call_operand.vmem [shape: f32[2,16,256], index: 0, kind: input, shape index: {}]   ;;  %s1187_s1 = inlined_call_operand.vmem [shape: bf16[256,256], index: 1, kind: input, shape index: {}]   ;;  %s1188_s2 = inlined_call_operand.vmem [shape: f32[1,256], index: 2, kind: input, shape index: {}]   ;;  %s1189_s3 = inlined_call_operand.vmem [shape: f32[2,16,256], index: 3, kind: input, shape index: {}]   ;;  %s1190_s4 = inlined_call_operand.vmem [shape: f32[2,16,256], index: 4, kind: output, shape index: {}]  }
   0x1   :  { %s1044_s17 = smov 0  }
   0x2 LB: > { %s40_s18 = sadd.s32 1, %s1009_s16  ;;  %p875_p0 = scmp.ge.s32.totalorder %s1013_s17, 1  ;;  %s1013_s17 = sphi %s1044_s17, %s14_s17   ;;  %s1009_s16 = sphi %s1042_s16, %s1192_s16   ;;  %s1005_s15 = sphi %s1040_s15, %s1191_s15  }
   0x3   : > { %p42_p1 = scmp.ge.s32.totalorder %s40_s18, 2  ;;  %p261_p2 = scmp.lt.s32.totalorder %s1013_s17, 3 }
   0x5   : > { %s1194_s18 = smov (%p42_p1, %s40_s18), 0  ;;  %p262_p3 = pnand %p875_p0, %p261_p2 }
   0x6   : > { %v943_v0 = vld [vmem:[%s1187_s1 + $0x4] ss:$8 sps:$4 sm:$0xff] (!%p262_p3)   ;;  %v945_v1 = vld [vmem:[%s1187_s1] ss:$8 sps:$4 sm:$0xff] (!%p262_p3)   ;;  %v946_v2 = vld [vmem:[%s1187_s1 + $0x14] ss:$8 sps:$4 sm:$0xff] (!%p262_p3)   ;;  %v668_v38 = vlaneseq (!%p262_p3) }
   0x7   : > { %265 = sbr.rel (%p262_p3) target bundleno = 291 (0x123), region = 36  ;;  %608 = vmatprep.subr.bf16.mxu0 (!%p262_p3), %v943_v0  ;;  %v948_v3 = vld [vmem:[%s1187_s1 + $0x10] ss:$8 sps:$4 sm:$0xff] (!%p262_p3)   ;;  %v949_v4 = vld [vmem:[%s1187_s1 + $0x24] ss:$8 sps:$4 sm:$0xff] (!%p262_p3)   ;;  %p335_p4 = scmp.lt.s32.totalorder (!%p262_p3), %s1005_s15, 1 }
   0x8   : > { %609 = vmatpush1.bf16.msra.mxu0 (!%p262_p3), %v945_v1  ;;  %v951_v5 = vld [vmem:[%s1187_s1 + $0x20] ss:$8 sps:$4 sm:$0xff] (!%p262_p3)   ;;  %v952_v6 = vld [vmem:[%s1187_s1 + $0x34] ss:$8 sps:$4 sm:$0xff] (!%p262_p3)   ;;  %v954_v7 = vld [vmem:[%s1187_s1 + $0x30] ss:$8 sps:$4 sm:$0xff] (!%p262_p3)  }
   0x9   : > { %610 = vmatprep.subr.bf16.mxu0 (!%p262_p3), %v946_v2  ;;  %v955_v8 = vld [vmem:[%s1187_s1 + $0x44] ss:$8 sps:$4 sm:$0xff] (!%p262_p3)   ;;  %v957_v9 = vld [vmem:[%s1187_s1 + $0x40] ss:$8 sps:$4 sm:$0xff] (!%p262_p3)   ;;  %v958_v10 = vld [vmem:[%s1187_s1 + $0x54] ss:$8 sps:$4 sm:$0xff] (!%p262_p3)  }
   0xa   : > { %v960_v11 = vld [vmem:[%s1187_s1 + $0x50] ss:$8 sps:$4 sm:$0xff] (!%p262_p3)   ;;  %v961_v12 = vld [vmem:[%s1187_s1 + $0x64] ss:$8 sps:$4 sm:$0xff] (!%p262_p3)   ;;  %v963_v16 = vld [vmem:[%s1187_s1 + $0x60] ss:$8 sps:$4 sm:$0xff] (!%p262_p3)  }
   0xb   : > { %v964_v17 = vld [vmem:[%s1187_s1 + $0x74] ss:$8 sps:$4 sm:$0xff] (!%p262_p3)   ;;  %v966_v18 = vld [vmem:[%s1187_s1 + $0x70] ss:$8 sps:$4 sm:$0xff] (!%p262_p3)   ;;  %v967_v19 = vld [vmem:[%s1187_s1 + $0x84] ss:$8 sps:$4 sm:$0xff] (!%p262_p3)  }
   0xc   : > { %611 = vmatpush1.bf16.msra.mxu0 (!%p262_p3), %v948_v3  ;;  %v969_v20 = vld [vmem:[%s1187_s1 + $0x80] ss:$8 sps:$4 sm:$0xff] (!%p262_p3)   ;;  %v970_v21 = vld [vmem:[%s1187_s1 + $0x94] ss:$8 sps:$4 sm:$0xff] (!%p262_p3)   ;;  %v972_v22 = vld [vmem:[%s1187_s1 + $0x90] ss:$8 sps:$4 sm:$0xff] (!%p262_p3)  }
   0xd   : > { %612 = vmatprep.subr.bf16.mxu0 (!%p262_p3), %v949_v4  ;;  %v973_v23 = vld [vmem:[%s1187_s1 + $0xa4] ss:$8 sps:$4 sm:$0xff] (!%p262_p3)   ;;  %v975_v24 = vld [vmem:[%s1187_s1 + $0xa0] ss:$8 sps:$4 sm:$0xff] (!%p262_p3)   ;;  %v976_v25 = vld [vmem:[%s1187_s1 + $0xb4] ss:$8 sps:$4 sm:$0xff] (!%p262_p3)  }
   0xe   : > { %s1196_s15 = smov (!%p335_p4, %s1005_s15), 1  ;;  %v978_v26 = vld [vmem:[%s1187_s1 + $0xb0] ss:$8 sps:$4 sm:$0xff]   ;;  %v979_v27 = vld [vmem:[%s1187_s1 + $0xc4] ss:$8 sps:$4 sm:$0xff]   ;;  %v669_v39 = vshrl.u32 %v668_v38, 7 }
   0xf   : > { %s1088_s13 = sshll.u32 %s1196_s15, 5  ;;  %v981_v28 = vld [vmem:[%s1187_s1 + $0xc0] ss:$8 sps:$4 sm:$0xff]   ;;  %v982_v29 = vld [vmem:[%s1187_s1 + $0xd4] ss:$8 sps:$4 sm:$0xff]  }
  0x10   : > { %613 = vmatpush1.bf16.msra.mxu0 %v951_v5  ;;  %s1097_s22 = scalar_lea.vmem %s1186_s0, %s1088_s13  ;;  %v984_v30 = vld [vmem:[%s1187_s1 + $0xd0] ss:$8 sps:$4 sm:$0xff]   ;;  %v985_v31 = vld [vmem:[%s1187_s1 + $0xe4] ss:$8 sps:$4 sm:$0xff]   ;;  %v987_v32 = vld [vmem:[%s1187_s1 + $0xe0] ss:$8 sps:$4 sm:$0xff]   ;;  %s379_s26 = scalar_lea.vmem %s1189_s3, %s1088_s13 }
  0x11   : > { %614 = vmatprep.subr.bf16.mxu0 %v952_v6  ;;  %v407_v13 = vld [vmem:[%s1097_s22 + $0x8] sm:$0xff]  ;;  %v409_v14 = vld [vmem:[%s1097_s22 + $0x18] sm:$0xff]  ;;  %v406_v35 = vld [vmem:[%s1097_s22] sm:$0xff]  ;;  %v670_v40 = vsub.s32 0, %v669_v39  ;;  %v674_v42 = vsub.s32 1, %v669_v39  ;;  %s395_s28 = scalar_lea.vmem %s1190_s4, %s1088_s13 }
  0x12   : > { %v411_v15 = vpack.c.bf16 %v409_v14, %v407_v13  ;;  %v988_v33 = vld [vmem:[%s1187_s1 + $0xf4] ss:$8 sps:$4 sm:$0xff]   ;;  %v990_v34 = vld [vmem:[%s1187_s1 + $0xf0] ss:$8 sps:$4 sm:$0xff]   ;;  %v666_v41 = vld [vmem:[%s1188_s2] sm:$0x3] }
  0x13   : > { %v408_v36 = vld [vmem:[%s1097_s22 + $0x10] sm:$0xff]  ;;  %v671_v43 = vrot.slane %v666_v41, %v670_v40  ;;  %v675_v44 = vrot.slane %v666_v41, %v674_v42  ;;  %v682_v46 = vld [vmem:[%s379_s26] sm:$0xff]  ;;  %v683_v49 = vld [vmem:[%s379_s26 + $0x8] sm:$0xff] }
  0x14   : > { %615 = vmatpush1.bf16.msra.mxu0 %v954_v7  ;;  %640 = vmatprep.mubr.bf16.mxu0 %v411_v15  ;;  %v410_v37 = vpack.c.bf16 %v408_v36, %v406_v35  ;;  %v684_v52 = vld [vmem:[%s379_s26 + $0x10] sm:$0xff]  ;;  %v685_v56 = vld [vmem:[%s379_s26 + $0x18] sm:$0xff] }
  0x15   : > { %616 = vmatprep.subr.bf16.mxu0 %v955_v8 }
  0x18   : > { %617 = vmatpush1.bf16.msra.mxu0 %v957_v9 }
  0x19   : > { %618 = vmatprep.subr.bf16.mxu0 %v958_v10 }
  0x1c   : > { %619 = vmatpush1.bf16.msra.mxu0 %v960_v11 }
  0x1d   : > { %620 = vmatprep.subr.bf16.mxu0 %v961_v12 }
  0x20   : > { %621 = vmatpush1.bf16.msra.mxu0 %v963_v16 }
  0x21   : > { %622 = vmatprep.subr.bf16.mxu0 %v964_v17 }
  0x24   : > { %623 = vmatpush1.bf16.msra.mxu0 %v966_v18 }
  0x25   : > { %624 = vmatprep.subr.bf16.mxu0 %v967_v19 }
  0x28   : > { %625 = vmatpush1.bf16.msra.mxu0 %v969_v20 }
  0x29   : > { %626 = vmatprep.subr.bf16.mxu0 %v970_v21 }
  0x2c   : > { %627 = vmatpush1.bf16.msra.mxu0 %v972_v22 }
  0x2d   : > { %628 = vmatprep.subr.bf16.mxu0 %v973_v23 }
  0x30   : > { %629 = vmatpush1.bf16.msra.mxu0 %v975_v24 }
  0x31   : > { %630 = vmatprep.subr.bf16.mxu0 %v976_v25 }
  0x34   : > { %631 = vmatpush1.bf16.msra.mxu0 %v978_v26 }
  0x35   : > { %632 = vmatprep.subr.bf16.mxu0 %v979_v27 }
  0x38   : > { %633 = vmatpush1.bf16.msra.mxu0 %v981_v28 }
  0x39   : > { %634 = vmatprep.subr.bf16.mxu0 %v982_v29 }
  0x3c   : > { %635 = vmatpush1.bf16.msra.mxu0 %v984_v30 }
  0x3d   : > { %636 = vmatprep.subr.bf16.mxu0 %v985_v31 }
  0x40   : > { %637 = vmatpush1.bf16.msra.mxu0 %v987_v32 }
  0x41   : > { %638 = vmatprep.subr.bf16.mxu0 %v988_v33 }
  0x44   : > { %639 = vmatpush1.bf16.msra.mxu0 %v990_v34 }
  0x47   : > { %641 = vmatmul.mubr.bf16.vlgmr.msra.gmra.mrb[0].mxu0 %v410_v37 }
 0x11a   : > { %v642_v45 = vpop.f32.mrb[0].mxu0 }
 0x11b   : > { %v678_v47 = vadd.f32 %v671_v43, %v642_v45  ;;  %v644_v48 = vpop.f32.mrb[1].mxu0 }
 0x11c   : > { %v679_v50 = vadd.f32 %v675_v44, %v644_v48  ;;  %v646_v51 = vpop.f32.mrb[2].mxu0 }
 0x11d   : > { %v686_v53 = vadd.f32 %v682_v46, %v678_v47  ;;  %v680_v54 = vadd.f32 %v671_v43, %v646_v51  ;;  %v648_v55 = vpop.f32.mrb[3].mxu0 }
 0x11e   : > { %v687_v57 = vadd.f32 %v683_v49, %v679_v50  ;;  %v681_v58 = vadd.f32 %v675_v44, %v648_v55 }
 0x11f   : > { %690 = vst [vmem:[%s395_s28] sm:$0xff] %v686_v53  ;;  %v688_v59 = vadd.f32 %v684_v52, %v680_v54 }
 0x120   : > { %691 = vst [vmem:[%s395_s28 + $0x8] sm:$0xff] %v687_v57  ;;  %v689_v60 = vadd.f32 %v685_v56, %v681_v58 }
 0x121   : > { %692 = vst [vmem:[%s395_s28 + $0x10] sm:$0xff] %v688_v59 }
 0x122   : > { %693 = vst [vmem:[%s395_s28 + $0x18] sm:$0xff] %v689_v60 }
 0x123 PF: > { %s14_s17 = sadd.s32 1, %s1013_s17   ;;  %s1191_s15 = smov %s1009_s16 }
 0x124   : > { %p11_p5 = scmp.ge.s32.totalorder %s14_s17, 4   ;;  %s1192_s16 = smov %s1194_s18 }
 0x126   :  { %13 = sbr.rel (!%p11_p5) target bundleno = 2 (0x2), region = 83 }

// kernel: pixart_controlnet_adapter_block.11
= control target key start
LH: loop header
LB: loop body
LE: loop exit
PB: predicated region body
PF: predicated region fallthrough
CT: control target
= control target key end

     0   :  { %s1955_s0 = inlined_call_operand.vmem [shape: f32[2,16,256], index: 0, kind: input, shape index: {}]   ;;  %s1956_s1 = inlined_call_operand.vmem [shape: f32[2,1,256], index: 1, kind: input, shape index: {}]   ;;  %s1957_s2 = inlined_call_operand.vmem [shape: f32[2,1,256], index: 2, kind: input, shape index: {}]   ;;  %s1958_s3 = inlined_call_operand.vmem [shape: bf16[256,768], index: 3, kind: input, shape index: {}]   ;;  %s1959_s4 = inlined_call_operand.vmem [shape: f32[1,768], index: 4, kind: input, shape index: {}]   ;;  %s1960_s5 = inlined_call_operand.vmem [shape: bf16[2,16,768], index: 5, kind: output, shape index: {}]  }
   0x1   :  { %1965 = sst [smem:[#allocation10_spill]] %s1958_s3 }
   0x2   :  { %s1611_s18 = smov 0   ;;  %s1613_s19 = smov 0  }
   0x3   :  { %s1615_s20 = smov 0   ;;  %s1617_s21 = smov 0  }
   0x4   :  { %s1619_s22 = smov 0   ;;  %s1621_s23 = smov 0  }
   0x5   :  { %s1623_s24 = smov 0   ;;  %s1625_s25 = smov 0  }
   0x6   :  { %s1627_s26 = smov 0  }
   0x7 LB: > { %1966 = sst [smem:[#allocation5_spill]] %s1571_s24  ;;  %s1203_s27 = sadd.s32 4294967295, %s1579_s26   ;;  %s1579_s26 = sphi %s1627_s26, %s15_s26   ;;  %s1575_s25 = sphi %s1625_s25, %s1977_s25   ;;  %s1571_s24 = sphi %s1623_s24, %s1976_s24   ;;  %s1567_s23 = sphi %s1621_s23, %s1982_s23   ;;  %s1563_s22 = sphi %s1619_s22, %s1974_s22   ;;  %s1559_s21 = sphi %s1617_s21, %s1981_s21   ;;  %s1555_s20 = sphi %s1615_s20, %s1980_s20   ;;  %s1551_s19 = sphi %s1613_s19, %s1979_s19   ;;  %s1547_s18 = sphi %s1611_s18, %s1978_s18  }
   0x8   : > { %1967 = sst [smem:[#allocation6_spill]] %s1575_s25  ;;  %s27_s28 = sadd.s32 1, %s1571_s24 }
   0x9   : > { %p28_p0 = scmp.ge.s32.totalorder %s27_s28, 2  ;;  %s34_s29 = sadd.s32 1, %s1575_s25 }
   0xa   : > { %s121_s30 = sadd.s32 1, %s1559_s21  ;;  %p128_p1 = scmp.ne.s32.totalorder %s1559_s21, %s1555_s20 }
   0xb   : > { %s1984_s28 = smov (%p28_p0, %s27_s28), 0  ;;  %s1986_s29 = smov (!%p28_p0, %s34_s29), %s1575_s25 }
   0xc   : > { %1968 = sst [smem:[#allocation7_spill]] %s1984_s28  ;;  %s118_s6 = ssub.s32 %s1571_s24, %s1984_s28 }
   0xd   : > { %p129_p2 = scmp.eq.s32.totalorder %s1579_s26, 0  ;;  %p36_p3 = scmp.ge.s32.totalorder %s1986_s29, 2 }
   0xe   : > { %p119_p4 = scmp.eq.s32.totalorder %s118_s6, 0  ;;  %s177_s7 = sadd.s32 1, %s1551_s19 }
   0xf   : > { %p130_p5 = por %p129_p2, %p128_p1  ;;  %s1988_s29 = smov (%p36_p3, %s1986_s29), 0 }
  0x10   : > { %1969 = sst [smem:[#allocation8_spill]] %s1988_s29  ;;  %s170_s9 = ssub.s32 %s1575_s25, %s1988_s29 }
  0x11   : > { %s1672_s8 = scalar_select %p119_p4, %s1559_s21, %s121_s30  }
  0x12   : > { %p187_p6 = scmp.ne.s32.totalorder %s1551_s19, %s1547_s18  ;;  %s174_s10 = sor.u32 %s170_s9, %s118_s6 }
  0x13   : > { %1970 = sst [smem:[#allocation9_spill]] %s1672_s8  ;;  %p188_p7 = scmp.eq.s32.totalorder %s1203_s27, 3 }
  0x14   : > { %p175_p8 = scmp.eq.s32.totalorder %s174_s10, 0  ;;  %p1206_p10 = scmp.ge.s32.totalorder %s1579_s26, 4 }
  0x15   : > { %p1678_p9 = por %p188_p7, %p187_p6 }
  0x16   : > { %s1683_s12 = scalar_select %p175_p8, %s1551_s19, %s177_s7  }
  0x17   : > { %210 = sbr.rel (%p1206_p10) target bundleno = 76 (0x4c), region = 16 }
  0x1e   : > { %241 = sbr.rel (!%p130_p5) target bundleno = 76 (0x4c), region = 32  ;;  %s243_s13 = sand.u32 (%p130_p5), 1, %s1559_s21  }
  0x1f   : > { %s1337_s14 = smul.u32 (%p130_p5), 12, %s1571_s24  ;;  %s1972_s3 = sld [smem:[#allocation10_spill]] (%p130_p5) }
  0x20   : > { %s1365_s15 = smul.u32 (%p130_p5), 384, %s243_s13 }
  0x22   : > { %s1696_s30 = scalar_lea.vmem (%p130_p5), [#allocation3], %s1365_s15 }
  0x25   : > { %s1691_s27 = scalar_lea.vmem %s1972_s3, %s1337_s14 }
  0x26   : > { %v263_v0 = vld [vmem:[%s1691_s27] sm:$0xff]  ;;  %v265_v1 = vld [vmem:[%s1691_s27 + $0x18] sm:$0xff]  ;;  %v267_v2 = vld [vmem:[%s1691_s27 + $0x30] sm:$0xff] }
  0x27   : > { %264 = vst [vmem:[%s1696_s30] sm:$0xff] %v263_v0  ;;  %266 = vst [vmem:[%s1696_s30 + $0xc] sm:$0xff] %v265_v1  ;;  %v269_v3 = vld [vmem:[%s1691_s27 + $0x48] sm:$0xff]  ;;  %v271_v4 = vld [vmem:[%s1691_s27 + $0x60] sm:$0xff] }
  0x28   : > { %268 = vst [vmem:[%s1696_s30 + $0x18] sm:$0xff] %v267_v2  ;;  %v273_v5 = vld [vmem:[%s1691_s27 + $0x78] sm:$0xff]  ;;  %270 = vst [vmem:[%s1696_s30 + $0x24] sm:$0xff] %v269_v3  ;;  %v275_v6 = vld [vmem:[%s1691_s27 + $0x90] sm:$0xff] }
  0x29   : > { %272 = vst [vmem:[%s1696_s30 + $0x30] sm:$0xff] %v271_v4  ;;  %274 = vst [vmem:[%s1696_s30 + $0x3c] sm:$0xff] %v273_v5  ;;  %v277_v7 = vld [vmem:[%s1691_s27 + $0xa8] sm:$0xff]  ;;  %v279_v8 = vld [vmem:[%s1691_s27 + $0xc0] sm:$0xff] }
  0x2a   : > { %276 = vst [vmem:[%s1696_s30 + $0x48] sm:$0xff] %v275_v6  ;;  %278 = vst [vmem:[%s1696_s30 + $0x54] sm:$0xff] %v277_v7  ;;  %v281_v9 = vld [vmem:[%s1691_s27 + $0xd8] sm:$0xff]  ;;  %v283_v10 = vld [vmem:[%s1691_s27 + $0xf0] sm:$0xff] }
  0x2b   : > { %280 = vst [vmem:[%s1696_s30 + $0x60] sm:$0xff] %v279_v8  ;;  %v285_v11 = vld [vmem:[%s1691_s27 + $0x108] sm:$0xff]  ;;  %282 = vst [vmem:[%s1696_s30 + $0x6c] sm:$0xff] %v281_v9  ;;  %v287_v12 = vld [vmem:[%s1691_s27 + $0x120] sm:$0xff] }
  0x2c   : > { %284 = vst [vmem:[%s1696_s30 + $0x78] sm:$0xff] %v283_v10  ;;  %286 = vst [vmem:[%s1696_s30 + $0x84] sm:$0xff] %v285_v11  ;;  %v289_v13 = vld [vmem:[%s1691_s27 + $0x138] sm:$0xff]  ;;  %v291_v14 = vld [vmem:[%s1691_s27 + $0x150] sm:$0xff] }
  0x2d   : > { %288 = vst [vmem:[%s1696_s30 + $0x90] sm:$0xff] %v287_v12  ;;  %290 = vst [vmem:[%s1696_s30 + $0x9c] sm:$0xff] %v289_v13  ;;  %v293_v15 = vld [vmem:[%s1691_s27 + $0x168] sm:$0xff]  ;;  %v295_v16 = vld [vmem:[%s1691_s27 + $0x180] sm:$0xff] }
  0x2e   : > { %292 = vst [vmem:[%s1696_s30 + $0xa8] sm:$0xff] %v291_v14  ;;  %v297_v17 = vld [vmem:[%s1691_s27 + $0x198] sm:$0xff]  ;;  %294 = vst [vmem:[%s1696_s30 + $0xb4] sm:$0xff] %v293_v15  ;;  %v299_v18 = vld [vmem:[%s1691_s27 + $0x1b0] sm:$0xff] }
  0x2f   : > { %296 = vst [vmem:[%s1696_s30 + $0xc0] sm:$0xff] %v295_v16  ;;  %298 = vst [vmem:[%s1696_s30 + $0xcc] sm:$0xff] %v297_v17  ;;  %v301_v19 = vld [vmem:[%s1691_s27 + $0x1c8] sm:$0xff]  ;;  %v303_v20 = vld [vmem:[%s1691_s27 + $0x1e0] sm:$0xff] }
  0x30   : > { %300 = vst [vmem:[%s1696_s30 + $0xd8] sm:$0xff] %v299_v18  ;;  %302 = vst [vmem:[%s1696_s30 + $0xe4] sm:$0xff] %v301_v19  ;;  %v305_v21 = vld [vmem:[%s1691_s27 + $0x1f8] sm:$0xff]  ;;  %v307_v22 = vld [vmem:[%s1691_s27 + $0x210] sm:$0xff] }
  0x31   : > { %304 = vst [vmem:[%s1696_s30 + $0xf0] sm:$0xff] %v303_v20  ;;  %v309_v23 = vld [vmem:[%s1691_s27 + $0x228] sm:$0xff]  ;;  %306 = vst [vmem:[%s1696_s30 + $0xfc] sm:$0xff] %v305_v21  ;;  %v311_v24 = vld [vmem:[%s1691_s27 + $0x240] sm:$0xff] }
  0x32   : > { %308 = vst [vmem:[%s1696_s30 + $0x108] sm:$0xff] %v307_v22  ;;  %310 = vst [vmem:[%s1696_s30 + $0x114] sm:$0xff] %v309_v23  ;;  %v313_v25 = vld [vmem:[%s1691_s27 + $0x258] sm:$0xff]  ;;  %v315_v26 = vld [vmem:[%s1691_s27 + $0x270] sm:$0xff] }
  0x33   : > { %312 = vst [vmem:[%s1696_s30 + $0x120] sm:$0xff] %v311_v24  ;;  %314 = vst [vmem:[%s1696_s30 + $0x12c] sm:$0xff] %v313_v25  ;;  %v317_v27 = vld [vmem:[%s1691_s27 + $0x288] sm:$0xff]  ;;  %v319_v28 = vld [vmem:[%s1691_s27 + $0x2a0] sm:$0xff] }
  0x34   : > { %316 = vst [vmem:[%s1696_s30 + $0x138] sm:$0xff] %v315_v26  ;;  %v321_v29 = vld [vmem:[%s1691_s27 + $0x2b8] sm:$0xff]  ;;  %318 = vst [vmem:[%s1696_s30 + $0x144] sm:$0xff] %v317_v27  ;;  %v323_v30 = vld [vmem:[%s1691_s27 + $0x2d0] sm:$0xff] }
  0x35   : > { %320 = vst [vmem:[%s1696_s30 + $0x150] sm:$0xff] %v319_v28  ;;  %322 = vst [vmem:[%s1696_s30 + $0x15c] sm:$0xff] %v321_v29  ;;  %v325_v31 = vld [vmem:[%s1691_s27 + $0x2e8] sm:$0xff]  ;;  %v1210_v33 = vld [vmem:[%s1691_s27 + $0x20] sm:$0xf] }
  0x36   : > { %v1208_v32 = vld [vmem:[%s1691_s27 + $0x8] sm:$0xf]  ;;  %324 = vst [vmem:[%s1696_s30 + $0x168] sm:$0xff] %v323_v30  ;;  %326 = vst [vmem:[%s1696_s30 + $0x174] sm:$0xff] %v325_v31  ;;  %v1212_v34 = vld [vmem:[%s1691_s27 + $0x38] sm:$0xf] }
  0x37   : > { %1209 = vst [vmem:[%s1696_s30 + $0x8] sm:$0xf] %v1208_v32  ;;  %v1214_v35 = vld [vmem:[%s1691_s27 + $0x50] sm:$0xf]  ;;  %1211 = vst [vmem:[%s1696_s30 + $0x14] sm:$0xf] %v1210_v33 }
  0x38   : > { %1213 = vst [vmem:[%s1696_s30 + $0x20] sm:$0xf] %v1212_v34  ;;  %1215 = vst [vmem:[%s1696_s30 + $0x2c] sm:$0xf] %v1214_v35  ;;  %v1216_v36 = vld [vmem:[%s1691_s27 + $0x68] sm:$0xf] }
  0x39   : > { %v1218_v37 = vld [vmem:[%s1691_s27 + $0x80] sm:$0xf]  ;;  %v1220_v38 = vld [vmem:[%s1691_s27 + $0x98] sm:$0xf]  ;;  %1217 = vst [vmem:[%s1696_s30 + $0x38] sm:$0xf] %v1216_v36 }
  0x3a   : > { %1219 = vst [vmem:[%s1696_s30 + $0x44] sm:$0xf] %v1218_v37  ;;  %1221 = vst [vmem:[%s1696_s30 + $0x50] sm:$0xf] %v1220_v38  ;;  %v1222_v39 = vld [vmem:[%s1691_s27 + $0xb0] sm:$0xf] }
  0x3b   : > { %v1224_v40 = vld [vmem:[%s1691_s27 + $0xc8] sm:$0xf]  ;;  %v1226_v41 = vld [vmem:[%s1691_s27 + $0xe0] sm:$0xf]  ;;  %1223 = vst [vmem:[%s1696_s30 + $0x5c] sm:$0xf] %v1222_v39 }
  0x3c   : > { %1225 = vst [vmem:[%s1696_s30 + $0x68] sm:$0xf] %v1224_v40  ;;  %1227 = vst [vmem:[%s1696_s30 + $0x74] sm:$0xf] %v1226_v41  ;;  %v1228_v42 = vld [vmem:[%s1691_s27 + $0xf8] sm:$0xf] }
  0x3d   : > { %v1230_v43 = vld [vmem:[%s1691_s27 + $0x110] sm:$0xf]  ;;  %v1232_v44 = vld [vmem:[%s1691_s27 + $0x128] sm:$0xf]  ;;  %1229 = vst [vmem:[%s1696_s30 + $0x80] sm:$0xf] %v1228_v42 }
  0x3e   : > { %1231 = vst [vmem:[%s1696_s30 + $0x8c] sm:$0xf] %v1230_v43  ;;  %1233 = vst [vmem:[%s1696_s30 + $0x98] sm:$0xf] %v1232_v44  ;;  %v1234_v45 = vld [vmem:[%s1691_s27 + $0x140] sm:$0xf] }
  0x3f   : > { %v1236_v46 = vld [vmem:[%s1691_s27 + $0x158] sm:$0xf]  ;;  %v1238_v47 = vld [vmem:[%s1691_s27 + $0x170] sm:$0xf]  ;;  %1235 = vst [vmem:[%s1696_s30 + $0xa4] sm:$0xf] %v1234_v45 }
  0x40   : > { %1237 = vst [vmem:[%s1696_s30 + $0xb0] sm:$0xf] %v1236_v46  ;;  %1239 = vst [vmem:[%s1696_s30 + $0xbc] sm:$0xf] %v1238_v47  ;;  %v1240_v48 = vld [vmem:[%s1691_s27 + $0x188] sm:$0xf] }
  0x41   : > { %v1242_v49 = vld [vmem:[%s1691_s27 + $0x1a0] sm:$0xf]  ;;  %v1244_v50 = vld [vmem:[%s1691_s27 + $0x1b8] sm:$0xf]  ;;  %1241 = vst [vmem:[%s1696_s30 + $0xc8] sm:$0xf] %v1240_v48 }
  0x42   : > { %1243 = vst [vmem:[%s1696_s30 + $0xd4] sm:$0xf] %v1242_v49  ;;  %1245 = vst [vmem:[%s1696_s30 + $0xe0] sm:$0xf] %v1244_v50  ;;  %v1246_v51 = vld [vmem:[%s1691_s27 + $0x1d0] sm:$0xf] }
  0x43   : > { %v1248_v52 = vld [vmem:[%s1691_s27 + $0x1e8] sm:$0xf]  ;;  %v1250_v53 = vld [vmem:[%s1691_s27 + $0x200] sm:$0xf]  ;;  %1247 = vst [vmem:[%s1696_s30 + $0xec] sm:$0xf] %v1246_v51 }
  0x44   : > { %1249 = vst [vmem:[%s1696_s30 + $0xf8] sm:$0xf] %v1248_v52  ;;  %1251 = vst [vmem:[%s1696_s30 + $0x104] sm:$0xf] %v1250_v53  ;;  %v1252_v54 = vld [vmem:[%s1691_s27 + $0x218] sm:$0xf] }
  0x45   : > { %v1254_v55 = vld [vmem:[%s1691_s27 + $0x230] sm:$0xf]  ;;  %v1256_v56 = vld [vmem:[%s1691_s27 + $0x248] sm:$0xf]  ;;  %1253 = vst [vmem:[%s1696_s30 + $0x110] sm:$0xf] %v1252_v54 }
  0x46   : > { %1255 = vst [vmem:[%s1696_s30 + $0x11c] sm:$0xf] %v1254_v55  ;;  %1257 = vst [vmem:[%s1696_s30 + $0x128] sm:$0xf] %v1256_v56  ;;  %v1258_v57 = vld [vmem:[%s1691_s27 + $0x260] sm:$0xf] }
  0x47   : > { %v1260_v58 = vld [vmem:[%s1691_s27 + $0x278] sm:$0xf]  ;;  %v1262_v59 = vld [vmem:[%s1691_s27 + $0x290] sm:$0xf]  ;;  %1259 = vst [vmem:[%s1696_s30 + $0x134] sm:$0xf] %v1258_v57 }
  0x48   : > { %1261 = vst [vmem:[%s1696_s30 + $0x140] sm:$0xf] %v1260_v58  ;;  %1263 = vst [vmem:[%s1696_s30 + $0x14c] sm:$0xf] %v1262_v59  ;;  %v1264_v60 = vld [vmem:[%s1691_s27 + $0x2a8] sm:$0xf] }
  0x49   : > { %v1266_v61 = vld [vmem:[%s1691_s27 + $0x2c0] sm:$0xf]  ;;  %v1268_v62 = vld [vmem:[%s1691_s27 + $0x2d8] sm:$0xf]  ;;  %1265 = vst [vmem:[%s1696_s30 + $0x158] sm:$0xf] %v1264_v60 }
  0x4a   : > { %1267 = vst [vmem:[%s1696_s30 + $0x164] sm:$0xf] %v1266_v61  ;;  %1269 = vst [vmem:[%s1696_s30 + $0x170] sm:$0xf] %v1268_v62  ;;  %v1270_v63 = vld [vmem:[%s1691_s27 + $0x2f0] sm:$0xf] }
  0x4b   : > { %1271 = vst [vmem:[%s1696_s30 + $0x17c] sm:$0xf] %v1270_v63 }
  0x4c PF: > { %p1272_p11 = scmp.ge.s32.totalorder %s1579_s26, 1  ;;  %p410_p12 = scmp.lt.s32.totalorder %s1579_s26, 5 }
  0x4e   : > { %p411_p13 = pnand %p1272_p11, %p410_p12 }
  0x4f   : > { %s417_s6 = sand.u32 (!%p411_p13), 1, %s1555_s20   ;;  %s462_s7 = sand.u32 (!%p411_p13), 1, %s1547_s18  }
  0x50   : > { %414 = sbr.rel (%p411_p13) target bundleno = 707 (0x2c3), region = 62  ;;  %p466_p0 = scmp.lt.s32.totalorder (!%p411_p13), %s1567_s23, 1 }
  0x51   : > { %s1366_s9 = smul.u32 (!%p411_p13), 384, %s417_s6  ;;  %p1277_p2 = scmp.ne.s32.totalorder (!%p411_p13), %s1563_s22, 0 }
  0x52   : > { %s1367_s10 = smul.u32 (!%p411_p13), 24, %s462_s7 }
  0x53   : > { %s1829_s13 = smul.u32 (!%p411_p13), 3, %s1563_s22  ;;  %s1853_s8 = scalar_lea.vmem (!%p411_p13), [#allocation3], %s1366_s9 }
  0x55   : > { %p486_p1 = scmp.lt.s32.totalorder (!%p411_p13), %s1829_s13, 5 }
  0x57   : > { %s467_s14 = scalar_select %p466_p0, %s1567_s23, 1 }
  0x58   : > { %s1847_s28 = scalar_select %p486_p1, %s1829_s13, 5 }
  0x59   : > { %s1338_s15 = sshll.u32 %s467_s14, 5  ;;  %s1275_s16 = sshll.u32 %s467_s14, 1  ;;  %v537_v23 = vlaneseq (!%p1277_p2) }
  0x5a   : > { %s474_s30 = scalar_lea.vmem %s1955_s0, %s1338_s15  ;;  %s1839_s20 = scalar_lea.vmem %s1956_s1, %s1275_s16 }
  0x5b   : > { %s1844_s7 = scalar_lea.vmem %s1957_s2, %s1275_s16  ;;  %s488_s14 = scalar_lea.vmem %s1959_s4, %s1847_s28  ;;  %v497_v0 = vld [vmem:[%s474_s30] sm:$0xff] (!%p1277_p2)  ;;  %v498_v1 = vld [vmem:[%s474_s30 + $0x8] sm:$0xff] (!%p1277_p2)  ;;  %v499_v2 = vld [vmem:[%s474_s30 + $0x10] sm:$0xff] (!%p1277_p2)  ;;  %v538_v27 = vshrl.u32 (!%p1277_p2), %v537_v23, 7 }
  0x5c   : > { %s1855_s15 = scalar_lea.vmem [#allocation4], %s1367_s10  ;;  %496 = sbr.rel (%p1277_p2) target bundleno = 414 (0x19e), region = 70  ;;  %v501_v3 = vadd.f32 (!%p1277_p2), %v498_v1, %v497_v0  ;;  %v500_v4 = vld [vmem:[%s474_s30 + $0x18] sm:$0xff] (!%p1277_p2)  ;;  %v534_v28 = vld [vmem:[%s1839_s20] sm:$0x3] (!%p1277_p2) }
  0x5d   : > { %v504_v5 = vadd.f32 (!%p1277_p2), %v500_v4, %v499_v2  ;;  %v535_v29 = vadd.f32 (!%p1277_p2), 1.0, %v534_v28  ;;  %v539_v30 = vsub.s32 (!%p1277_p2), 0, %v538_v27  ;;  %v543_v31 = vsub.s32 (!%p1277_p2), 1, %v538_v27  ;;  %v551_v35 = vld [vmem:[%s1844_s7] sm:$0x3] (!%p1277_p2) }
  0x5e   : > { %502 = vadd.xlane.f32.xlu0 (!%p1277_p2), %v501_v3 }
  0x5f   : > { %v540_v33 = vrot.slane (!%p1277_p2), %v535_v29, %v539_v30  ;;  %v544_v34 = vrot.slane (!%p1277_p2), %v535_v29, %v543_v31  ;;  %v556_v39 = vrot.slane (!%p1277_p2), %v551_v35, %v539_v30  ;;  %v560_v40 = vrot.slane (!%p1277_p2), %v551_v35, %v543_v31 }
  0x62   : > { %505 = vadd.xlane.f32.xlu0 (!%p1277_p2), %v504_v5 }
  0xeb   : > { %v503_v6 = vpop.xlane.xlu0 %502 }
  0xec   : > { %v508_v7 = vmul.f32 0.00390625, %v503_v6 }
  0xee   : > { %v510_v8 = vsub.f32 %v497_v0, %v508_v7  ;;  %v511_v9 = vsub.f32 %v498_v1, %v508_v7 }
  0xef   : > { %v506_v10 = vpop.xlane.xlu0 %505 }
  0xf0   : > { %v509_v11 = vmul.f32 0.00390625, %v506_v10  ;;  %v514_v12 = vmul.f32 %v510_v8, %v510_v8  ;;  %v515_v13 = vmul.f32 %v511_v9, %v511_v9 }
  0xf2   : > { %v512_v14 = vsub.f32 %v499_v2, %v509_v11  ;;  %v513_v15 = vsub.f32 %v500_v4, %v509_v11  ;;  %v518_v16 = vadd.f32 %v515_v13, %v514_v12 }
  0xf4   : > { %519 = vadd.xlane.f32.xlu1 %v518_v16  ;;  %v516_v17 = vmul.f32 %v512_v14, %v512_v14  ;;  %v517_v18 = vmul.f32 %v513_v15, %v513_v15 }
  0xf6   : > { %v521_v19 = vadd.f32 %v517_v18, %v516_v17 }
  0xf8   : > { %522 = vadd.xlane.f32.xlu1 %v521_v19 }
 0x181   : > { %v520_v20 = vpop.xlane.xlu1 %519 }
 0x182   : > { %v524_v21 = vmul.f32 0.00390625, %v520_v20 }
 0x184   : > { %v526_v22 = vadd.f32 1e-06, %v524_v21 }
 0x185   : > { %v523_v24 = vpop.xlane.xlu1 %522 }
 0x186   : > { %1441 = vrsqrt.f32 %v526_v22  ;;  %v525_v25 = vmul.f32 0.00390625, %v523_v24 }
 0x188   : > { %v527_v26 = vadd.f32 1e-06, %v525_v25 }
 0x18a   : > { %1443 = vrsqrt.f32 %v527_v26 }
 0x190   : > { %v1442_v32 = vpop.eup %1441 }
 0x191   : > { %v530_v36 = vmul.f32 %v1442_v32, %v510_v8  ;;  %v531_v37 = vmul.f32 %v1442_v32, %v511_v9 }
 0x193   : > { %v547_v41 = vmul.f32 %v540_v33, %v530_v36  ;;  %v548_v42 = vmul.f32 %v544_v34, %v531_v37 }
 0x194   : > { %v1444_v38 = vpop.eup %1443 }
 0x195   : > { %v532_v43 = vmul.f32 %v1444_v38, %v512_v14  ;;  %v533_v44 = vmul.f32 %v1444_v38, %v513_v15  ;;  %v563_v47 = vadd.f32 %v556_v39, %v547_v41  ;;  %v564_v48 = vadd.f32 %v560_v40, %v548_v42 }
 0x197   : > { %v549_v45 = vmul.f32 %v540_v33, %v532_v43  ;;  %v550_v46 = vmul.f32 %v544_v34, %v533_v44 }
 0x199   : > { %v565_v49 = vadd.f32 %v556_v39, %v549_v45  ;;  %v566_v50 = vadd.f32 %v560_v40, %v550_v46 }
 0x19b   : > { %v567_v51 = vpack.c.bf16 %v565_v49, %v563_v47  ;;  %v568_v52 = vpack.c.bf16 %v566_v50, %v564_v48 }
 0x19d   : > { %569 = vst [vmem:[#allocation2] sm:$0xff] %v567_v51  ;;  %570 = vst [vmem:[#allocation2 + $0x8] sm:$0xff] %v568_v52 }
 0x19e PF: > { %v1445_v53 = vld [vmem:[%s1853_s8 + $0x4] ss:$12 sps:$4 sm:$0xff]   ;;  %v1447_v54 = vld [vmem:[%s1853_s8] ss:$12 sps:$4 sm:$0xff]   ;;  %v1448_v55 = vld [vmem:[%s1853_s8 + $0x1c] ss:$12 sps:$4 sm:$0xff]   ;;  %v639_v39 = vlaneseq }
 0x19f   : > { %910 = vmatprep.subr.bf16.mxu0 %v1445_v53  ;;  %v1450_v56 = vld [vmem:[%s1853_s8 + $0x18] ss:$12 sps:$4 sm:$0xff]   ;;  %v1451_v57 = vld [vmem:[%s1853_s8 + $0x34] ss:$12 sps:$4 sm:$0xff]   ;;  %v1453_v58 = vld [vmem:[%s1853_s8 + $0x30] ss:$12 sps:$4 sm:$0xff]  }
 0x1a0   : > { %911 = vmatpush1.bf16.msra.mxu0 %v1447_v54  ;;  %v1454_v59 = vld [vmem:[%s1853_s8 + $0x4c] ss:$12 sps:$4 sm:$0xff]   ;;  %v1466_v60 = vld [vmem:[%s1853_s8 + $0xc8] ss:$12 sps:$4 sm:$0xff]   ;;  %v1457_v62 = vld [vmem:[%s1853_s8 + $0x64] ss:$12 sps:$4 sm:$0xff]  }
 0x1a1   : > { %912 = vmatprep.subr.bf16.mxu0 %v1448_v55  ;;  %v1456_v61 = vld [vmem:[%s1853_s8 + $0x48] ss:$12 sps:$4 sm:$0xff]   ;;  %1343 = vmatprep.subr.bf16.mxu1 %v1466_v60  ;;  %v1471_v0 = vld [vmem:[%s1853_s8 + $0xe0] ss:$12 sps:$4 sm:$0xff]   ;;  %v1476_v4 = vld [vmem:[%s1853_s8 + $0xf8] ss:$12 sps:$4 sm:$0xff]  }
 0x1a2   : > { %v1469_v63 = vld [vmem:[%s1853_s8 + $0x8] ss:$12 sps:$4 sm:$0xff]   ;;  %v1459_v1 = vld [vmem:[%s1853_s8 + $0x60] ss:$12 sps:$4 sm:$0xff]   ;;  %v1462_v5 = vld [vmem:[%s1853_s8 + $0x78] ss:$12 sps:$4 sm:$0xff]  }
 0x1a3   : > { %1344 = vmatpush3.bf16.msra.mxu1 %v1469_v63  ;;  %v1460_v2 = vld [vmem:[%s1853_s8 + $0x7c] ss:$12 sps:$4 sm:$0xff]   ;;  %v1474_v3 = vld [vmem:[%s1853_s8 + $0x20] ss:$12 sps:$4 sm:$0xff]   ;;  %v1479_v6 = vld [vmem:[%s1853_s8 + $0x38] ss:$12 sps:$4 sm:$0xff]  }
 0x1a4   : > { %913 = vmatpush1.bf16.msra.mxu0 %v1450_v56  ;;  %1345 = vmatprep.subr.bf16.mxu1 %v1471_v0  ;;  %v1463_v7 = vld [vmem:[%s1853_s8 + $0x94] ss:$12 sps:$4 sm:$0xff]   ;;  %v1481_v8 = vld [vmem:[%s1853_s8 + $0x110] ss:$12 sps:$4 sm:$0xff]   ;;  %v1467_v12 = vld [vmem:[%s1853_s8 + $0xac] ss:$12 sps:$4 sm:$0xff]  }
 0x1a5   : > { %914 = vmatprep.subr.bf16.mxu0 %v1451_v57  ;;  %v1465_v9 = vld [vmem:[%s1853_s8 + $0x90] ss:$12 sps:$4 sm:$0xff]   ;;  %v1486_v11 = vld [vmem:[%s1853_s8 + $0x128] ss:$12 sps:$4 sm:$0xff]   ;;  %v1491_v15 = vld [vmem:[%s1853_s8 + $0x140] ss:$12 sps:$4 sm:$0xff]  }
 0x1a6   : > { %v1484_v10 = vld [vmem:[%s1853_s8 + $0x50] ss:$12 sps:$4 sm:$0xff]   ;;  %v1470_v13 = vld [vmem:[%s1853_s8 + $0xa8] ss:$12 sps:$4 sm:$0xff]   ;;  %v1475_v17 = vld [vmem:[%s1853_s8 + $0xc0] ss:$12 sps:$4 sm:$0xff]  }
 0x1a7   : > { %1346 = vmatpush3.bf16.msra.mxu1 %v1474_v3  ;;  %v1489_v14 = vld [vmem:[%s1853_s8 + $0x68] ss:$12 sps:$4 sm:$0xff]   ;;  %v1472_v16 = vld [vmem:[%s1853_s8 + $0xc4] ss:$12 sps:$4 sm:$0xff]   ;;  %v1494_v18 = vld [vmem:[%s1853_s8 + $0x80] ss:$12 sps:$4 sm:$0xff]  }
 0x1a8   : > { %915 = vmatpush1.bf16.msra.mxu0 %v1453_v58  ;;  %1347 = vmatprep.subr.bf16.mxu1 %v1476_v4  ;;  %v1496_v19 = vld [vmem:[%s1853_s8 + $0x158] ss:$12 sps:$4 sm:$0xff]   ;;  %v1477_v20 = vld [vmem:[%s1853_s8 + $0xdc] ss:$12 sps:$4 sm:$0xff]   ;;  %v1482_v24 = vld [vmem:[%s1853_s8 + $0xf4] ss:$12 sps:$4 sm:$0xff]  }
 0x1a9   : > { %916 = vmatprep.subr.bf16.mxu0 %v1454_v59  ;;  %v1499_v21 = vld [vmem:[%s1853_s8 + $0x98] ss:$12 sps:$4 sm:$0xff]   ;;  %v1501_v23 = vld [vmem:[%s1853_s8 + $0x170] ss:$12 sps:$4 sm:$0xff]   ;;  %v1490_v30 = vld [vmem:[%s1853_s8 + $0x108] ss:$12 sps:$4 sm:$0xff]  }
 0x1aa   : > { %v1480_v22 = vld [vmem:[%s1853_s8 + $0xd8] ss:$12 sps:$4 sm:$0xff]   ;;  %v1504_v26 = vld [vmem:[%s1853_s8 + $0xb0] ss:$12 sps:$4 sm:$0xff]   ;;  %v1495_v32 = vld [vmem:[%s1853_s8 + $0x120] ss:$12 sps:$4 sm:$0xff]  }
 0x1ab   : > { %1348 = vmatpush3.bf16.msra.mxu1 %v1479_v6  ;;  %v572_v25 = vld [vmem:[#allocation2 + $0x8] sm:$0xff]  ;;  %v571_v29 = vld [vmem:[#allocation2] sm:$0xff]  ;;  %v640_v40 = vshrl.u32 %v639_v39, 7  ;;  %s1368_s24 = smul.u32 (%p1678_p9), 12, %s1567_s23 }
 0x1ac   : > { %917 = vmatpush1.bf16.msra.mxu0 %v1456_v61  ;;  %1349 = vmatprep.subr.bf16.mxu1 %v1481_v8  ;;  %v1485_v27 = vld [vmem:[%s1853_s8 + $0xf0] ss:$12 sps:$4 sm:$0xff]   ;;  %v1487_v28 = vld [vmem:[%s1853_s8 + $0x10c] ss:$12 sps:$4 sm:$0xff]   ;;  %v1502_v35 = vld [vmem:[%s1853_s8 + $0x154] ss:$12 sps:$4 sm:$0xff]  }
 0x1ad   : > { %918 = vmatprep.subr.bf16.mxu0 %v1457_v62  ;;  %985 = vmatprep.mubr.bf16.mxu1 %v572_v25  ;;  %v1492_v31 = vld [vmem:[%s1853_s8 + $0x124] ss:$12 sps:$4 sm:$0xff]   ;;  %v1497_v33 = vld [vmem:[%s1853_s8 + $0x13c] ss:$12 sps:$4 sm:$0xff]   ;;  %v1506_v37 = vld [vmem:[%s1853_s8 + $0x16c] ss:$12 sps:$4 sm:$0xff]   ;;  %s1030_s25 = sadd.s32 (%p1678_p9), %s1368_s24, %s1829_s13 }
 0x1ae   : > { %942 = vmatprep.mubr.bf16.mxu0 %v572_v25  ;;  %v1500_v34 = vld [vmem:[%s1853_s8 + $0x138] ss:$12 sps:$4 sm:$0xff]   ;;  %v1505_v36 = vld [vmem:[%s1853_s8 + $0x150] ss:$12 sps:$4 sm:$0xff]   ;;  %v1508_v38 = vld [vmem:[%s1853_s8 + $0x168] ss:$12 sps:$4 sm:$0xff]  }
 0x1af   : > { %1350 = vmatpush3.bf16.msra.mxu1 %v1484_v10  ;;  %v649_v41 = vsub.s32 2, %v640_v40  ;;  %v637_v42 = vld [vmem:[%s488_s14] sm:$0x7]  ;;  %v641_v54 = vsub.s32 0, %v640_v40  ;;  %v645_v55 = vsub.s32 1, %v640_v40  ;;  %s1330_s28 = sshll.u32 (%p1678_p9), %s1030_s25, 2 }
 0x1b0   : > { %919 = vmatpush1.bf16.msra.mxu0 %v1459_v1  ;;  %1351 = vmatprep.subr.bf16.mxu1 %v1486_v11  ;;  %s1032_s9 = scalar_lea.vmem (%p1678_p9), %s1960_s5, %s1330_s28 }
 0x1b1   : > { %920 = vmatprep.subr.bf16.mxu0 %v1460_v2  ;;  %v650_v44 = vrot.slane %v637_v42, %v649_v41  ;;  %v642_v56 = vrot.slane %v637_v42, %v641_v54  ;;  %v646_v57 = vrot.slane %v637_v42, %v645_v55 }
 0x1b3   : > { %1352 = vmatpush3.bf16.msra.mxu1 %v1489_v14 }
 0x1b4   : > { %921 = vmatpush1.bf16.msra.mxu0 %v1462_v5  ;;  %1353 = vmatprep.subr.bf16.mxu1 %v1491_v15 }
 0x1b5   : > { %922 = vmatprep.subr.bf16.mxu0 %v1463_v7 }
 0x1b7   : > { %1354 = vmatpush3.bf16.msra.mxu1 %v1494_v18 }
 0x1b8   : > { %923 = vmatpush1.bf16.msra.mxu0 %v1465_v9  ;;  %1355 = vmatprep.subr.bf16.mxu1 %v1496_v19 }
 0x1b9   : > { %924 = vmatprep.subr.bf16.mxu0 %v1467_v12 }
 0x1bb   : > { %1356 = vmatpush3.bf16.msra.mxu1 %v1499_v21 }
 0x1bc   : > { %925 = vmatpush1.bf16.msra.mxu0 %v1470_v13  ;;  %1357 = vmatprep.subr.bf16.mxu1 %v1501_v23 }
 0x1bd   : > { %926 = vmatprep.subr.bf16.mxu0 %v1472_v16 }
 0x1bf   : > { %1358 = vmatpush3.bf16.msra.mxu1 %v1504_v26 }
 0x1c0   : > { %927 = vmatpush1.bf16.msra.mxu0 %v1475_v17 }
 0x1c1   : > { %928 = vmatprep.subr.bf16.mxu0 %v1477_v20 }
 0x1c2   : > { %986 = vmatmul.mubr.bf16.vlgmr.msra.gmra.mrb[0].mxu1 %v571_v29 }
 0x1c4   : > { %929 = vmatpush1.bf16.msra.mxu0 %v1480_v22 }
 0x1c5   : > { %930 = vmatprep.subr.bf16.mxu0 %v1482_v24 }
 0x1c8   : > { %931 = vmatpush1.bf16.msra.mxu0 %v1485_v27 }
 0x1c9   : > { %932 = vmatprep.subr.bf16.mxu0 %v1487_v28 }
 0x1cc   : > { %933 = vmatpush1.bf16.msra.mxu0 %v1490_v30 }
 0x1cd   : > { %934 = vmatprep.subr.bf16.mxu0 %v1492_v31 }
 0x1d0   : > { %935 = vmatpush1.bf16.msra.mxu0 %v1495_v32 }
 0x1d1   : > { %936 = vmatprep.subr.bf16.mxu0 %v1497_v33 }
 0x1d4   : > { %937 = vmatpush1.bf16.msra.mxu0 %v1500_v34 }
 0x1d5   : > { %938 = vmatprep.subr.bf16.mxu0 %v1502_v35 }
 0x1d8   : > { %939 = vmatpush1.bf16.msra.mxu0 %v1505_v36 }
 0x1d9   : > { %940 = vmatprep.subr.bf16.mxu0 %v1506_v37 }
 0x1dc   : > { %941 = vmatpush1.bf16.msra.mxu0 %v1508_v38 }
 0x1df   : > { %943 = vmatmul.mubr.bf16.vlgmr.msra.gmra.mrb[0].mxu0 %v571_v29 }
 0x295   : > { %v1359_v43 = vpop.f32.mrb[0].mxu1 }
 0x296   : > { %v1360_v45 = vpop.f32.mrb[1].mxu1 }
 0x297   : > { %v1361_v46 = vadd.f32 %v1360_v45, %v1359_v43  ;;  %v1362_v47 = vpop.f32.mrb[2].mxu1 }
 0x298   : > { %v1363_v48 = vpop.f32.mrb[3].mxu1 }
 0x299   : > { %v988_v49 = vadd.f32 %v1361_v46, %v650_v44  ;;  %v1364_v50 = vadd.f32 %v1363_v48, %v1362_v47 }
 0x29b   : > { %v1340_v51 = vpack.c.bf16 %v988_v49, %v988_v49  ;;  %v991_v52 = vadd.f32 %v1364_v50, %v650_v44 }
 0x29d   : > { %1015 = vst [vmem:[%s1855_s15 + $0x8] sm:$0xf] %v1340_v51  ;;  %v1342_v53 = vpack.c.bf16 %v991_v52, %v991_v52 }
 0x29f   : > { %1017 = vst [vmem:[%s1855_s15 + $0x14] sm:$0xf] %v1342_v53 }
 0x2a4   : > { %v1331_v6 = vld [vmem:[%s1855_s15 + $0x8] sm:$0xf] (%p1678_p9) }
 0x2a5   : > { %1332 = vst [vmem:[%s1032_s9 + $0x8] sm:$0xf] (%p1678_p9), %v1331_v6 }
 0x2a6   : > { %v1333_v7 = vld [vmem:[%s1855_s15 + $0x14] sm:$0xf] (%p1678_p9) }
 0x2a7   : > { %1334 = vst [vmem:[%s1032_s9 + $0x20] sm:$0xf] (%p1678_p9), %v1333_v7 }
 0x2b2   : > { %v944_v58 = vpop.f32.mrb[0].mxu0 }
 0x2b3   : > { %v945_v59 = vadd.f32 %v944_v58, %v642_v56  ;;  %v946_v60 = vpop.f32.mrb[1].mxu0 }
 0x2b4   : > { %v947_v61 = vadd.f32 %v946_v60, %v646_v57  ;;  %v948_v62 = vpop.f32.mrb[2].mxu0  ;;  %1024 = sbr.rel (!%p1678_p9) target bundleno = 707 (0x2c3), region = 74 }
 0x2b5   : > { %v949_v63 = vadd.f32 %v948_v62, %v642_v56  ;;  %v950_v0 = vpop.f32.mrb[3].mxu0 }
 0x2b6   : > { %v1339_v1 = vpack.c.bf16 %v947_v61, %v945_v59  ;;  %v951_v2 = vadd.f32 %v950_v0, %v646_v57 }
 0x2b8   : > { %1014 = vst [vmem:[%s1855_s15] sm:$0xff] %v1339_v1  ;;  %v1341_v3 = vpack.c.bf16 %v951_v2, %v949_v63 }
 0x2ba   : > { %1016 = vst [vmem:[%s1855_s15 + $0xc] sm:$0xff] %v1341_v3 }
 0x2bf   : > { %v1047_v4 = vld [vmem:[%s1855_s15] sm:$0xff] }
 0x2c0   : > { %1048 = vst [vmem:[%s1032_s9] sm:$0xff] %v1047_v4 }
 0x2c1   : > { %v1049_v5 = vld [vmem:[%s1855_s15 + $0xc] sm:$0xff] }
 0x2c2   : > { %1050 = vst [vmem:[%s1032_s9 + $0x18] sm:$0xff] %v1049_v5 }
 0x2c3 PF: > { %s15_s26 = sadd.s32 1, %s1579_s26   ;;  %s1973_s23 = sld [smem:[#allocation9_spill]] }
 0x2c4   : > { %p12_p3 = scmp.ge.s32.totalorder %s15_s26, 6   ;;  %s1974_s22 = sld [smem:[#allocation5_spill]] }
 0x2c5   : > { %s1975_s11 = sld [smem:[#allocation6_spill]]  ;;  %s1976_s24 = sld [smem:[#allocation7_spill]] }
 0x2c6   : > { %s1977_s25 = sld [smem:[#allocation8_spill]]  ;;  %s1978_s18 = smov %s1551_s19 }
 0x2c7   : > { %s1979_s19 = smov %s1683_s12  ;;  %s1980_s20 = smov %s1559_s21 }
 0x2c8   :  { %14 = sbr.rel (!%p12_p3) target bundleno = 7 (0x7), region = 155 }
 0x2c9   : > { %s1981_s21 = smov %s1973_s23 }
 0x2cb   : > { %s1982_s23 = smov %s1975_s11 }

// kernel: pixart_controlnet_adapter_block.12
= control target key start
LH: loop header
LB: loop body
LE: loop exit
PB: predicated region body
PF: predicated region fallthrough
CT: control target
= control target key end

     0   :  { %s1160_s12 = smov 0   ;;  %s1162_s13 = smov 0   ;;  %s1319_s0 = inlined_call_operand.vmem [shape: bf16[2,16,768], index: 0, kind: input, shape index: {}, may-alias: {0,1,2}]   ;;  %s1320_s1 = inlined_call_operand.vmem [shape: bf16[2,16,768], index: 1, kind: input, shape index: {}, may-alias: {0,1,2}]   ;;  %s1321_s2 = inlined_call_operand.vmem [shape: bf16[2,16,768], index: 2, kind: input, shape index: {}, may-alias: {0,1,2}]   ;;  %s1322_s3 = inlined_call_operand.vmem [shape: bf16[2,16,256], index: 3, kind: output, shape index: {}]  }
   0x1   :  { %s1164_s14 = smov 0   ;;  %s1166_s15 = smov 0  }
   0x2   :  { %s1168_s16 = smov 0  }
   0x3 LB: > { %s32_s17 = sadd.s32 1, %s1130_s15  ;;  %p48_p1 = scmp.ne.s32.totalorder %s1122_s13, %s1118_s12  ;;  %s1134_s16 = sphi %s1168_s16, %s13_s16   ;;  %s1130_s15 = sphi %s1166_s15, %s1327_s15   ;;  %s1126_s14 = sphi %s1164_s14, %s1326_s14   ;;  %s1122_s13 = sphi %s1162_s13, %s1325_s13   ;;  %s1118_s12 = sphi %s1160_s12, %s1324_s12  }
   0x4   : > { %p34_p0 = scmp.ge.s32.totalorder %s32_s17, 2  ;;  %p49_p2 = scmp.eq.s32.totalorder %s1134_s16, 0 }
   0x5   : > { %s41_s20 = sadd.s32 1, %s1122_s13  ;;  %p948_p5 = scmp.ge.s32.totalorder %s1134_s16, 2 }
   0x6   : > { %s1329_s17 = smov (%p34_p0, %s32_s17), 0  ;;  %p1191_p3 = por %p49_p2, %p48_p1 }
   0x7   : > { %s36_s19 = ssub.s32 %s1130_s15, %s1329_s17  ;;  %158 = sbr.rel (%p948_p5) target bundleno = 35 (0x23), region = 16 }
   0x8   : > { %p39_p4 = scmp.eq.s32.totalorder %s36_s19, 0 }
   0xa   : > { %s1199_s21 = scalar_select %p39_p4, %s1122_s13, %s41_s20  }
   0xe   : > { %161 = sbr.rel (!%p1191_p3) target bundleno = 21 (0x15), region = 20  ;;  %s163_s22 = sand.u32 (%p1191_p3), 1, %s1122_s13  }
   0xf   : > { %s1016_s23 = smul.u32 (%p1191_p3), 48, %s1130_s15  ;;  %s949_s24 = sshll.u32 (%p1191_p3), %s163_s22, 4 }
  0x10   : > { %s165_s28 = scalar_lea.vmem (%p1191_p3), [#allocation5], %s949_s24 }
  0x11   : > { %s171_s27 = scalar_lea.vmem (%p1191_p3), %s1319_s0, %s1016_s23 }
  0x12   : > { %v201_v0 = vld [vmem:[%s171_s27] sm:$0xff] (%p1191_p3)  ;;  %v203_v1 = vld [vmem:[%s171_s27 + $0x18] sm:$0xff] (%p1191_p3) }
  0x13   : > { %202 = vst [vmem:[%s165_s28] sm:$0xff] (%p1191_p3), %v201_v0  ;;  %204 = vst [vmem:[%s165_s28 + $0x8] sm:$0xff] (%p1191_p3), %v203_v1 }
  0x15 PF: > { %210 = sbr.rel (!%p1191_p3) target bundleno = 28 (0x1c), region = 58  ;;  %s212_s29 = sand.u32 (%p1191_p3), 1, %s1122_s13  }
  0x16   : > { %s952_s30 = smul.u32 (%p1191_p3), 48, %s1130_s15  ;;  %s951_s4 = sshll.u32 (%p1191_p3), %s212_s29, 4 }
  0x17   : > { %s214_s8 = scalar_lea.vmem (%p1191_p3), [#allocation6], %s951_s4 }
  0x18   : > { %s847_s7 = scalar_lea.vmem (%p1191_p3), %s1320_s1, %s952_s30 }
  0x19   : > { %v953_v2 = vld [vmem:[%s847_s7 + $0x8] sm:$0xff] (%p1191_p3)  ;;  %v954_v3 = vld [vmem:[%s847_s7 + $0x20] sm:$0xff] (%p1191_p3) }
  0x1a   : > { %252 = vst [vmem:[%s214_s8] sm:$0xff] (%p1191_p3), %v953_v2  ;;  %254 = vst [vmem:[%s214_s8 + $0x8] sm:$0xff] (%p1191_p3), %v954_v3 }
  0x1c PF: > { %260 = sbr.rel (!%p1191_p3) target bundleno = 35 (0x23), region = 96  ;;  %s262_s9 = sand.u32 (%p1191_p3), 1, %s1122_s13  }
  0x1d   : > { %s956_s10 = smul.u32 (%p1191_p3), 48, %s1130_s15  ;;  %s955_s11 = sshll.u32 (%p1191_p3), %s262_s9, 4 }
  0x1e   : > { %s264_s23 = scalar_lea.vmem (%p1191_p3), [#allocation7], %s955_s11 }
  0x1f   : > { %s855_s22 = scalar_lea.vmem (%p1191_p3), %s1321_s2, %s956_s10 }
  0x20   : > { %v957_v4 = vld [vmem:[%s855_s22 + $0x10] sm:$0xff] (%p1191_p3)  ;;  %v958_v5 = vld [vmem:[%s855_s22 + $0x28] sm:$0xff] (%p1191_p3) }
  0x21   : > { %302 = vst [vmem:[%s264_s23] sm:$0xff] (%p1191_p3), %v957_v4  ;;  %304 = vst [vmem:[%s264_s23 + $0x8] sm:$0xff] (%p1191_p3), %v958_v5 }
  0x23 PF: > { %p959_p6 = scmp.ge.s32.totalorder %s1134_s16, 1  ;;  %p309_p7 = scmp.lt.s32.totalorder %s1134_s16, 3 }
  0x25   : > { %p310_p8 = pnand %p959_p6, %p309_p7 }
  0x26   : > { %s316_s18 = sand.u32 (!%p310_p8), 1, %s1118_s12   ;;  %v1136_v6 = vmov (!%p310_p8), 0.0   ;;  %vm1137_vm0 = vmmov (!%p310_p8), 0   ;;  %vm385_vm1 = vcmask (!%p310_p8), 7168   ;;  %v1138_v9 = vmov (!%p310_p8), -inf   ;;  %p370_p9 = scmp.lt.s32.totalorder (!%p310_p8), %s1126_s14, 1 }
  0x27   : > { %313 = sbr.rel (%p310_p8) target bundleno = 1364 (0x554), region = 134  ;;  %992 = vmatprep.subr.bf16.mxu0 (!%p310_p8), %v1136_v6  ;;  %s1227_s24 = sshll.u32 (!%p310_p8), %s316_s18, 4  ;;  %994 = vmatprep.mubr.msk.bf16.mxu0 (!%p310_p8), %vm1137_vm0, %v1136_v6  ;;  %386 = vst.msk [vmem:[#allocation2] sm:$0xff] (!%p310_p8), %vm385_vm1, %v1138_v9  ;;  %387 = vst.msk [vmem:[#allocation2 + $0x8] sm:$0xff] (!%p310_p8), %vm385_vm1, %v1138_v9  ;;  %vm459_vm2 = vcmask (!%p310_p8), 130048   ;;  %v1139_v16 = vmov (!%p310_p8), 0  }
  0x28   : > { %998 = vmatprep.subr.bf16.mxu1 (!%p310_p8), %v1136_v6  ;;  %1000 = vmatprep.mubr.msk.bf16.mxu1 (!%p310_p8), %vm1137_vm0, %v1136_v6  ;;  %s325_s25 = scalar_lea.vmem (!%p310_p8), [#allocation6], %s1227_s24  ;;  %s318_s12 = scalar_lea.vmem (!%p310_p8), [#allocation5], %s1227_s24  ;;  %388 = vst.msk [vmem:[#allocation2 + $0x10] sm:$0xff] (!%p310_p8), %vm385_vm1, %v1138_v9  ;;  %389 = vst.msk [vmem:[#allocation2 + $0x18] sm:$0xff] (!%p310_p8), %vm385_vm1, %v1138_v9 }
  0x29   : > { %v1063_v7 = vld [vmem:[%s325_s25] ss:$8 sps:$4 sm:$0xff] (!%p310_p8)   ;;  %390 = vst.msk [vmem:[#allocation3] sm:$0xff] (!%p310_p8), %vm385_vm1, %v1136_v6  ;;  %391 = vst.msk [vmem:[#allocation3 + $0x8] sm:$0xff] (!%p310_p8), %vm385_vm1, %v1136_v6  ;;  %1061 = vset.pattern.permute.xlu1 (!%p310_p8), %v1139_v16  ;;  %1062 = vset.pattern.permute.xlu0 (!%p310_p8), %v1139_v16  ;;  %s332_s26 = scalar_lea.vmem (!%p310_p8), [#allocation7], %s1227_s24 }
  0x2a   : > { %993 = vmatpush3.bf16.xpose.msra.mxu0 (!%p310_p8), %v1063_v7  ;;  %v1066_v8 = vld [vmem:[%s318_s12] ss:$8 sps:$4 sm:$0xff] (!%p310_p8)   ;;  %392 = vst.msk [vmem:[#allocation3 + $0x10] sm:$0xff] (!%p310_p8), %vm385_vm1, %v1136_v6  ;;  %393 = vst.msk [vmem:[#allocation3 + $0x18] sm:$0xff] (!%p310_p8), %vm385_vm1, %v1136_v6  ;;  %v1071_v26 = vld [vmem:[%s332_s26 + $0x4] ss:$8 sps:$4 sm:$0xff] (!%p310_p8)  }
  0x2b   : > { %1010 = vmatprep.subr.bf16.mxu0 (!%p310_p8), %v1136_v6  ;;  %v1069_v25 = vld [vmem:[%s332_s26] ss:$8 sps:$4 sm:$0xff] (!%p310_p8)   ;;  %v1065_v35 = vld [vmem:[%s325_s25 + $0x4] ss:$8 sps:$4 sm:$0xff] (!%p310_p8)  }
  0x2c   : > { %999 = vmatpush3.bf16.msra.mxu1 (!%p310_p8), %v1069_v25  ;;  %v1068_v37 = vld [vmem:[%s318_s12 + $0x4] ss:$8 sps:$4 sm:$0xff] (!%p310_p8)  }
  0x2d   : > { %1004 = vmatprep.subr.bf16.mxu1 (!%p310_p8), %v1136_v6 }
  0x2e   : > { %v1257_v17 = vld [vmem:[#allocation2] sm:$0xff]  ;;  %v458_v20 = vld [vmem:[#allocation2 + $0x8] sm:$0xff]  ;;  %s1331_s14 = smov (!%p370_p9, %s1126_s14), 1 }
  0x2f   : > { %v626_v48 = vld [vmem:[#allocation2 + $0x10] sm:$0xff]  ;;  %v627_v50 = vld [vmem:[#allocation2 + $0x18] sm:$0xff]  ;;  %s979_s27 = sshll.u32 %s1331_s14, 4 }
  0x30   : > { %s378_s30 = scalar_lea.vmem %s1322_s3, %s979_s27 }
  0x31   : > { %995 = vmatmul.mubr.bf16.vlgmr.msra.gmra.mrb[0].mxu0 %v1066_v8  ;;  %v659_v25 = vld [vmem:[#allocation3 + $0x10] sm:$0xff] }
  0x32   : > { %1012 = vmatprep.mubr.msk.bf16.mxu0 %vm1137_vm0, %v1136_v6  ;;  %1011 = vmatpush3.bf16.msra.mxu0 %v1071_v26 }
 0x104   : > { %v450_v10 = vpop.f32.mrb[0].mxu0 }
 0x105   : > { %v996_v11 = vpop.f32.mrb[1].mxu0  ;;  %v460_v12 = vsel %vm459_vm2, %v450_v10, -inf }
 0x106   : > { %461 = vmax.xlane.f32.xlu0 %v460_v12  ;;  %v453_v13 = vpop.f32.mrb[2].mxu0  ;;  %v490_v12 = vld [vmem:[#allocation3] sm:$0xff] }
 0x107   : > { %v997_v14 = vpop.f32.mrb[3].mxu0  ;;  %v463_v15 = vsel %vm459_vm2, %v453_v13, -inf }
 0x10a   : > { %464 = vmax.xlane.f32.xlu0 %v463_v15 }
 0x193   : > { %v462_v18 = vpop.xlane.xlu0 %461 }
 0x194   : > { %v1260_v19 = vmax.f32 %v1257_v17, %v462_v18  ;;  %v491_v18 = vld [vmem:[#allocation3 + $0x8] sm:$0xff] }
 0x196   : > { %v468_v21 = vsub.f32 %v1257_v17, %v1260_v19  ;;  %574 = vst.msk [vmem:[#allocation2] sm:$0xff] %vm385_vm1, %v1260_v19  ;;  %476 = vperm.xlu1 %1061, %v1260_v19  }
 0x197   : > { %v465_v22 = vpop.xlane.xlu0 %464 }
 0x198   : > { %v467_v23 = vmax.f32 %v458_v20, %v465_v22  ;;  %v470_v9 = vmul.f32 1.442695, %v468_v21 }
 0x19a   : > { %v469_v24 = vsub.f32 %v458_v20, %v467_v23  ;;  %575 = vst.msk [vmem:[#allocation2 + $0x8] sm:$0xff] %vm385_vm1, %v467_v23  ;;  %481 = vperm.xlu1 %1061, %v467_v23  }
 0x19c   : > { %v472_v57 = vmul.f32 1.442695, %v469_v24 }
 0x215   : > { %v477_v27 = vpop.permute.xlu1 %476 }
 0x216   : > { %v484_v28 = vsub.f32 %v450_v10, %v477_v27 }
 0x218   : > { %v486_v29 = vmul.f32 1.442695, %v484_v28  ;;  %v660_v28 = vld [vmem:[#allocation3 + $0x18] sm:$0xff] }
 0x219   : > { %v482_v30 = vpop.permute.xlu1 %481 }
 0x21a   : > { %v485_v31 = vsub.f32 %v453_v13, %v482_v30  ;;  %1072 = vpow2.f32 %v486_v29 }
 0x21c   : > { %v488_v32 = vmul.f32 1.442695, %v485_v31 }
 0x21e   : > { %1074 = vpow2.f32 %v488_v32 }
 0x21f   : > { %1076 = vpow2.f32 %v472_v57 }
 0x224   : > { %v1073_v33 = vpop.eup %1072 }
 0x225   : > { %v494_v55 = vsel %vm459_vm2, %v1073_v33, 0.0 }
 0x228   : > { %v1075_v34 = vpop.eup %1074 }
 0x229   : > { %v519_v36 = vpack.c.bf16 %v1075_v34, %v1073_v33  ;;  %v497_v56 = vsel %vm459_vm2, %v1075_v34, 0.0  ;;  %v1077_v60 = vpop.eup %1076 }
 0x22a   : > { %v493_v20 = vmul.f32 %v1077_v60, %v491_v18 }
 0x22b   : > { %1001 = vmatmul.mubr.msk.bf16.vlgmr.msra.gmra.mrb[0].mxu1 %vm459_vm2, %v519_v36 }
 0x22c   : > { %1005 = vmatpush3.bf16.xpose.msra.mxu1 %v1065_v35  ;;  %1006 = vmatprep.mubr.msk.bf16.mxu1 %vm1137_vm0, %v1136_v6 }
 0x233   : > { %1007 = vmatmul.mubr.bf16.vlgmr.msra.gmra.mrb[4].mxu1 %v1068_v37 }
 0x2fe   : > { %v1277_v38 = vpop.f32.mrb[0].mxu1 }
 0x2ff   : > { %v1002_v39 = vpop.f32.mrb[1].mxu1 }
 0x300   : > { %v1279_v40 = vpop.f32.mrb[2].mxu1 }
 0x301   : > { %v1003_v41 = vpop.f32.mrb[3].mxu1 }
 0x306   : > { %v618_v42 = vpop.f32.mrb[4].mxu1 }
 0x307   : > { %v1008_v43 = vpop.f32.mrb[5].mxu1  ;;  %v628_v44 = vsel %vm459_vm2, %v618_v42, -inf }
 0x308   : > { %629 = vmax.xlane.f32.xlu0 %v628_v44  ;;  %v621_v45 = vpop.f32.mrb[6].mxu1 }
 0x309   : > { %v1009_v46 = vpop.f32.mrb[7].mxu1  ;;  %v631_v47 = vsel %vm459_vm2, %v621_v45, -inf }
 0x30a   : > { %632 = vmax.xlane.f32.xlu1 %v631_v47 }
 0x395   : > { %v630_v49 = vpop.xlane.xlu0 %629 }
 0x396   : > { %v634_v51 = vmax.f32 %v626_v48, %v630_v49 }
 0x397   : > { %v633_v52 = vpop.xlane.xlu1 %632 }
 0x398   : > { %741 = vst.msk [vmem:[#allocation2 + $0x10] sm:$0xff] %vm385_vm1, %v634_v51  ;;  %v635_v53 = vmax.f32 %v627_v50, %v633_v52  ;;  %644 = vperm.xlu0 %1062, %v634_v51   ;;  %v636_v58 = vsub.f32 %v626_v48, %v634_v51 }
 0x39a   : > { %v637_v54 = vsub.f32 %v627_v50, %v635_v53  ;;  %742 = vst.msk [vmem:[#allocation2 + $0x18] sm:$0xff] %vm385_vm1, %v635_v53  ;;  %649 = vperm.xlu1 %1061, %v635_v53   ;;  %v638_v59 = vmul.f32 1.442695, %v636_v58 }
 0x39c   : > { %1078 = vpow2.f32 %v638_v59  ;;  %v640_v10 = vmul.f32 1.442695, %v637_v54 }
 0x3a6   : > { %v1079_v61 = vpop.eup %1078 }
 0x3a7   : > { %v661_v26 = vmul.f32 %v1079_v61, %v659_v25 }
 0x3b7   : > { %495 = vadd.xlane.f32.xlu0 %v494_v55 }
 0x3be   : > { %498 = vadd.xlane.f32.xlu1 %v497_v56 }
 0x3cf   : > { %514 = vperm.xlu1 %1061, %v1077_v60  }
 0x3d3   : > { %678 = vperm.xlu1 %1061, %v1079_v61  }
 0x417   : > { %v645_v62 = vpop.permute.xlu0 %644 }
 0x418   : > { %v652_v63 = vsub.f32 %v618_v42, %v645_v62 }
 0x419   : > { %v650_v0 = vpop.permute.xlu1 %649 }
 0x41a   : > { %v654_v1 = vmul.f32 1.442695, %v652_v63  ;;  %v653_v2 = vsub.f32 %v621_v45, %v650_v0 }
 0x41c   : > { %1080 = vpow2.f32 %v654_v1  ;;  %v656_v3 = vmul.f32 1.442695, %v653_v2 }
 0x41e   : > { %1082 = vpow2.f32 %v656_v3 }
 0x41f   : > { %1084 = vpow2.f32 %v470_v9 }
 0x420   : > { %1086 = vpow2.f32 %v640_v10 }
 0x426   : > { %v1081_v4 = vpop.eup %1080 }
 0x427   : > { %v663_v5 = vsel %vm459_vm2, %v1081_v4, 0.0 }
 0x428   : > { %v1083_v6 = vpop.eup %1082  ;;  %664 = vadd.xlane.f32.xlu0 %v663_v5 }
 0x429   : > { %v688_v7 = vpack.c.bf16 %v1083_v6, %v1081_v4  ;;  %v666_v8 = vsel %vm459_vm2, %v1083_v6, 0.0  ;;  %v1085_v11 = vpop.eup %1084 }
 0x42a   : > { %v492_v13 = vmul.f32 %v1085_v11, %v490_v12  ;;  %v1087_v15 = vpop.eup %1086 }
 0x42b   : > { %1013 = vmatmul.mubr.msk.bf16.vlgmr.msra.gmra.mrb[4].mxu0 %vm459_vm2, %v688_v7  ;;  %v662_v30 = vmul.f32 %v1087_v15, %v660_v28 }
 0x42c   : > { %667 = vadd.xlane.f32.xlu0 %v666_v8 }
 0x442   : > { %509 = vperm.xlu0 %1062, %v1085_v11  }
 0x444   : > { %v496_v14 = vpop.xlane.xlu0 %495 }
 0x445   : > { %v500_v16 = vadd.f32 %v496_v14, %v492_v13 }
 0x446   : > { %683 = vperm.xlu0 %1062, %v1087_v15  }
 0x447   : > { %503 = vst.msk [vmem:[#allocation3] sm:$0xff] %vm385_vm1, %v500_v16 }
 0x44b   : > { %v499_v22 = vpop.xlane.xlu1 %498 }
 0x44c   : > { %v501_v23 = vadd.f32 %v499_v22, %v493_v20 }
 0x44e   : > { %504 = vst.msk [vmem:[#allocation3 + $0x8] sm:$0xff] %vm385_vm1, %v501_v23  ;;  %v746_v17 = vld [vmem:[#allocation3] sm:$0xff] }
 0x44f   : > { %1088 = vrcp.f32 %v746_v17  ;;  %v515_v37 = vpop.permute.xlu1 %514 }
 0x450   : > { %v518_v46 = vmul.f32 0.0, %v515_v37 }
 0x452   : > { %v571_v49 = vadd.f32 %v1279_v40, %v518_v46 }
 0x453   : > { %v679_v42 = vpop.permute.xlu1 %678 }
 0x454   : > { %v686_v58 = vmul.f32 0.0, %v679_v42 }
 0x455   : > { %v747_v19 = vld [vmem:[#allocation3 + $0x8] sm:$0xff] }
 0x456   : > { %1090 = vrcp.f32 %v747_v19 }
 0x459   : > { %v1089_v21 = vpop.eup %1088 }
 0x45a   : > { %754 = vperm.xlu1 %1061, %v1089_v21  }
 0x460   : > { %v1091_v24 = vpop.eup %1090 }
 0x461   : > { %759 = vperm.xlu0 %1062, %v1091_v24  }
 0x4b5   : > { %v665_v27 = vpop.xlane.xlu0 %664 }
 0x4b6   : > { %v669_v29 = vadd.f32 %v665_v27, %v661_v26 }
 0x4b8   : > { %671 = vst.msk [vmem:[#allocation3 + $0x10] sm:$0xff] %vm385_vm1, %v669_v29 }
 0x4b9   : > { %v668_v31 = vpop.xlane.xlu0 %667 }
 0x4ba   : > { %v670_v32 = vadd.f32 %v668_v31, %v662_v30 }
 0x4bc   : > { %672 = vst.msk [vmem:[#allocation3 + $0x18] sm:$0xff] %vm385_vm1, %v670_v32 }
 0x4bf   : > { %v774_v33 = vld [vmem:[#allocation3 + $0x10] sm:$0xff] }
 0x4c0   : > { %1092 = vrcp.f32 %v774_v33 }
 0x4c1   : > { %v510_v39 = vpop.permute.xlu0 %509 }
 0x4c2   : > { %v517_v41 = vmul.f32 0.0, %v510_v39 }
 0x4c3   : > { %v775_v34 = vld [vmem:[#allocation3 + $0x18] sm:$0xff] }
 0x4c4   : > { %1094 = vrcp.f32 %v775_v34  ;;  %v570_v43 = vadd.f32 %v1277_v38, %v517_v41 }
 0x4c5   : > { %v684_v47 = vpop.permute.xlu0 %683 }
 0x4c6   : > { %v687_v54 = vmul.f32 0.0, %v684_v47 }
 0x4ca   : > { %v1093_v35 = vpop.eup %1092 }
 0x4cb   : > { %782 = vperm.xlu1 %1061, %v1093_v35  }
 0x4ce   : > { %v1095_v36 = vpop.eup %1094 }
 0x4cf   : > { %787 = vperm.xlu0 %1062, %v1095_v36  }
 0x4d9   : > { %v755_v44 = vpop.permute.xlu1 %754 }
 0x4da   : > { %v762_v45 = vmul.f32 %v755_v44, %v570_v43 }
 0x4dc   : > { %v980_v48 = vpack.c.bf16 %v762_v45, %v762_v45 }
 0x4de   : > { %772 = vst [vmem:[%s378_s30] sm:$0xf] %v980_v48 }
 0x4e0   : > { %v760_v50 = vpop.permute.xlu0 %759 }
 0x4e1   : > { %v763_v51 = vmul.f32 %v760_v50, %v571_v49 }
 0x4e3   : > { %v981_v52 = vpack.c.bf16 %v763_v51, %v763_v51 }
 0x4e5   : > { %773 = vst [vmem:[%s378_s30 + $0x8] sm:$0xf] %v981_v52 }
 0x4fe   : > { %v730_v53 = vpop.f32.mrb[4].mxu0 }
 0x4ff   : > { %v1014_v55 = vpop.f32.mrb[5].mxu0  ;;  %v737_v59 = vadd.f32 %v730_v53, %v686_v58 }
 0x500   : > { %v733_v38 = vpop.f32.mrb[6].mxu0 }
 0x501   : > { %v738_v56 = vadd.f32 %v733_v38, %v687_v54  ;;  %v1015_v57 = vpop.f32.mrb[7].mxu0 }
 0x54a   : > { %v783_v60 = vpop.permute.xlu1 %782 }
 0x54b   : > { %v790_v61 = vmul.f32 %v783_v60, %v737_v59 }
 0x54d   : > { %v982_v62 = vpack.c.bf16 %v790_v61, %v790_v61 }
 0x54e   : > { %v788_v63 = vpop.permute.xlu0 %787 }
 0x54f   : > { %800 = vst [vmem:[%s378_s30 + $0x4] sm:$0xf] %v982_v62  ;;  %v791_v0 = vmul.f32 %v788_v63, %v738_v56 }
 0x551   : > { %v983_v1 = vpack.c.bf16 %v791_v0, %v791_v0 }
 0x553   : > { %801 = vst [vmem:[%s378_s30 + $0xc] sm:$0xf] %v983_v1 }
 0x554 PF: > { %s13_s16 = sadd.s32 1, %s1134_s16   ;;  %s1324_s12 = smov %s1122_s13 }
 0x555   : > { %p10_p10 = scmp.ge.s32.totalorder %s13_s16, 4   ;;  %s1325_s13 = smov %s1199_s21 }
 0x556   : > { %s1326_s14 = smov %s1130_s15  ;;  %s1327_s15 = smov %s1329_s17 }
 0x557   :  { %12 = sbr.rel (!%p10_p10) target bundleno = 3 (0x3), region = 208 }

// kernel: pixart_controlnet_adapter_block.13
= control target key start
LH: loop header
LB: loop body
LE: loop exit
PB: predicated region body
PF: predicated region fallthrough
CT: control target
= control target key end

     0   :  { %s1148_s18 = smov 0   ;;  %s1150_s19 = smov 0   ;;  %s1295_s0 = inlined_call_operand.vmem [shape: bf16[2,16,256], index: 0, kind: input, shape index: {}]   ;;  %s1296_s1 = inlined_call_operand.vmem [shape: bf16[256,256], index: 1, kind: input, shape index: {}]   ;;  %s1297_s2 = inlined_call_operand.vmem [shape: f32[1,256], index: 2, kind: input, shape index: {}]   ;;  %s1298_s3 = inlined_call_operand.vmem [shape: f32[2,1,256], index: 3, kind: input, shape index: {}]   ;;  %s1299_s4 = inlined_call_operand.vmem [shape: f32[2,16,256], index: 4, kind: input, shape index: {}]   ;;  %s1300_s5 = inlined_call_operand.vmem [shape: f32[2,16,256], index: 5, kind: output, shape index: {}]  }
   0x1   :  { %s1152_s20 = smov 0  }
   0x2 LB: > { %s41_s21 = sadd.s32 1, %s1112_s19  ;;  %p972_p0 = scmp.ge.s32.totalorder %s1116_s20, 1  ;;  %s1116_s20 = sphi %s1152_s20, %s15_s20   ;;  %s1112_s19 = sphi %s1150_s19, %s1302_s19   ;;  %s1108_s18 = sphi %s1148_s18, %s1301_s18  }
   0x3   : > { %p43_p1 = scmp.ge.s32.totalorder %s41_s21, 2  ;;  %p302_p2 = scmp.lt.s32.totalorder %s1116_s20, 3 }
   0x5   : > { %s1304_s21 = smov (%p43_p1, %s41_s21), 0  ;;  %p303_p3 = pnand %p972_p0, %p302_p2 }
   0x6   : > { %v1043_v0 = vld [vmem:[%s1296_s1 + $0x4] ss:$8 sps:$4 sm:$0xff] (!%p303_p3)   ;;  %v1045_v1 = vld [vmem:[%s1296_s1] ss:$8 sps:$4 sm:$0xff] (!%p303_p3)   ;;  %v1046_v2 = vld [vmem:[%s1296_s1 + $0x14] ss:$8 sps:$4 sm:$0xff] (!%p303_p3)   ;;  %v734_v34 = vlaneseq (!%p303_p3) }
   0x7   : > { %306 = sbr.rel (%p303_p3) target bundleno = 293 (0x125), region = 40  ;;  %674 = vmatprep.subr.bf16.mxu0 (!%p303_p3), %v1043_v0  ;;  %v1048_v3 = vld [vmem:[%s1296_s1 + $0x10] ss:$8 sps:$4 sm:$0xff] (!%p303_p3)   ;;  %v1049_v4 = vld [vmem:[%s1296_s1 + $0x24] ss:$8 sps:$4 sm:$0xff] (!%p303_p3)   ;;  %p386_p4 = scmp.lt.s32.totalorder (!%p303_p3), %s1108_s18, 1 }
   0x8   : > { %675 = vmatpush1.bf16.msra.mxu0 (!%p303_p3), %v1045_v1  ;;  %v1051_v5 = vld [vmem:[%s1296_s1 + $0x20] ss:$8 sps:$4 sm:$0xff] (!%p303_p3)   ;;  %v1052_v6 = vld [vmem:[%s1296_s1 + $0x34] ss:$8 sps:$4 sm:$0xff] (!%p303_p3)   ;;  %v1054_v7 = vld [vmem:[%s1296_s1 + $0x30] ss:$8 sps:$4 sm:$0xff] (!%p303_p3)  }
   0x9   : > { %676 = vmatprep.subr.bf16.mxu0 (!%p303_p3), %v1046_v2  ;;  %v1055_v8 = vld [vmem:[%s1296_s1 + $0x44] ss:$8 sps:$4 sm:$0xff] (!%p303_p3)   ;;  %v1057_v9 = vld [vmem:[%s1296_s1 + $0x40] ss:$8 sps:$4 sm:$0xff] (!%p303_p3)   ;;  %v1058_v10 = vld [vmem:[%s1296_s1 + $0x54] ss:$8 sps:$4 sm:$0xff] (!%p303_p3)  }
   0xa   : > { %v1060_v11 = vld [vmem:[%s1296_s1 + $0x50] ss:$8 sps:$4 sm:$0xff] (!%p303_p3)   ;;  %v1061_v12 = vld [vmem:[%s1296_s1 + $0x64] ss:$8 sps:$4 sm:$0xff] (!%p303_p3)   ;;  %v1063_v14 = vld [vmem:[%s1296_s1 + $0x60] ss:$8 sps:$4 sm:$0xff] (!%p303_p3)  }
   0xb   : > { %v1064_v15 = vld [vmem:[%s1296_s1 + $0x74] ss:$8 sps:$4 sm:$0xff] (!%p303_p3)   ;;  %v1066_v16 = vld [vmem:[%s1296_s1 + $0x70] ss:$8 sps:$4 sm:$0xff] (!%p303_p3)   ;;  %v1067_v17 = vld [vmem:[%s1296_s1 + $0x84] ss:$8 sps:$4 sm:$0xff] (!%p303_p3)  }
   0xc   : > { %677 = vmatpush1.bf16.msra.mxu0 (!%p303_p3), %v1048_v3  ;;  %v1069_v18 = vld [vmem:[%s1296_s1 + $0x80] ss:$8 sps:$4 sm:$0xff] (!%p303_p3)   ;;  %v1070_v19 = vld [vmem:[%s1296_s1 + $0x94] ss:$8 sps:$4 sm:$0xff] (!%p303_p3)   ;;  %v1072_v20 = vld [vmem:[%s1296_s1 + $0x90] ss:$8 sps:$4 sm:$0xff] (!%p303_p3)  }
   0xd   : > { %678 = vmatprep.subr.bf16.mxu0 (!%p303_p3), %v1049_v4  ;;  %v1073_v21 = vld [vmem:[%s1296_s1 + $0xa4] ss:$8 sps:$4 sm:$0xff] (!%p303_p3)   ;;  %v1075_v22 = vld [vmem:[%s1296_s1 + $0xa0] ss:$8 sps:$4 sm:$0xff] (!%p303_p3)   ;;  %v1076_v23 = vld [vmem:[%s1296_s1 + $0xb4] ss:$8 sps:$4 sm:$0xff] (!%p303_p3)  }
   0xe   : > { %s1306_s18 = smov (!%p386_p4, %s1108_s18), 1  ;;  %v1078_v24 = vld [vmem:[%s1296_s1 + $0xb0] ss:$8 sps:$4 sm:$0xff]   ;;  %v1079_v25 = vld [vmem:[%s1296_s1 + $0xc4] ss:$8 sps:$4 sm:$0xff]   ;;  %v735_v35 = vshrl.u32 %v734_v34, 7 }
   0xf   : > { %s1016_s23 = sshll.u32 %s1306_s18, 4  ;;  %v1081_v26 = vld [vmem:[%s1296_s1 + $0xc0] ss:$8 sps:$4 sm:$0xff]   ;;  %v1082_v27 = vld [vmem:[%s1296_s1 + $0xd4] ss:$8 sps:$4 sm:$0xff]   ;;  %s975_s29 = sshll.u32 %s1306_s18, 1 }
  0x10   : > { %679 = vmatpush1.bf16.msra.mxu0 %v1051_v5  ;;  %s1208_s28 = scalar_lea.vmem %s1295_s0, %s1016_s23  ;;  %v1084_v28 = vld [vmem:[%s1296_s1 + $0xd0] ss:$8 sps:$4 sm:$0xff]   ;;  %v1085_v29 = vld [vmem:[%s1296_s1 + $0xe4] ss:$8 sps:$4 sm:$0xff]   ;;  %v1087_v30 = vld [vmem:[%s1296_s1 + $0xe0] ss:$8 sps:$4 sm:$0xff]   ;;  %s424_s7 = scalar_lea.vmem %s1298_s3, %s975_s29 }
  0x11   : > { %680 = vmatprep.subr.bf16.mxu0 %v1052_v6  ;;  %v1093_v13 = vld [vmem:[%s1208_s28 + $0x4] ss:$8 sps:$4 sm:$0xff]   ;;  %v1088_v31 = vld [vmem:[%s1296_s1 + $0xf4] ss:$8 sps:$4 sm:$0xff]   ;;  %v1090_v32 = vld [vmem:[%s1296_s1 + $0xf0] ss:$8 sps:$4 sm:$0xff]  }
  0x12   : > { %706 = vmatprep.mubr.bf16.mxu0 %v1093_v13  ;;  %v1091_v33 = vld [vmem:[%s1208_s28] ss:$8 sps:$4 sm:$0xff]   ;;  %v736_v36 = vsub.s32 0, %v735_v35  ;;  %v740_v38 = vsub.s32 1, %v735_v35  ;;  %s1017_s10 = sshll.u32 %s1306_s18, 5 }
  0x13   : > { %v732_v37 = vld [vmem:[%s1297_s2] sm:$0x3]  ;;  %s439_s12 = scalar_lea.vmem %s1299_s4, %s1017_s10  ;;  %s455_s14 = scalar_lea.vmem %s1300_s5, %s1017_s10 }
  0x14   : > { %681 = vmatpush1.bf16.msra.mxu0 %v1054_v7  ;;  %v748_v39 = vld [vmem:[%s424_s7] sm:$0x3]  ;;  %v737_v40 = vrot.slane %v732_v37, %v736_v36  ;;  %v741_v41 = vrot.slane %v732_v37, %v740_v38  ;;  %v765_v51 = vld [vmem:[%s439_s12 + $0x8] sm:$0xff]  ;;  %v766_v55 = vld [vmem:[%s439_s12 + $0x10] sm:$0xff] }
  0x15   : > { %682 = vmatprep.subr.bf16.mxu0 %v1055_v8  ;;  %v753_v42 = vrot.slane %v748_v39, %v736_v36  ;;  %v757_v44 = vrot.slane %v748_v39, %v740_v38  ;;  %v764_v47 = vld [vmem:[%s439_s12] sm:$0xff]  ;;  %v767_v59 = vld [vmem:[%s439_s12 + $0x18] sm:$0xff] }
  0x18   : > { %683 = vmatpush1.bf16.msra.mxu0 %v1057_v9 }
  0x19   : > { %684 = vmatprep.subr.bf16.mxu0 %v1058_v10 }
  0x1c   : > { %685 = vmatpush1.bf16.msra.mxu0 %v1060_v11 }
  0x1d   : > { %686 = vmatprep.subr.bf16.mxu0 %v1061_v12 }
  0x20   : > { %687 = vmatpush1.bf16.msra.mxu0 %v1063_v14 }
  0x21   : > { %688 = vmatprep.subr.bf16.mxu0 %v1064_v15 }
  0x24   : > { %689 = vmatpush1.bf16.msra.mxu0 %v1066_v16 }
  0x25   : > { %690 = vmatprep.subr.bf16.mxu0 %v1067_v17 }
  0x28   : > { %691 = vmatpush1.bf16.msra.mxu0 %v1069_v18 }
  0x29   : > { %692 = vmatprep.subr.bf16.mxu0 %v1070_v19 }
  0x2c   : > { %693 = vmatpush1.bf16.msra.mxu0 %v1072_v20 }
  0x2d   : > { %694 = vmatprep.subr.bf16.mxu0 %v1073_v21 }
  0x30   : > { %695 = vmatpush1.bf16.msra.mxu0 %v1075_v22 }
  0x31   : > { %696 = vmatprep.subr.bf16.mxu0 %v1076_v23 }
  0x34   : > { %697 = vmatpush1.bf16.msra.mxu0 %v1078_v24 }
  0x35   : > { %698 = vmatprep.subr.bf16.mxu0 %v1079_v25 }
  0x38   : > { %699 = vmatpush1.bf16.msra.mxu0 %v1081_v26 }
  0x39   : > { %700 = vmatprep.subr.bf16.mxu0 %v1082_v27 }
  0x3c   : > { %701 = vmatpush1.bf16.msra.mxu0 %v1084_v28 }
  0x3d   : > { %702 = vmatprep.subr.bf16.mxu0 %v1085_v29 }
  0x40   : > { %703 = vmatpush1.bf16.msra.mxu0 %v1087_v30 }
  0x41   : > { %704 = vmatprep.subr.bf16.mxu0 %v1088_v31 }
  0x44   : > { %705 = vmatpush1.bf16.msra.mxu0 %v1090_v32 }
  0x47   : > { %707 = vmatmul.mubr.bf16.vlgmr.msra.gmra.mrb[0].mxu0 %v1091_v33 }
 0x11a   : > { %v708_v43 = vpop.f32.mrb[0].mxu0 }
 0x11b   : > { %v744_v45 = vadd.f32 %v737_v40, %v708_v43  ;;  %v710_v46 = vpop.f32.mrb[1].mxu0 }
 0x11c   : > { %v745_v48 = vadd.f32 %v741_v41, %v710_v46  ;;  %v712_v49 = vpop.f32.mrb[2].mxu0 }
 0x11d   : > { %v760_v50 = vmul.f32 %v753_v42, %v744_v45  ;;  %v746_v52 = vadd.f32 %v737_v40, %v712_v49  ;;  %v714_v53 = vpop.f32.mrb[3].mxu0 }
 0x11e   : > { %v761_v54 = vmul.f32 %v757_v44, %v745_v48  ;;  %v747_v56 = vadd.f32 %v741_v41, %v714_v53 }
 0x11f   : > { %v768_v57 = vadd.f32 %v764_v47, %v760_v50  ;;  %v762_v58 = vmul.f32 %v753_v42, %v746_v52 }
 0x120   : > { %v769_v60 = vadd.f32 %v765_v51, %v761_v54  ;;  %v763_v61 = vmul.f32 %v757_v44, %v747_v56 }
 0x121   : > { %772 = vst [vmem:[%s455_s14] sm:$0xff] %v768_v57  ;;  %v770_v62 = vadd.f32 %v766_v55, %v762_v58 }
 0x122   : > { %773 = vst [vmem:[%s455_s14 + $0x8] sm:$0xff] %v769_v60  ;;  %v771_v63 = vadd.f32 %v767_v59, %v763_v61 }
 0x123   : > { %774 = vst [vmem:[%s455_s14 + $0x10] sm:$0xff] %v770_v62 }
 0x124   : > { %775 = vst [vmem:[%s455_s14 + $0x18] sm:$0xff] %v771_v63 }
 0x125 PF: > { %s15_s20 = sadd.s32 1, %s1116_s20   ;;  %s1301_s18 = smov %s1112_s19 }
 0x126   : > { %p12_p5 = scmp.ge.s32.totalorder %s15_s20, 4   ;;  %s1302_s19 = smov %s1304_s21 }
 0x128   :  { %14 = sbr.rel (!%p12_p5) target bundleno = 2 (0x2), region = 90 }

// kernel: pixart_controlnet_adapter_block.14
= control target key start
LH: loop header
LB: loop body
LE: loop exit
PB: predicated region body
PF: predicated region fallthrough
CT: control target
= control target key end

     0   :  { %s932_s12 = smov 0   ;;  %s934_s13 = smov 0   ;;  %s1074_s0 = inlined_call_operand.vmem [shape: f32[2,16,256], index: 0, kind: input, shape index: {}]   ;;  %s1075_s1 = inlined_call_operand.vmem [shape: bf16[256,256], index: 1, kind: input, shape index: {}]   ;;  %s1076_s2 = inlined_call_operand.vmem [shape: f32[1,256], index: 2, kind: input, shape index: {}]   ;;  %s1077_s3 = inlined_call_operand.vmem [shape: bf16[2,16,256], index: 3, kind: output, shape index: {}]  }
   0x1   :  { %s936_s14 = smov 0  }
   0x2 LB: > { %s39_s15 = sadd.s32 1, %s906_s13  ;;  %p771_p0 = scmp.ge.s32.totalorder %s910_s14, 1  ;;  %s910_s14 = sphi %s936_s14, %s13_s14   ;;  %s906_s13 = sphi %s934_s13, %s1079_s13   ;;  %s902_s12 = sphi %s932_s12, %s1078_s12  }
   0x3   : > { %p41_p1 = scmp.ge.s32.totalorder %s39_s15, 2  ;;  %p211_p2 = scmp.lt.s32.totalorder %s910_s14, 3 }
   0x5   : > { %s1081_s15 = smov (%p41_p1, %s39_s15), 0  ;;  %p212_p3 = pnand %p771_p0, %p211_p2 }
   0x6   : > { %v840_v0 = vld [vmem:[%s1075_s1 + $0x4] ss:$8 sps:$4 sm:$0xff] (!%p212_p3)   ;;  %v842_v1 = vld [vmem:[%s1075_s1] ss:$8 sps:$4 sm:$0xff] (!%p212_p3)   ;;  %v843_v2 = vld [vmem:[%s1075_s1 + $0x14] ss:$8 sps:$4 sm:$0xff] (!%p212_p3)   ;;  %v586_v38 = vlaneseq (!%p212_p3) }
   0x7   : > { %215 = sbr.rel (%p212_p3) target bundleno = 291 (0x123), region = 32  ;;  %526 = vmatprep.subr.bf16.mxu0 (!%p212_p3), %v840_v0  ;;  %v845_v3 = vld [vmem:[%s1075_s1 + $0x10] ss:$8 sps:$4 sm:$0xff] (!%p212_p3)   ;;  %v846_v4 = vld [vmem:[%s1075_s1 + $0x24] ss:$8 sps:$4 sm:$0xff] (!%p212_p3)   ;;  %p269_p4 = scmp.lt.s32.totalorder (!%p212_p3), %s902_s12, 1 }
   0x8   : > { %527 = vmatpush1.bf16.msra.mxu0 (!%p212_p3), %v842_v1  ;;  %v848_v5 = vld [vmem:[%s1075_s1 + $0x20] ss:$8 sps:$4 sm:$0xff] (!%p212_p3)   ;;  %v849_v6 = vld [vmem:[%s1075_s1 + $0x34] ss:$8 sps:$4 sm:$0xff] (!%p212_p3)   ;;  %v851_v7 = vld [vmem:[%s1075_s1 + $0x30] ss:$8 sps:$4 sm:$0xff] (!%p212_p3)  }
   0x9   : > { %528 = vmatprep.subr.bf16.mxu0 (!%p212_p3), %v843_v2  ;;  %v852_v8 = vld [vmem:[%s1075_s1 + $0x44] ss:$8 sps:$4 sm:$0xff] (!%p212_p3)   ;;  %v854_v9 = vld [vmem:[%s1075_s1 + $0x40] ss:$8 sps:$4 sm:$0xff] (!%p212_p3)   ;;  %v855_v10 = vld [vmem:[%s1075_s1 + $0x54] ss:$8 sps:$4 sm:$0xff] (!%p212_p3)  }
   0xa   : > { %v857_v11 = vld [vmem:[%s1075_s1 + $0x50] ss:$8 sps:$4 sm:$0xff] (!%p212_p3)   ;;  %v858_v12 = vld [vmem:[%s1075_s1 + $0x64] ss:$8 sps:$4 sm:$0xff] (!%p212_p3)   ;;  %v860_v16 = vld [vmem:[%s1075_s1 + $0x60] ss:$8 sps:$4 sm:$0xff] (!%p212_p3)  }
   0xb   : > { %v861_v17 = vld [vmem:[%s1075_s1 + $0x74] ss:$8 sps:$4 sm:$0xff] (!%p212_p3)   ;;  %v863_v18 = vld [vmem:[%s1075_s1 + $0x70] ss:$8 sps:$4 sm:$0xff] (!%p212_p3)   ;;  %v864_v19 = vld [vmem:[%s1075_s1 + $0x84] ss:$8 sps:$4 sm:$0xff] (!%p212_p3)  }
   0xc   : > { %529 = vmatpush1.bf16.msra.mxu0 (!%p212_p3), %v845_v3  ;;  %v866_v20 = vld [vmem:[%s1075_s1 + $0x80] ss:$8 sps:$4 sm:$0xff] (!%p212_p3)   ;;  %v867_v21 = vld [vmem:[%s1075_s1 + $0x94] ss:$8 sps:$4 sm:$0xff] (!%p212_p3)   ;;  %v869_v22 = vld [vmem:[%s1075_s1 + $0x90] ss:$8 sps:$4 sm:$0xff] (!%p212_p3)  }
   0xd   : > { %530 = vmatprep.subr.bf16.mxu0 (!%p212_p3), %v846_v4  ;;  %v870_v23 = vld [vmem:[%s1075_s1 + $0xa4] ss:$8 sps:$4 sm:$0xff] (!%p212_p3)   ;;  %v872_v24 = vld [vmem:[%s1075_s1 + $0xa0] ss:$8 sps:$4 sm:$0xff] (!%p212_p3)   ;;  %v873_v25 = vld [vmem:[%s1075_s1 + $0xb4] ss:$8 sps:$4 sm:$0xff] (!%p212_p3)  }
   0xe   : > { %s1083_s12 = smov (!%p269_p4, %s902_s12), 1  ;;  %v875_v26 = vld [vmem:[%s1075_s1 + $0xb0] ss:$8 sps:$4 sm:$0xff]   ;;  %v876_v27 = vld [vmem:[%s1075_s1 + $0xc4] ss:$8 sps:$4 sm:$0xff]   ;;  %v587_v39 = vshrl.u32 %v586_v38, 7 }
   0xf   : > { %s812_s9 = sshll.u32 %s1083_s12, 5  ;;  %v878_v28 = vld [vmem:[%s1075_s1 + $0xc0] ss:$8 sps:$4 sm:$0xff]   ;;  %v879_v29 = vld [vmem:[%s1075_s1 + $0xd4] ss:$8 sps:$4 sm:$0xff]   ;;  %s813_s19 = sshll.u32 %s1083_s12, 4 }
  0x10   : > { %531 = vmatpush1.bf16.msra.mxu0 %v848_v5  ;;  %s989_s18 = scalar_lea.vmem %s1074_s0, %s812_s9  ;;  %v881_v30 = vld [vmem:[%s1075_s1 + $0xd0] ss:$8 sps:$4 sm:$0xff]   ;;  %v882_v31 = vld [vmem:[%s1075_s1 + $0xe4] ss:$8 sps:$4 sm:$0xff]   ;;  %v884_v32 = vld [vmem:[%s1075_s1 + $0xe0] ss:$8 sps:$4 sm:$0xff]   ;;  %s313_s21 = scalar_lea.vmem %s1077_s3, %s813_s19 }
  0x11   : > { %532 = vmatprep.subr.bf16.mxu0 %v849_v6  ;;  %v325_v13 = vld [vmem:[%s989_s18 + $0x8] sm:$0xff]  ;;  %v327_v14 = vld [vmem:[%s989_s18 + $0x18] sm:$0xff]  ;;  %v324_v35 = vld [vmem:[%s989_s18] sm:$0xff]  ;;  %v588_v40 = vsub.s32 0, %v587_v39  ;;  %v592_v42 = vsub.s32 1, %v587_v39 }
  0x12   : > { %v329_v15 = vpack.c.bf16 %v327_v14, %v325_v13  ;;  %v885_v33 = vld [vmem:[%s1075_s1 + $0xf4] ss:$8 sps:$4 sm:$0xff]   ;;  %v887_v34 = vld [vmem:[%s1075_s1 + $0xf0] ss:$8 sps:$4 sm:$0xff]   ;;  %v584_v41 = vld [vmem:[%s1076_s2] sm:$0x3] }
  0x13   : > { %v326_v36 = vld [vmem:[%s989_s18 + $0x10] sm:$0xff]  ;;  %v589_v43 = vrot.slane %v584_v41, %v588_v40  ;;  %v593_v44 = vrot.slane %v584_v41, %v592_v42 }
  0x14   : > { %533 = vmatpush1.bf16.msra.mxu0 %v851_v7  ;;  %558 = vmatprep.mubr.bf16.mxu0 %v329_v15  ;;  %v328_v37 = vpack.c.bf16 %v326_v36, %v324_v35 }
  0x15   : > { %534 = vmatprep.subr.bf16.mxu0 %v852_v8 }
  0x18   : > { %535 = vmatpush1.bf16.msra.mxu0 %v854_v9 }
  0x19   : > { %536 = vmatprep.subr.bf16.mxu0 %v855_v10 }
  0x1c   : > { %537 = vmatpush1.bf16.msra.mxu0 %v857_v11 }
  0x1d   : > { %538 = vmatprep.subr.bf16.mxu0 %v858_v12 }
  0x20   : > { %539 = vmatpush1.bf16.msra.mxu0 %v860_v16 }
  0x21   : > { %540 = vmatprep.subr.bf16.mxu0 %v861_v17 }
  0x24   : > { %541 = vmatpush1.bf16.msra.mxu0 %v863_v18 }
  0x25   : > { %542 = vmatprep.subr.bf16.mxu0 %v864_v19 }
  0x28   : > { %543 = vmatpush1.bf16.msra.mxu0 %v866_v20 }
  0x29   : > { %544 = vmatprep.subr.bf16.mxu0 %v867_v21 }
  0x2c   : > { %545 = vmatpush1.bf16.msra.mxu0 %v869_v22 }
  0x2d   : > { %546 = vmatprep.subr.bf16.mxu0 %v870_v23 }
  0x30   : > { %547 = vmatpush1.bf16.msra.mxu0 %v872_v24 }
  0x31   : > { %548 = vmatprep.subr.bf16.mxu0 %v873_v25 }
  0x34   : > { %549 = vmatpush1.bf16.msra.mxu0 %v875_v26 }
  0x35   : > { %550 = vmatprep.subr.bf16.mxu0 %v876_v27 }
  0x38   : > { %551 = vmatpush1.bf16.msra.mxu0 %v878_v28 }
  0x39   : > { %552 = vmatprep.subr.bf16.mxu0 %v879_v29 }
  0x3c   : > { %553 = vmatpush1.bf16.msra.mxu0 %v881_v30 }
  0x3d   : > { %554 = vmatprep.subr.bf16.mxu0 %v882_v31 }
  0x40   : > { %555 = vmatpush1.bf16.msra.mxu0 %v884_v32 }
  0x41   : > { %556 = vmatprep.subr.bf16.mxu0 %v885_v33 }
  0x44   : > { %557 = vmatpush1.bf16.msra.mxu0 %v887_v34 }
  0x47   : > { %559 = vmatmul.mubr.bf16.vlgmr.msra.gmra.mrb[0].mxu0 %v328_v37 }
 0x11a   : > { %v560_v45 = vpop.f32.mrb[0].mxu0 }
 0x11b   : > { %v596_v46 = vadd.f32 %v589_v43, %v560_v45  ;;  %v562_v47 = vpop.f32.mrb[1].mxu0 }
 0x11c   : > { %v597_v48 = vadd.f32 %v593_v44, %v562_v47  ;;  %v564_v49 = vpop.f32.mrb[2].mxu0 }
 0x11d   : > { %v598_v50 = vadd.f32 %v589_v43, %v564_v49  ;;  %v566_v51 = vpop.f32.mrb[3].mxu0 }
 0x11e   : > { %v814_v52 = vpack.c.bf16 %v597_v48, %v596_v46  ;;  %v599_v53 = vadd.f32 %v593_v44, %v566_v51 }
 0x120   : > { %612 = vst [vmem:[%s313_s21] sm:$0xff] %v814_v52  ;;  %v815_v54 = vpack.c.bf16 %v599_v53, %v598_v50 }
 0x122   : > { %613 = vst [vmem:[%s313_s21 + $0x8] sm:$0xff] %v815_v54 }
 0x123 PF: > { %s13_s14 = sadd.s32 1, %s910_s14   ;;  %s1078_s12 = smov %s906_s13 }
 0x124   : > { %p10_p5 = scmp.ge.s32.totalorder %s13_s14, 4   ;;  %s1079_s13 = smov %s1081_s15 }
 0x126   :  { %12 = sbr.rel (!%p10_p5) target bundleno = 2 (0x2), region = 76 }

// kernel: pixart_controlnet_adapter_block.16
= control target key start
LH: loop header
LB: loop body
LE: loop exit
PB: predicated region body
PF: predicated region fallthrough
CT: control target
= control target key end

     0   :  { %s732_s9 = smov 0   ;;  %s734_s10 = smov 0   ;;  %s797_s0 = inlined_call_operand.vmem [shape: bf16[2,16,256], index: 0, kind: input, shape index: {}]   ;;  %s798_s1 = inlined_call_operand.vmem [shape: bf16[2,8,512], index: 1, kind: input, shape index: {}]   ;;  %s799_s2 = inlined_call_operand.vmem [shape: bf16[2,16,256], index: 2, kind: output, shape index: {}]  }
   0x1   :  { %s736_s11 = smov 0  }
   0x2 LB: > { %s24_s12 = sadd.s32 1, %s709_s10  ;;  %p586_p0 = scmp.ge.s32.totalorder %s713_s11, 1  ;;  %s713_s11 = sphi %s736_s11, %s12_s11   ;;  %s709_s10 = sphi %s734_s10, %s801_s10   ;;  %s705_s9 = sphi %s732_s9, %s800_s9  }
   0x3   : > { %p26_p1 = scmp.ge.s32.totalorder %s24_s12, 2  ;;  %p144_p2 = scmp.lt.s32.totalorder %s713_s11, 3 }
   0x5   : > { %s803_s12 = smov (%p26_p1, %s24_s12), 0  ;;  %p145_p3 = pnand %p586_p0, %p144_p2 }
   0x6   : > { %p182_p4 = scmp.lt.s32.totalorder (!%p145_p3), %s705_s9, 1  ;;  %v715_v0 = vmov (!%p145_p3), 0.0   ;;  %vm716_vm0 = vmmov (!%p145_p3), 0   ;;  %vm260_vm1 = vcmask (!%p145_p3), 64512   ;;  %vm283_vm2 = vcmask (!%p145_p3), 1043456  }
   0x7   : > { %148 = sbr.rel (%p145_p3) target bundleno = 1004 (0x3ec), region = 28  ;;  %620 = vmatprep.subr.bf16.mxu0 (!%p145_p3), %v715_v0  ;;  %622 = vmatprep.mubr.msk.bf16.mxu0 (!%p145_p3), %vm716_vm0, %v715_v0 }
   0x8   : > { %626 = vmatprep.subr.bf16.mxu1 (!%p145_p3), %v715_v0  ;;  %628 = vmatprep.mubr.msk.bf16.mxu1 (!%p145_p3), %vm716_vm0, %v715_v0 }
   0xe   : > { %s805_s9 = smov (!%p182_p4, %s705_s9), 1 }
   0xf   : > { %s752_s13 = sshll.u32 %s805_s9, 4 }
  0x10   : > { %s196_s16 = scalar_lea.vmem %s798_s1, %s752_s13  ;;  %s762_s19 = scalar_lea.vmem %s797_s0, %s752_s13 }
  0x11   : > { %v211_v1 = vld [vmem:[%s196_s16] sm:$0xff]  ;;  %v212_v9 = vld [vmem:[%s196_s16 + $0x8] sm:$0xff]  ;;  %s776_s22 = scalar_lea.vmem %s799_s2, %s752_s13 }
  0x12   : > { %621 = vmatpush3.bf16.xpose.msra.mxu0 %v211_v1  ;;  %v671_v2 = vld [vmem:[%s762_s19] ss:$8 sps:$4 sm:$0xff]   ;;  %v285_v10 = vsel %vm283_vm2, %v212_v9, 0  ;;  %v599_v11 = vcombine.high %v212_v9, %v212_v9  ;;  %v598_v22 = vcombine.high %v211_v1, %v211_v1  ;;  %v673_v24 = vld [vmem:[%s762_s19 + $0x4] ss:$8 sps:$4 sm:$0xff]  }
  0x13   : > { %638 = vmatprep.subr.bf16.mxu0 %v715_v0  ;;  %627 = vmatpush3.bf16.msra.mxu1 %v285_v10 }
  0x14   : > { %v417_v12 = vsel %vm283_vm2, %v599_v11, 0  ;;  %632 = vmatprep.subr.bf16.mxu1 %v715_v0 }
  0x19   : > { %623 = vmatmul.mubr.bf16.vlgmr.msra.gmra.mrb[0].mxu0 %v671_v2 }
  0x1a   : > { %640 = vmatprep.mubr.msk.bf16.mxu0 %vm716_vm0, %v715_v0  ;;  %639 = vmatpush3.bf16.msra.mxu0 %v417_v12 }
  0xec   : > { %v253_v3 = vpop.f32.mrb[0].mxu0 }
  0xed   : > { %v624_v4 = vpop.f32.mrb[1].mxu0  ;;  %v261_v5 = vsel %vm260_vm1, %v253_v3, -inf }
  0xee   : > { %262 = vmax.xlane.f32.xlu0 %v261_v5  ;;  %v256_v6 = vpop.f32.mrb[2].mxu0 }
  0xef   : > { %v625_v7 = vpop.f32.mrb[3].mxu0  ;;  %v264_v8 = vsel %vm260_vm1, %v256_v6, -inf }
  0xf2   : > { %265 = vmax.xlane.f32.xlu0 %v264_v8 }
 0x17b   : > { %v263_v13 = vpop.xlane.xlu0 %262 }
 0x17c   : > { %v267_v14 = vsub.f32 %v253_v3, %v263_v13 }
 0x17e   : > { %v269_v15 = vmul.f32 1.442695, %v267_v14 }
 0x17f   : > { %v266_v16 = vpop.xlane.xlu0 %265 }
 0x180   : > { %675 = vpow2.f32 %v269_v15  ;;  %v268_v17 = vsub.f32 %v256_v6, %v266_v16 }
 0x182   : > { %v271_v18 = vmul.f32 1.442695, %v268_v17 }
 0x184   : > { %677 = vpow2.f32 %v271_v18 }
 0x18a   : > { %v676_v19 = vpop.eup %675 }
 0x18b   : > { %v273_v20 = vsel %vm260_vm1, %v676_v19, 0.0 }
 0x18c   : > { %274 = vadd.xlane.f32.xlu0 %v273_v20 }
 0x18e   : > { %v678_v21 = vpop.eup %677 }
 0x18f   : > { %v279_v23 = vpack.c.bf16 %v678_v21, %v676_v19  ;;  %v276_v39 = vsel %vm260_vm1, %v678_v21, 0.0 }
 0x191   : > { %629 = vmatmul.mubr.msk.bf16.vlgmr.msra.gmra.mrb[0].mxu1 %vm260_vm1, %v279_v23 }
 0x192   : > { %633 = vmatpush3.bf16.xpose.msra.mxu1 %v598_v22  ;;  %634 = vmatprep.mubr.msk.bf16.mxu1 %vm716_vm0, %v715_v0 }
 0x199   : > { %635 = vmatmul.mubr.bf16.vlgmr.msra.gmra.mrb[4].mxu1 %v673_v24 }
 0x219   : > { %v275_v25 = vpop.xlane.xlu0 %274 }
 0x21a   : > { %679 = vrcp.f32 %v275_v25 }
 0x224   : > { %v680_v26 = vpop.eup %679 }
 0x264   : > { %v321_v27 = vpop.f32.mrb[0].mxu1 }
 0x265   : > { %v330_v28 = vmul.f32 %v680_v26, %v321_v27  ;;  %v630_v29 = vpop.f32.mrb[1].mxu1 }
 0x266   : > { %v324_v30 = vpop.f32.mrb[2].mxu1 }
 0x267   : > { %v608_v31 = vpack.c.bf16 %v330_v28, %v330_v28  ;;  %v631_v32 = vpop.f32.mrb[3].mxu1 }
 0x269   : > { %340 = vst [vmem:[%s776_s22] sm:$0xf] %v608_v31 }
 0x26c   : > { %v384_v33 = vpop.f32.mrb[4].mxu1 }
 0x26d   : > { %v636_v34 = vpop.f32.mrb[5].mxu1  ;;  %v391_v35 = vsel %vm260_vm1, %v384_v33, -inf }
 0x26e   : > { %392 = vmax.xlane.f32.xlu1 %v391_v35  ;;  %v387_v36 = vpop.f32.mrb[6].mxu1 }
 0x26f   : > { %v637_v37 = vpop.f32.mrb[7].mxu1  ;;  %v394_v38 = vsel %vm260_vm1, %v387_v36, -inf }
 0x272   : > { %395 = vmax.xlane.f32.xlu1 %v394_v38 }
 0x276   : > { %277 = vadd.xlane.f32.xlu1 %v276_v39 }
 0x2fb   : > { %v393_v40 = vpop.xlane.xlu1 %392 }
 0x2fc   : > { %v397_v41 = vsub.f32 %v384_v33, %v393_v40 }
 0x2fe   : > { %v399_v42 = vmul.f32 1.442695, %v397_v41 }
 0x2ff   : > { %v396_v43 = vpop.xlane.xlu1 %395 }
 0x300   : > { %681 = vpow2.f32 %v399_v42  ;;  %v398_v44 = vsub.f32 %v387_v36, %v396_v43 }
 0x302   : > { %v401_v45 = vmul.f32 1.442695, %v398_v44 }
 0x303   : > { %v278_v46 = vpop.xlane.xlu1 %277 }
 0x304   : > { %683 = vpow2.f32 %v401_v45 }
 0x305   : > { %685 = vrcp.f32 %v278_v46 }
 0x30a   : > { %v682_v47 = vpop.eup %681 }
 0x30b   : > { %v403_v48 = vsel %vm260_vm1, %v682_v47, 0.0 }
 0x30c   : > { %404 = vadd.xlane.f32.xlu0 %v403_v48 }
 0x30e   : > { %v684_v49 = vpop.eup %683 }
 0x30f   : > { %v686_v50 = vpop.eup %685  ;;  %v406_v51 = vsel %vm260_vm1, %v684_v49, 0.0  ;;  %v409_v52 = vpack.c.bf16 %v684_v49, %v682_v47 }
 0x310   : > { %v331_v53 = vmul.f32 %v686_v50, %v324_v30  ;;  %407 = vadd.xlane.f32.xlu1 %v406_v51 }
 0x311   : > { %641 = vmatmul.mubr.msk.bf16.vlgmr.msra.gmra.mrb[4].mxu0 %vm260_vm1, %v409_v52 }
 0x312   : > { %v609_v54 = vpack.c.bf16 %v331_v53, %v331_v53 }
 0x314   : > { %341 = vst [vmem:[%s776_s22 + $0x8] sm:$0xf] %v609_v54 }
 0x399   : > { %v405_v55 = vpop.xlane.xlu0 %404 }
 0x39a   : > { %687 = vrcp.f32 %v405_v55 }
 0x39d   : > { %v408_v56 = vpop.xlane.xlu1 %407 }
 0x39e   : > { %689 = vrcp.f32 %v408_v56 }
 0x3a4   : > { %v688_v57 = vpop.eup %687 }
 0x3a8   : > { %v690_v61 = vpop.eup %689 }
 0x3e4   : > { %v453_v58 = vpop.f32.mrb[4].mxu0 }
 0x3e5   : > { %v462_v59 = vmul.f32 %v688_v57, %v453_v58  ;;  %v642_v60 = vpop.f32.mrb[5].mxu0 }
 0x3e6   : > { %v456_v62 = vpop.f32.mrb[6].mxu0 }
 0x3e7   : > { %v610_v63 = vpack.c.bf16 %v462_v59, %v462_v59  ;;  %v463_v0 = vmul.f32 %v690_v61, %v456_v62  ;;  %v643_v1 = vpop.f32.mrb[7].mxu0 }
 0x3e9   : > { %472 = vst [vmem:[%s776_s22 + $0x4] sm:$0xf] %v610_v63  ;;  %v611_v2 = vpack.c.bf16 %v463_v0, %v463_v0 }
 0x3eb   : > { %473 = vst [vmem:[%s776_s22 + $0xc] sm:$0xf] %v611_v2 }
 0x3ec PF: > { %s12_s11 = sadd.s32 1, %s713_s11   ;;  %s800_s9 = smov %s709_s10 }
 0x3ed   : > { %p9_p5 = scmp.ge.s32.totalorder %s12_s11, 4   ;;  %s801_s10 = smov %s803_s12 }
 0x3ef   :  { %11 = sbr.rel (!%p9_p5) target bundleno = 2 (0x2), region = 61 }

// kernel: pixart_controlnet_adapter_block.17
= control target key start
LH: loop header
LB: loop body
LE: loop exit
PB: predicated region body
PF: predicated region fallthrough
CT: control target
= control target key end

     0   :  { %s1051_s15 = smov 0   ;;  %s1053_s16 = smov 0   ;;  %s1194_s0 = inlined_call_operand.vmem [shape: bf16[2,16,256], index: 0, kind: input, shape index: {}]   ;;  %s1195_s1 = inlined_call_operand.vmem [shape: bf16[256,256], index: 1, kind: input, shape index: {}]   ;;  %s1196_s2 = inlined_call_operand.vmem [shape: f32[1,256], index: 2, kind: input, shape index: {}]   ;;  %s1197_s3 = inlined_call_operand.vmem [shape: f32[2,16,256], index: 3, kind: input, shape index: {}]   ;;  %s1198_s4 = inlined_call_operand.vmem [shape: f32[2,16,256], index: 4, kind: output, shape index: {}]  }
   0x1   :  { %s1055_s17 = smov 0  }
   0x2 LB: > { %s40_s18 = sadd.s32 1, %s1020_s16  ;;  %p881_p0 = scmp.ge.s32.totalorder %s1024_s17, 1  ;;  %s1024_s17 = sphi %s1055_s17, %s14_s17   ;;  %s1020_s16 = sphi %s1053_s16, %s1200_s16   ;;  %s1016_s15 = sphi %s1051_s15, %s1199_s15  }
   0x3   : > { %p42_p1 = scmp.ge.s32.totalorder %s40_s18, 2  ;;  %p261_p2 = scmp.lt.s32.totalorder %s1024_s17, 3 }
   0x5   : > { %s1202_s18 = smov (%p42_p1, %s40_s18), 0  ;;  %p262_p3 = pnand %p881_p0, %p261_p2 }
   0x6   : > { %v951_v0 = vld [vmem:[%s1195_s1 + $0x4] ss:$8 sps:$4 sm:$0xff] (!%p262_p3)   ;;  %v953_v1 = vld [vmem:[%s1195_s1] ss:$8 sps:$4 sm:$0xff] (!%p262_p3)   ;;  %v954_v2 = vld [vmem:[%s1195_s1 + $0x14] ss:$8 sps:$4 sm:$0xff] (!%p262_p3)   ;;  %v674_v34 = vlaneseq (!%p262_p3) }
   0x7   : > { %265 = sbr.rel (%p262_p3) target bundleno = 291 (0x123), region = 36  ;;  %614 = vmatprep.subr.bf16.mxu0 (!%p262_p3), %v951_v0  ;;  %v956_v3 = vld [vmem:[%s1195_s1 + $0x10] ss:$8 sps:$4 sm:$0xff] (!%p262_p3)   ;;  %v957_v4 = vld [vmem:[%s1195_s1 + $0x24] ss:$8 sps:$4 sm:$0xff] (!%p262_p3)   ;;  %p335_p4 = scmp.lt.s32.totalorder (!%p262_p3), %s1016_s15, 1 }
   0x8   : > { %615 = vmatpush1.bf16.msra.mxu0 (!%p262_p3), %v953_v1  ;;  %v959_v5 = vld [vmem:[%s1195_s1 + $0x20] ss:$8 sps:$4 sm:$0xff] (!%p262_p3)   ;;  %v960_v6 = vld [vmem:[%s1195_s1 + $0x34] ss:$8 sps:$4 sm:$0xff] (!%p262_p3)   ;;  %v962_v7 = vld [vmem:[%s1195_s1 + $0x30] ss:$8 sps:$4 sm:$0xff] (!%p262_p3)  }
   0x9   : > { %616 = vmatprep.subr.bf16.mxu0 (!%p262_p3), %v954_v2  ;;  %v963_v8 = vld [vmem:[%s1195_s1 + $0x44] ss:$8 sps:$4 sm:$0xff] (!%p262_p3)   ;;  %v965_v9 = vld [vmem:[%s1195_s1 + $0x40] ss:$8 sps:$4 sm:$0xff] (!%p262_p3)   ;;  %v966_v10 = vld [vmem:[%s1195_s1 + $0x54] ss:$8 sps:$4 sm:$0xff] (!%p262_p3)  }
   0xa   : > { %v968_v11 = vld [vmem:[%s1195_s1 + $0x50] ss:$8 sps:$4 sm:$0xff] (!%p262_p3)   ;;  %v969_v12 = vld [vmem:[%s1195_s1 + $0x64] ss:$8 sps:$4 sm:$0xff] (!%p262_p3)   ;;  %v971_v14 = vld [vmem:[%s1195_s1 + $0x60] ss:$8 sps:$4 sm:$0xff] (!%p262_p3)  }
   0xb   : > { %v972_v15 = vld [vmem:[%s1195_s1 + $0x74] ss:$8 sps:$4 sm:$0xff] (!%p262_p3)   ;;  %v974_v16 = vld [vmem:[%s1195_s1 + $0x70] ss:$8 sps:$4 sm:$0xff] (!%p262_p3)   ;;  %v975_v17 = vld [vmem:[%s1195_s1 + $0x84] ss:$8 sps:$4 sm:$0xff] (!%p262_p3)  }
   0xc   : > { %617 = vmatpush1.bf16.msra.mxu0 (!%p262_p3), %v956_v3  ;;  %v977_v18 = vld [vmem:[%s1195_s1 + $0x80] ss:$8 sps:$4 sm:$0xff] (!%p262_p3)   ;;  %v978_v19 = vld [vmem:[%s1195_s1 + $0x94] ss:$8 sps:$4 sm:$0xff] (!%p262_p3)   ;;  %v980_v20 = vld [vmem:[%s1195_s1 + $0x90] ss:$8 sps:$4 sm:$0xff] (!%p262_p3)  }
   0xd   : > { %618 = vmatprep.subr.bf16.mxu0 (!%p262_p3), %v957_v4  ;;  %v981_v21 = vld [vmem:[%s1195_s1 + $0xa4] ss:$8 sps:$4 sm:$0xff] (!%p262_p3)   ;;  %v983_v22 = vld [vmem:[%s1195_s1 + $0xa0] ss:$8 sps:$4 sm:$0xff] (!%p262_p3)   ;;  %v984_v23 = vld [vmem:[%s1195_s1 + $0xb4] ss:$8 sps:$4 sm:$0xff] (!%p262_p3)  }
   0xe   : > { %s1204_s15 = smov (!%p335_p4, %s1016_s15), 1  ;;  %v986_v24 = vld [vmem:[%s1195_s1 + $0xb0] ss:$8 sps:$4 sm:$0xff]   ;;  %v987_v25 = vld [vmem:[%s1195_s1 + $0xc4] ss:$8 sps:$4 sm:$0xff]   ;;  %v675_v35 = vshrl.u32 %v674_v34, 7 }
   0xf   : > { %s924_s19 = sshll.u32 %s1204_s15, 4  ;;  %v989_v26 = vld [vmem:[%s1195_s1 + $0xc0] ss:$8 sps:$4 sm:$0xff]   ;;  %v990_v27 = vld [vmem:[%s1195_s1 + $0xd4] ss:$8 sps:$4 sm:$0xff]   ;;  %s925_s22 = sshll.u32 %s1204_s15, 5 }
  0x10   : > { %619 = vmatpush1.bf16.msra.mxu0 %v959_v5  ;;  %s1111_s24 = scalar_lea.vmem %s1194_s0, %s924_s19  ;;  %v992_v28 = vld [vmem:[%s1195_s1 + $0xd0] ss:$8 sps:$4 sm:$0xff]   ;;  %v993_v29 = vld [vmem:[%s1195_s1 + $0xe4] ss:$8 sps:$4 sm:$0xff]   ;;  %v995_v30 = vld [vmem:[%s1195_s1 + $0xe0] ss:$8 sps:$4 sm:$0xff]   ;;  %s379_s28 = scalar_lea.vmem %s1197_s3, %s925_s22 }
  0x11   : > { %620 = vmatprep.subr.bf16.mxu0 %v960_v6  ;;  %v1001_v13 = vld [vmem:[%s1111_s24 + $0x4] ss:$8 sps:$4 sm:$0xff]   ;;  %v996_v31 = vld [vmem:[%s1195_s1 + $0xf4] ss:$8 sps:$4 sm:$0xff]   ;;  %v998_v32 = vld [vmem:[%s1195_s1 + $0xf0] ss:$8 sps:$4 sm:$0xff]   ;;  %s395_s15 = scalar_lea.vmem %s1198_s4, %s925_s22 }
  0x12   : > { %646 = vmatprep.mubr.bf16.mxu0 %v1001_v13  ;;  %v999_v33 = vld [vmem:[%s1111_s24] ss:$8 sps:$4 sm:$0xff]   ;;  %v676_v36 = vsub.s32 0, %v675_v35  ;;  %v680_v38 = vsub.s32 1, %v675_v35  ;;  %v690_v48 = vld [vmem:[%s379_s28 + $0x10] sm:$0xff]  ;;  %v691_v52 = vld [vmem:[%s379_s28 + $0x18] sm:$0xff] }
  0x13   : > { %v672_v37 = vld [vmem:[%s1196_s2] sm:$0x3]  ;;  %v689_v45 = vld [vmem:[%s379_s28 + $0x8] sm:$0xff] }
  0x14   : > { %621 = vmatpush1.bf16.msra.mxu0 %v962_v7  ;;  %v677_v39 = vrot.slane %v672_v37, %v676_v36  ;;  %v681_v40 = vrot.slane %v672_v37, %v680_v38  ;;  %v688_v42 = vld [vmem:[%s379_s28] sm:$0xff] }
  0x15   : > { %622 = vmatprep.subr.bf16.mxu0 %v963_v8 }
  0x18   : > { %623 = vmatpush1.bf16.msra.mxu0 %v965_v9 }
  0x19   : > { %624 = vmatprep.subr.bf16.mxu0 %v966_v10 }
  0x1c   : > { %625 = vmatpush1.bf16.msra.mxu0 %v968_v11 }
  0x1d   : > { %626 = vmatprep.subr.bf16.mxu0 %v969_v12 }
  0x20   : > { %627 = vmatpush1.bf16.msra.mxu0 %v971_v14 }
  0x21   : > { %628 = vmatprep.subr.bf16.mxu0 %v972_v15 }
  0x24   : > { %629 = vmatpush1.bf16.msra.mxu0 %v974_v16 }
  0x25   : > { %630 = vmatprep.subr.bf16.mxu0 %v975_v17 }
  0x28   : > { %631 = vmatpush1.bf16.msra.mxu0 %v977_v18 }
  0x29   : > { %632 = vmatprep.subr.bf16.mxu0 %v978_v19 }
  0x2c   : > { %633 = vmatpush1.bf16.msra.mxu0 %v980_v20 }
  0x2d   : > { %634 = vmatprep.subr.bf16.mxu0 %v981_v21 }
  0x30   : > { %635 = vmatpush1.bf16.msra.mxu0 %v983_v22 }
  0x31   : > { %636 = vmatprep.subr.bf16.mxu0 %v984_v23 }
  0x34   : > { %637 = vmatpush1.bf16.msra.mxu0 %v986_v24 }
  0x35   : > { %638 = vmatprep.subr.bf16.mxu0 %v987_v25 }
  0x38   : > { %639 = vmatpush1.bf16.msra.mxu0 %v989_v26 }
  0x39   : > { %640 = vmatprep.subr.bf16.mxu0 %v990_v27 }
  0x3c   : > { %641 = vmatpush1.bf16.msra.mxu0 %v992_v28 }
  0x3d   : > { %642 = vmatprep.subr.bf16.mxu0 %v993_v29 }
  0x40   : > { %643 = vmatpush1.bf16.msra.mxu0 %v995_v30 }
  0x41   : > { %644 = vmatprep.subr.bf16.mxu0 %v996_v31 }
  0x44   : > { %645 = vmatpush1.bf16.msra.mxu0 %v998_v32 }
  0x47   : > { %647 = vmatmul.mubr.bf16.vlgmr.msra.gmra.mrb[0].mxu0 %v999_v33 }
 0x11a   : > { %v648_v41 = vpop.f32.mrb[0].mxu0 }
 0x11b   : > { %v684_v43 = vadd.f32 %v677_v39, %v648_v41  ;;  %v650_v44 = vpop.f32.mrb[1].mxu0 }
 0x11c   : > { %v685_v46 = vadd.f32 %v681_v40, %v650_v44  ;;  %v652_v47 = vpop.f32.mrb[2].mxu0 }
 0x11d   : > { %v692_v49 = vadd.f32 %v688_v42, %v684_v43  ;;  %v686_v50 = vadd.f32 %v677_v39, %v652_v47  ;;  %v654_v51 = vpop.f32.mrb[3].mxu0 }
 0x11e   : > { %v693_v53 = vadd.f32 %v689_v45, %v685_v46  ;;  %v687_v54 = vadd.f32 %v681_v40, %v654_v51 }
 0x11f   : > { %696 = vst [vmem:[%s395_s15] sm:$0xff] %v692_v49  ;;  %v694_v55 = vadd.f32 %v690_v48, %v686_v50 }
 0x120   : > { %697 = vst [vmem:[%s395_s15 + $0x8] sm:$0xff] %v693_v53  ;;  %v695_v56 = vadd.f32 %v691_v52, %v687_v54 }
 0x121   : > { %698 = vst [vmem:[%s395_s15 + $0x10] sm:$0xff] %v694_v55 }
 0x122   : > { %699 = vst [vmem:[%s395_s15 + $0x18] sm:$0xff] %v695_v56 }
 0x123 PF: > { %s14_s17 = sadd.s32 1, %s1024_s17   ;;  %s1199_s15 = smov %s1020_s16 }
 0x124   : > { %p11_p5 = scmp.ge.s32.totalorder %s14_s17, 4   ;;  %s1200_s16 = smov %s1202_s18 }
 0x126   :  { %13 = sbr.rel (!%p11_p5) target bundleno = 2 (0x2), region = 83 }

// kernel: pixart_controlnet_adapter_block.15
= control target key start
LH: loop header
LB: loop body
LE: loop exit
PB: predicated region body
PF: predicated region fallthrough
CT: control target
= control target key end

     0   :  { %s1244_s12 = smov 0   ;;  %s1246_s13 = smov 0   ;;  %s1487_s0 = inlined_call_operand.vmem [shape: f32[2,8,256], index: 0, kind: input, shape index: {}]   ;;  %s1488_s1 = inlined_call_operand.vmem [shape: bf16[256,512], index: 1, kind: input, shape index: {}]   ;;  %s1489_s2 = inlined_call_operand.vmem [shape: f32[1,512], index: 2, kind: input, shape index: {}]   ;;  %s1490_s3 = inlined_call_operand.vmem [shape: bf16[2,8,512], index: 3, kind: output, shape index: {}]  }
   0x1   :  { %s1248_s14 = smov 0  }
   0x2 LB: > { %s39_s15 = sadd.s32 1, %s1218_s13  ;;  %p1003_p0 = scmp.ge.s32.totalorder %s1222_s14, 1  ;;  %s1222_s14 = sphi %s1248_s14, %s13_s14   ;;  %s1218_s13 = sphi %s1246_s13, %s1492_s13   ;;  %s1214_s12 = sphi %s1244_s12, %s1491_s12  }
   0x3   : > { %p41_p1 = scmp.ge.s32.totalorder %s39_s15, 2  ;;  %p209_p2 = scmp.lt.s32.totalorder %s1222_s14, 3 }
   0x5   : > { %s1494_s15 = smov (%p41_p1, %s39_s15), 0  ;;  %p210_p3 = pnand %p1003_p0, %p209_p2 }
   0x6   : > { %v1104_v0 = vld [vmem:[%s1488_s1 + $0x4] ss:$16 sps:$4 sm:$0xff] (!%p210_p3)   ;;  %v1106_v1 = vld [vmem:[%s1488_s1 + $0xc] ss:$16 sps:$4 sm:$0xff] (!%p210_p3)   ;;  %v1108_v2 = vld [vmem:[%s1488_s1] ss:$16 sps:$4 sm:$0xff] (!%p210_p3)  }
   0x7   : > { %213 = sbr.rel (%p210_p3) target bundleno = 289 (0x121), region = 32  ;;  %708 = vmatprep.subr.bf16.mxu0 (!%p210_p3), %v1104_v0  ;;  %v1109_v3 = vld [vmem:[%s1488_s1 + $0x8] ss:$16 sps:$4 sm:$0xff] (!%p210_p3)   ;;  %749 = vmatprep.subr.bf16.mxu1 (!%p210_p3), %v1106_v1  ;;  %v1110_v4 = vld [vmem:[%s1488_s1 + $0x24] ss:$16 sps:$4 sm:$0xff] (!%p210_p3)   ;;  %p264_p4 = scmp.lt.s32.totalorder (!%p210_p3), %s1214_s12, 1 }
   0x8   : > { %709 = vmatpush1.bf16.msra.mxu0 (!%p210_p3), %v1108_v2  ;;  %750 = vmatpush1.bf16.msra.mxu1 (!%p210_p3), %v1109_v3  ;;  %v1112_v5 = vld [vmem:[%s1488_s1 + $0x2c] ss:$16 sps:$4 sm:$0xff] (!%p210_p3)   ;;  %v1114_v6 = vld [vmem:[%s1488_s1 + $0x20] ss:$16 sps:$4 sm:$0xff] (!%p210_p3)   ;;  %v1115_v7 = vld [vmem:[%s1488_s1 + $0x28] ss:$16 sps:$4 sm:$0xff] (!%p210_p3)  }
   0x9   : > { %710 = vmatprep.subr.bf16.mxu0 (!%p210_p3), %v1110_v4  ;;  %751 = vmatprep.subr.bf16.mxu1 (!%p210_p3), %v1112_v5  ;;  %v1116_v8 = vld [vmem:[%s1488_s1 + $0x44] ss:$16 sps:$4 sm:$0xff] (!%p210_p3)   ;;  %v1118_v9 = vld [vmem:[%s1488_s1 + $0x4c] ss:$16 sps:$4 sm:$0xff] (!%p210_p3)   ;;  %v1120_v10 = vld [vmem:[%s1488_s1 + $0x40] ss:$16 sps:$4 sm:$0xff] (!%p210_p3)   ;;  %v807_v4 = vlaneseq (!%p210_p3) }
   0xa   : > { %v1121_v11 = vld [vmem:[%s1488_s1 + $0x48] ss:$16 sps:$4 sm:$0xff] (!%p210_p3)   ;;  %v1122_v12 = vld [vmem:[%s1488_s1 + $0x64] ss:$16 sps:$4 sm:$0xff] (!%p210_p3)   ;;  %v1124_v13 = vld [vmem:[%s1488_s1 + $0x6c] ss:$16 sps:$4 sm:$0xff] (!%p210_p3)  }
   0xb   : > { %v1126_v14 = vld [vmem:[%s1488_s1 + $0x60] ss:$16 sps:$4 sm:$0xff] (!%p210_p3)   ;;  %v1127_v15 = vld [vmem:[%s1488_s1 + $0x68] ss:$16 sps:$4 sm:$0xff] (!%p210_p3)   ;;  %v1128_v16 = vld [vmem:[%s1488_s1 + $0x84] ss:$16 sps:$4 sm:$0xff] (!%p210_p3)  }
   0xc   : > { %711 = vmatpush1.bf16.msra.mxu0 (!%p210_p3), %v1114_v6  ;;  %752 = vmatpush1.bf16.msra.mxu1 (!%p210_p3), %v1115_v7  ;;  %v1130_v17 = vld [vmem:[%s1488_s1 + $0x8c] ss:$16 sps:$4 sm:$0xff] (!%p210_p3)   ;;  %v1132_v18 = vld [vmem:[%s1488_s1 + $0x80] ss:$16 sps:$4 sm:$0xff] (!%p210_p3)   ;;  %v1133_v19 = vld [vmem:[%s1488_s1 + $0x88] ss:$16 sps:$4 sm:$0xff] (!%p210_p3)  }
   0xd   : > { %712 = vmatprep.subr.bf16.mxu0 (!%p210_p3), %v1116_v8  ;;  %753 = vmatprep.subr.bf16.mxu1 (!%p210_p3), %v1118_v9  ;;  %v1134_v20 = vld [vmem:[%s1488_s1 + $0xa4] ss:$16 sps:$4 sm:$0xff] (!%p210_p3)   ;;  %v1136_v21 = vld [vmem:[%s1488_s1 + $0xac] ss:$16 sps:$4 sm:$0xff] (!%p210_p3)   ;;  %v1138_v22 = vld [vmem:[%s1488_s1 + $0xa0] ss:$16 sps:$4 sm:$0xff] (!%p210_p3)  }
   0xe   : > { %v1139_v23 = vld [vmem:[%s1488_s1 + $0xa8] ss:$16 sps:$4 sm:$0xff]   ;;  %v1140_v24 = vld [vmem:[%s1488_s1 + $0xc4] ss:$16 sps:$4 sm:$0xff]   ;;  %v1142_v25 = vld [vmem:[%s1488_s1 + $0xcc] ss:$16 sps:$4 sm:$0xff]  }
   0xf   : > { %v1144_v26 = vld [vmem:[%s1488_s1 + $0xc0] ss:$16 sps:$4 sm:$0xff]   ;;  %v1145_v27 = vld [vmem:[%s1488_s1 + $0xc8] ss:$16 sps:$4 sm:$0xff]   ;;  %v1146_v28 = vld [vmem:[%s1488_s1 + $0xe4] ss:$16 sps:$4 sm:$0xff]  }
  0x10   : > { %713 = vmatpush1.bf16.msra.mxu0 %v1120_v10  ;;  %754 = vmatpush1.bf16.msra.mxu1 %v1121_v11  ;;  %v1148_v29 = vld [vmem:[%s1488_s1 + $0xec] ss:$16 sps:$4 sm:$0xff]   ;;  %v1150_v30 = vld [vmem:[%s1488_s1 + $0xe0] ss:$16 sps:$4 sm:$0xff]   ;;  %v1151_v31 = vld [vmem:[%s1488_s1 + $0xe8] ss:$16 sps:$4 sm:$0xff]  }
  0x11   : > { %714 = vmatprep.subr.bf16.mxu0 %v1122_v12  ;;  %755 = vmatprep.subr.bf16.mxu1 %v1124_v13  ;;  %v1152_v32 = vld [vmem:[%s1488_s1 + $0x104] ss:$16 sps:$4 sm:$0xff]   ;;  %v1154_v33 = vld [vmem:[%s1488_s1 + $0x10c] ss:$16 sps:$4 sm:$0xff]   ;;  %v1156_v34 = vld [vmem:[%s1488_s1 + $0x100] ss:$16 sps:$4 sm:$0xff]  }
  0x12   : > { %v1157_v35 = vld [vmem:[%s1488_s1 + $0x108] ss:$16 sps:$4 sm:$0xff]   ;;  %v1158_v36 = vld [vmem:[%s1488_s1 + $0x124] ss:$16 sps:$4 sm:$0xff]   ;;  %v1160_v37 = vld [vmem:[%s1488_s1 + $0x12c] ss:$16 sps:$4 sm:$0xff]  }
  0x13   : > { %s1496_s12 = smov (!%p264_p4, %s1214_s12), 1  ;;  %v1162_v38 = vld [vmem:[%s1488_s1 + $0x120] ss:$16 sps:$4 sm:$0xff]   ;;  %v1163_v39 = vld [vmem:[%s1488_s1 + $0x128] ss:$16 sps:$4 sm:$0xff]   ;;  %v808_v5 = vshrl.u32 %v807_v4, 7 }
  0x14   : > { %715 = vmatpush1.bf16.msra.mxu0 %v1126_v14  ;;  %756 = vmatpush1.bf16.msra.mxu1 %v1127_v15  ;;  %v1164_v40 = vld [vmem:[%s1488_s1 + $0x144] ss:$16 sps:$4 sm:$0xff]   ;;  %v1166_v41 = vld [vmem:[%s1488_s1 + $0x14c] ss:$16 sps:$4 sm:$0xff]   ;;  %s1076_s4 = sshll.u32 %s1496_s12, 4 }
  0x15   : > { %716 = vmatprep.subr.bf16.mxu0 %v1128_v16  ;;  %757 = vmatprep.subr.bf16.mxu1 %v1130_v17  ;;  %v1168_v42 = vld [vmem:[%s1488_s1 + $0x140] ss:$16 sps:$4 sm:$0xff]   ;;  %v1169_v43 = vld [vmem:[%s1488_s1 + $0x148] ss:$16 sps:$4 sm:$0xff]   ;;  %v1170_v44 = vld [vmem:[%s1488_s1 + $0x164] ss:$16 sps:$4 sm:$0xff]   ;;  %s1409_s17 = scalar_lea.vmem %s1487_s0, %s1076_s4  ;;  %s306_s16 = scalar_lea.vmem %s1490_s3, %s1076_s4 }
  0x16   : > { %v1172_v45 = vld [vmem:[%s1488_s1 + $0x16c] ss:$16 sps:$4 sm:$0xff]   ;;  %v1174_v47 = vld [vmem:[%s1488_s1 + $0x160] ss:$16 sps:$4 sm:$0xff]   ;;  %v1175_v48 = vld [vmem:[%s1488_s1 + $0x168] ss:$16 sps:$4 sm:$0xff]  }
  0x17   : > { %v317_v46 = vld [vmem:[%s1409_s17 + $0x8] sm:$0xff]  ;;  %v1176_v50 = vld [vmem:[%s1488_s1 + $0x184] ss:$16 sps:$4 sm:$0xff]   ;;  %v1180_v52 = vld [vmem:[%s1488_s1 + $0x180] ss:$16 sps:$4 sm:$0xff]   ;;  %v809_v6 = vsub.s32 0, %v808_v5 }
  0x18   : > { %717 = vmatpush1.bf16.msra.mxu0 %v1132_v18  ;;  %758 = vmatpush1.bf16.msra.mxu1 %v1133_v19  ;;  %v319_v49 = vpack.c.bf16 %v317_v46, %v317_v46  ;;  %v1178_v51 = vld [vmem:[%s1488_s1 + $0x18c] ss:$16 sps:$4 sm:$0xff]   ;;  %v1181_v53 = vld [vmem:[%s1488_s1 + $0x188] ss:$16 sps:$4 sm:$0xff]   ;;  %v1182_v54 = vld [vmem:[%s1488_s1 + $0x1a4] ss:$16 sps:$4 sm:$0xff]  }
  0x19   : > { %718 = vmatprep.subr.bf16.mxu0 %v1134_v20  ;;  %759 = vmatprep.subr.bf16.mxu1 %v1136_v21  ;;  %v1184_v55 = vld [vmem:[%s1488_s1 + $0x1ac] ss:$16 sps:$4 sm:$0xff]   ;;  %v1186_v56 = vld [vmem:[%s1488_s1 + $0x1a0] ss:$16 sps:$4 sm:$0xff]   ;;  %v1187_v57 = vld [vmem:[%s1488_s1 + $0x1a8] ss:$16 sps:$4 sm:$0xff]  }
  0x1a   : > { %740 = vmatprep.mubr.bf16.mxu0 %v319_v49  ;;  %781 = vmatprep.mubr.bf16.mxu1 %v319_v49  ;;  %v1188_v58 = vld [vmem:[%s1488_s1 + $0x1c4] ss:$16 sps:$4 sm:$0xff]   ;;  %v1190_v59 = vld [vmem:[%s1488_s1 + $0x1cc] ss:$16 sps:$4 sm:$0xff]   ;;  %v1192_v60 = vld [vmem:[%s1488_s1 + $0x1c0] ss:$16 sps:$4 sm:$0xff]  }
  0x1b   : > { %v1193_v61 = vld [vmem:[%s1488_s1 + $0x1c8] ss:$16 sps:$4 sm:$0xff]   ;;  %v1194_v62 = vld [vmem:[%s1488_s1 + $0x1e4] ss:$16 sps:$4 sm:$0xff]   ;;  %v1196_v63 = vld [vmem:[%s1488_s1 + $0x1ec] ss:$16 sps:$4 sm:$0xff]  }
  0x1c   : > { %719 = vmatpush1.bf16.msra.mxu0 %v1138_v22  ;;  %760 = vmatpush1.bf16.msra.mxu1 %v1139_v23  ;;  %v1198_v0 = vld [vmem:[%s1488_s1 + $0x1e0] ss:$16 sps:$4 sm:$0xff]   ;;  %v1199_v1 = vld [vmem:[%s1488_s1 + $0x1e8] ss:$16 sps:$4 sm:$0xff]   ;;  %v817_v7 = vsub.s32 2, %v808_v5  ;;  %v813_v9 = vsub.s32 1, %v808_v5 }
  0x1d   : > { %720 = vmatprep.subr.bf16.mxu0 %v1140_v24  ;;  %761 = vmatprep.subr.bf16.mxu1 %v1142_v25  ;;  %v316_v2 = vld [vmem:[%s1409_s17] sm:$0xff]  ;;  %v821_v10 = vsub.s32 3, %v808_v5 }
  0x1e   : > { %v318_v3 = vpack.c.bf16 %v316_v2, %v316_v2  ;;  %v805_v8 = vld [vmem:[%s1489_s2] sm:$0xf] }
  0x1f   : > { %v810_v11 = vrot.slane %v805_v8, %v809_v6  ;;  %v818_v12 = vrot.slane %v805_v8, %v817_v7  ;;  %v814_v13 = vrot.slane %v805_v8, %v813_v9  ;;  %v822_v14 = vrot.slane %v805_v8, %v821_v10 }
  0x20   : > { %721 = vmatpush1.bf16.msra.mxu0 %v1144_v26  ;;  %762 = vmatpush1.bf16.msra.mxu1 %v1145_v27 }
  0x21   : > { %722 = vmatprep.subr.bf16.mxu0 %v1146_v28  ;;  %763 = vmatprep.subr.bf16.mxu1 %v1148_v29 }
  0x24   : > { %723 = vmatpush1.bf16.msra.mxu0 %v1150_v30  ;;  %764 = vmatpush1.bf16.msra.mxu1 %v1151_v31 }
  0x25   : > { %724 = vmatprep.subr.bf16.mxu0 %v1152_v32  ;;  %765 = vmatprep.subr.bf16.mxu1 %v1154_v33 }
  0x28   : > { %725 = vmatpush1.bf16.msra.mxu0 %v1156_v34  ;;  %766 = vmatpush1.bf16.msra.mxu1 %v1157_v35 }
  0x29   : > { %726 = vmatprep.subr.bf16.mxu0 %v1158_v36  ;;  %767 = vmatprep.subr.bf16.mxu1 %v1160_v37 }
  0x2c   : > { %727 = vmatpush1.bf16.msra.mxu0 %v1162_v38  ;;  %768 = vmatpush1.bf16.msra.mxu1 %v1163_v39 }
  0x2d   : > { %728 = vmatprep.subr.bf16.mxu0 %v1164_v40  ;;  %769 = vmatprep.subr.bf16.mxu1 %v1166_v41 }
  0x30   : > { %729 = vmatpush1.bf16.msra.mxu0 %v1168_v42  ;;  %770 = vmatpush1.bf16.msra.mxu1 %v1169_v43 }
  0x31   : > { %730 = vmatprep.subr.bf16.mxu0 %v1170_v44  ;;  %771 = vmatprep.subr.bf16.mxu1 %v1172_v45 }
  0x34   : > { %731 = vmatpush1.bf16.msra.mxu0 %v1174_v47  ;;  %772 = vmatpush1.bf16.msra.mxu1 %v1175_v48 }
  0x35   : > { %732 = vmatprep.subr.bf16.mxu0 %v1176_v50  ;;  %773 = vmatprep.subr.bf16.mxu1 %v1178_v51 }
  0x38   : > { %733 = vmatpush1.bf16.msra.mxu0 %v1180_v52  ;;  %774 = vmatpush1.bf16.msra.mxu1 %v1181_v53 }
  0x39   : > { %734 = vmatprep.subr.bf16.mxu0 %v1182_v54  ;;  %775 = vmatprep.subr.bf16.mxu1 %v1184_v55 }
  0x3c   : > { %735 = vmatpush1.bf16.msra.mxu0 %v1186_v56  ;;  %776 = vmatpush1.bf16.msra.mxu1 %v1187_v57 }
  0x3d   : > { %736 = vmatprep.subr.bf16.mxu0 %v1188_v58  ;;  %777 = vmatprep.subr.bf16.mxu1 %v1190_v59 }
  0x40   : > { %737 = vmatpush1.bf16.msra.mxu0 %v1192_v60  ;;  %778 = vmatpush1.bf16.msra.mxu1 %v1193_v61 }
  0x41   : > { %738 = vmatprep.subr.bf16.mxu0 %v1194_v62  ;;  %779 = vmatprep.subr.bf16.mxu1 %v1196_v63 }
  0x44   : > { %739 = vmatpush1.bf16.msra.mxu0 %v1198_v0  ;;  %780 = vmatpush1.bf16.msra.mxu1 %v1199_v1 }
  0x47   : > { %741 = vmatmul.mubr.bf16.vlgmr.msra.gmra.mrb[0].mxu0 %v318_v3  ;;  %782 = vmatmul.mubr.bf16.vlgmr.msra.gmra.mrb[0].mxu1 %v318_v3 }
 0x11a   : > { %v742_v15 = vpop.f32.mrb[0].mxu0  ;;  %v783_v16 = vpop.f32.mrb[0].mxu1 }
 0x11b   : > { %v827_v17 = vadd.f32 %v810_v11, %v742_v15  ;;  %v829_v18 = vadd.f32 %v818_v12, %v783_v16  ;;  %v744_v19 = vpop.f32.mrb[1].mxu0  ;;  %v785_v20 = vpop.f32.mrb[1].mxu1 }
 0x11c   : > { %v828_v21 = vadd.f32 %v814_v13, %v744_v19  ;;  %v830_v22 = vadd.f32 %v822_v14, %v785_v20  ;;  %v746_v23 = vpop.f32.mrb[2].mxu0  ;;  %v787_v24 = vpop.f32.mrb[2].mxu1 }
 0x11d   : > { %v747_v25 = vpop.f32.mrb[3].mxu0  ;;  %v788_v26 = vpop.f32.mrb[3].mxu1 }
 0x11e   : > { %v1078_v27 = vpack.c.bf16 %v828_v21, %v827_v17  ;;  %v1079_v28 = vpack.c.bf16 %v830_v22, %v829_v18 }
 0x120   : > { %847 = vst [vmem:[%s306_s16] sm:$0xff] %v1078_v27  ;;  %848 = vst [vmem:[%s306_s16 + $0x8] sm:$0xff] %v1079_v28 }
 0x121 PF: > { %s13_s14 = sadd.s32 1, %s1222_s14   ;;  %s1491_s12 = smov %s1218_s13 }
 0x122   : > { %p10_p5 = scmp.ge.s32.totalorder %s13_s14, 4   ;;  %s1492_s13 = smov %s1494_s15 }
 0x124   :  { %12 = sbr.rel (!%p10_p5) target bundleno = 2 (0x2), region = 76 }

// kernel: pixart_controlnet_adapter_block.18
= control target key start
LH: loop header
LB: loop body
LE: loop exit
PB: predicated region body
PF: predicated region fallthrough
CT: control target
= control target key end

     0   :  { %s2125_s0 = inlined_call_operand.vmem [shape: f32[2,16,256], index: 0, kind: input, shape index: {}]   ;;  %s2126_s1 = inlined_call_operand.vmem [shape: f32[2,1,256], index: 1, kind: input, shape index: {}]   ;;  %s2127_s2 = inlined_call_operand.vmem [shape: f32[2,1,256], index: 2, kind: input, shape index: {}]   ;;  %s2128_s3 = inlined_call_operand.vmem [shape: bf16[256,1024], index: 3, kind: input, shape index: {}]   ;;  %s2129_s4 = inlined_call_operand.vmem [shape: f32[1,1024], index: 4, kind: input, shape index: {}]   ;;  %s2130_s5 = inlined_call_operand.vmem [shape: bf16[2,16,1024], index: 5, kind: output, shape index: {}]  }
   0x1   :  { %2136 = sst [smem:[#allocation11_spill]] %s2128_s3 }
   0x2   :  { %s1709_s18 = smov 0   ;;  %s1711_s19 = smov 0  }
   0x3   :  { %s1713_s20 = smov 0   ;;  %s1715_s21 = smov 0  }
   0x4   :  { %s1717_s22 = smov 0   ;;  %s1719_s23 = smov 0  }
   0x5   :  { %s1721_s24 = smov 0   ;;  %s1723_s25 = smov 0  }
   0x6   :  { %s1725_s26 = smov 0  }
   0x7 LB: > { %2137 = sst [smem:[#allocation5_spill]] %s1657_s21  ;;  %s1323_s27 = sadd.s32 4294967295, %s1677_s26   ;;  %s1677_s26 = sphi %s1725_s26, %s15_s26   ;;  %s1673_s25 = sphi %s1723_s25, %s2150_s25   ;;  %s1669_s24 = sphi %s1721_s24, %s2149_s24   ;;  %s1665_s23 = sphi %s1719_s23, %s2148_s23   ;;  %s1661_s22 = sphi %s1717_s22, %s2147_s22   ;;  %s1657_s21 = sphi %s1715_s21, %s2146_s21   ;;  %s1653_s20 = sphi %s1713_s20, %s2145_s20   ;;  %s1649_s19 = sphi %s1711_s19, %s2152_s19   ;;  %s1645_s18 = sphi %s1709_s18, %s2151_s18  }
   0x8   : > { %2138 = sst [smem:[#allocation6_spill]] %s1669_s24  ;;  %s27_s28 = sadd.s32 1, %s1669_s24 }
   0x9   : > { %2139 = sst [smem:[#allocation7_spill]] %s1673_s25  ;;  %p28_p0 = scmp.ge.s32.totalorder %s27_s28, 2 }
   0xa   : > { %s34_s29 = sadd.s32 1, %s1673_s25  ;;  %s121_s30 = sadd.s32 1, %s1657_s21 }
   0xb   : > { %p128_p1 = scmp.ne.s32.totalorder %s1657_s21, %s1653_s20  ;;  %s2154_s28 = smov (%p28_p0, %s27_s28), 0 }
   0xc   : > { %2140 = sst [smem:[#allocation8_spill]] %s2154_s28  ;;  %s2156_s29 = smov (!%p28_p0, %s34_s29), %s1673_s25 }
   0xd   : > { %s118_s6 = ssub.s32 %s1669_s24, %s2154_s28  ;;  %p129_p2 = scmp.eq.s32.totalorder %s1677_s26, 0 }
   0xe   : > { %p36_p3 = scmp.ge.s32.totalorder %s2156_s29, 2  ;;  %p119_p4 = scmp.eq.s32.totalorder %s118_s6, 0 }
   0xf   : > { %p130_p5 = por %p129_p2, %p128_p1  ;;  %s177_s7 = sadd.s32 1, %s1649_s19 }
  0x10   : > { %s2158_s29 = smov (%p36_p3, %s2156_s29), 0  ;;  %p187_p6 = scmp.ne.s32.totalorder %s1649_s19, %s1645_s18 }
  0x11   : > { %2141 = sst [smem:[#allocation9_spill]] %s2158_s29  ;;  %s170_s9 = ssub.s32 %s1673_s25, %s2158_s29 }
  0x12   : > { %s1770_s8 = scalar_select %p119_p4, %s1657_s21, %s121_s30  }
  0x13   : > { %s174_s10 = sor.u32 %s170_s9, %s118_s6  ;;  %p188_p7 = scmp.eq.s32.totalorder %s1323_s27, 3 }
  0x14   : > { %2142 = sst [smem:[#allocation10_spill]] %s1770_s8  ;;  %p175_p8 = scmp.eq.s32.totalorder %s174_s10, 0 }
  0x15   : > { %p1776_p9 = por %p188_p7, %p187_p6  ;;  %p1326_p10 = scmp.ge.s32.totalorder %s1677_s26, 4 }
  0x16   : > { %s1781_s12 = scalar_select %p175_p8, %s1649_s19, %s177_s7  }
  0x17   : > { %210 = sbr.rel (%p1326_p10) target bundleno = 72 (0x48), region = 16 }
  0x1e   : > { %241 = sbr.rel (!%p130_p5) target bundleno = 72 (0x48), region = 32  ;;  %s243_s13 = sand.u32 (%p130_p5), 1, %s1657_s21  }
  0x1f   : > { %s1413_s14 = sshll.u32 (%p130_p5), %s1669_s24, 4  ;;  %s1327_s15 = sshll.u32 (%p130_p5), %s243_s13, 9 }
  0x20   : > { %s2144_s3 = sld [smem:[#allocation11_spill]] (%p130_p5)  ;;  %s1794_s30 = scalar_lea.vmem (%p130_p5), [#allocation3], %s1327_s15 }
  0x26   : > { %s1789_s27 = scalar_lea.vmem %s2144_s3, %s1413_s14 }
  0x27   : > { %v261_v0 = vld [vmem:[%s1789_s27] sm:$0xff]  ;;  %v263_v1 = vld [vmem:[%s1789_s27 + $0x8] sm:$0xff] }
  0x28   : > { %v265_v2 = vld [vmem:[%s1789_s27 + $0x20] sm:$0xff]  ;;  %262 = vst [vmem:[%s1794_s30] sm:$0xff] %v261_v0  ;;  %264 = vst [vmem:[%s1794_s30 + $0x8] sm:$0xff] %v263_v1  ;;  %v267_v3 = vld [vmem:[%s1789_s27 + $0x28] sm:$0xff] }
  0x29   : > { %266 = vst [vmem:[%s1794_s30 + $0x10] sm:$0xff] %v265_v2  ;;  %v269_v4 = vld [vmem:[%s1789_s27 + $0x40] sm:$0xff]  ;;  %v271_v5 = vld [vmem:[%s1789_s27 + $0x48] sm:$0xff]  ;;  %268 = vst [vmem:[%s1794_s30 + $0x18] sm:$0xff] %v267_v3 }
  0x2a   : > { %270 = vst [vmem:[%s1794_s30 + $0x20] sm:$0xff] %v269_v4  ;;  %272 = vst [vmem:[%s1794_s30 + $0x28] sm:$0xff] %v271_v5  ;;  %v273_v6 = vld [vmem:[%s1789_s27 + $0x60] sm:$0xff]  ;;  %v275_v7 = vld [vmem:[%s1789_s27 + $0x68] sm:$0xff] }
  0x2b   : > { %v277_v8 = vld [vmem:[%s1789_s27 + $0x80] sm:$0xff]  ;;  %274 = vst [vmem:[%s1794_s30 + $0x30] sm:$0xff] %v273_v6  ;;  %276 = vst [vmem:[%s1794_s30 + $0x38] sm:$0xff] %v275_v7  ;;  %v279_v9 = vld [vmem:[%s1789_s27 + $0x88] sm:$0xff] }
  0x2c   : > { %278 = vst [vmem:[%s1794_s30 + $0x40] sm:$0xff] %v277_v8  ;;  %v281_v10 = vld [vmem:[%s1789_s27 + $0xa0] sm:$0xff]  ;;  %v283_v11 = vld [vmem:[%s1789_s27 + $0xa8] sm:$0xff]  ;;  %280 = vst [vmem:[%s1794_s30 + $0x48] sm:$0xff] %v279_v9 }
  0x2d   : > { %282 = vst [vmem:[%s1794_s30 + $0x50] sm:$0xff] %v281_v10  ;;  %284 = vst [vmem:[%s1794_s30 + $0x58] sm:$0xff] %v283_v11  ;;  %v285_v12 = vld [vmem:[%s1789_s27 + $0xc0] sm:$0xff]  ;;  %v287_v13 = vld [vmem:[%s1789_s27 + $0xc8] sm:$0xff] }
  0x2e   : > { %v289_v14 = vld [vmem:[%s1789_s27 + $0xe0] sm:$0xff]  ;;  %286 = vst [vmem:[%s1794_s30 + $0x60] sm:$0xff] %v285_v12  ;;  %288 = vst [vmem:[%s1794_s30 + $0x68] sm:$0xff] %v287_v13  ;;  %v291_v15 = vld [vmem:[%s1789_s27 + $0xe8] sm:$0xff] }
  0x2f   : > { %290 = vst [vmem:[%s1794_s30 + $0x70] sm:$0xff] %v289_v14  ;;  %v293_v16 = vld [vmem:[%s1789_s27 + $0x100] sm:$0xff]  ;;  %v295_v17 = vld [vmem:[%s1789_s27 + $0x108] sm:$0xff]  ;;  %292 = vst [vmem:[%s1794_s30 + $0x78] sm:$0xff] %v291_v15 }
  0x30   : > { %294 = vst [vmem:[%s1794_s30 + $0x80] sm:$0xff] %v293_v16  ;;  %296 = vst [vmem:[%s1794_s30 + $0x88] sm:$0xff] %v295_v17  ;;  %v297_v18 = vld [vmem:[%s1789_s27 + $0x120] sm:$0xff]  ;;  %v299_v19 = vld [vmem:[%s1789_s27 + $0x128] sm:$0xff] }
  0x31   : > { %v301_v20 = vld [vmem:[%s1789_s27 + $0x140] sm:$0xff]  ;;  %298 = vst [vmem:[%s1794_s30 + $0x90] sm:$0xff] %v297_v18  ;;  %300 = vst [vmem:[%s1794_s30 + $0x98] sm:$0xff] %v299_v19  ;;  %v303_v21 = vld [vmem:[%s1789_s27 + $0x148] sm:$0xff] }
  0x32   : > { %302 = vst [vmem:[%s1794_s30 + $0xa0] sm:$0xff] %v301_v20  ;;  %v305_v22 = vld [vmem:[%s1789_s27 + $0x160] sm:$0xff]  ;;  %v307_v23 = vld [vmem:[%s1789_s27 + $0x168] sm:$0xff]  ;;  %304 = vst [vmem:[%s1794_s30 + $0xa8] sm:$0xff] %v303_v21 }
  0x33   : > { %306 = vst [vmem:[%s1794_s30 + $0xb0] sm:$0xff] %v305_v22  ;;  %308 = vst [vmem:[%s1794_s30 + $0xb8] sm:$0xff] %v307_v23  ;;  %v309_v24 = vld [vmem:[%s1789_s27 + $0x180] sm:$0xff]  ;;  %v311_v25 = vld [vmem:[%s1789_s27 + $0x188] sm:$0xff] }
  0x34   : > { %v313_v26 = vld [vmem:[%s1789_s27 + $0x1a0] sm:$0xff]  ;;  %310 = vst [vmem:[%s1794_s30 + $0xc0] sm:$0xff] %v309_v24  ;;  %312 = vst [vmem:[%s1794_s30 + $0xc8] sm:$0xff] %v311_v25  ;;  %v315_v27 = vld [vmem:[%s1789_s27 + $0x1a8] sm:$0xff] }
  0x35   : > { %314 = vst [vmem:[%s1794_s30 + $0xd0] sm:$0xff] %v313_v26  ;;  %v317_v28 = vld [vmem:[%s1789_s27 + $0x1c0] sm:$0xff]  ;;  %v319_v29 = vld [vmem:[%s1789_s27 + $0x1c8] sm:$0xff]  ;;  %316 = vst [vmem:[%s1794_s30 + $0xd8] sm:$0xff] %v315_v27 }
  0x36   : > { %318 = vst [vmem:[%s1794_s30 + $0xe0] sm:$0xff] %v317_v28  ;;  %320 = vst [vmem:[%s1794_s30 + $0xe8] sm:$0xff] %v319_v29  ;;  %v321_v30 = vld [vmem:[%s1789_s27 + $0x1e0] sm:$0xff]  ;;  %v323_v31 = vld [vmem:[%s1789_s27 + $0x1e8] sm:$0xff] }
  0x37   : > { %v325_v32 = vld [vmem:[%s1789_s27 + $0x200] sm:$0xff]  ;;  %322 = vst [vmem:[%s1794_s30 + $0xf0] sm:$0xff] %v321_v30  ;;  %324 = vst [vmem:[%s1794_s30 + $0xf8] sm:$0xff] %v323_v31  ;;  %v327_v33 = vld [vmem:[%s1789_s27 + $0x208] sm:$0xff] }
  0x38   : > { %326 = vst [vmem:[%s1794_s30 + $0x100] sm:$0xff] %v325_v32  ;;  %v329_v34 = vld [vmem:[%s1789_s27 + $0x220] sm:$0xff]  ;;  %v331_v35 = vld [vmem:[%s1789_s27 + $0x228] sm:$0xff]  ;;  %328 = vst [vmem:[%s1794_s30 + $0x108] sm:$0xff] %v327_v33 }
  0x39   : > { %330 = vst [vmem:[%s1794_s30 + $0x110] sm:$0xff] %v329_v34  ;;  %332 = vst [vmem:[%s1794_s30 + $0x118] sm:$0xff] %v331_v35  ;;  %v333_v36 = vld [vmem:[%s1789_s27 + $0x240] sm:$0xff]  ;;  %v335_v37 = vld [vmem:[%s1789_s27 + $0x248] sm:$0xff] }
  0x3a   : > { %v337_v38 = vld [vmem:[%s1789_s27 + $0x260] sm:$0xff]  ;;  %334 = vst [vmem:[%s1794_s30 + $0x120] sm:$0xff] %v333_v36  ;;  %336 = vst [vmem:[%s1794_s30 + $0x128] sm:$0xff] %v335_v37  ;;  %v339_v39 = vld [vmem:[%s1789_s27 + $0x268] sm:$0xff] }
  0x3b   : > { %338 = vst [vmem:[%s1794_s30 + $0x130] sm:$0xff] %v337_v38  ;;  %v341_v40 = vld [vmem:[%s1789_s27 + $0x280] sm:$0xff]  ;;  %v343_v41 = vld [vmem:[%s1789_s27 + $0x288] sm:$0xff]  ;;  %340 = vst [vmem:[%s1794_s30 + $0x138] sm:$0xff] %v339_v39 }
  0x3c   : > { %342 = vst [vmem:[%s1794_s30 + $0x140] sm:$0xff] %v341_v40  ;;  %344 = vst [vmem:[%s1794_s30 + $0x148] sm:$0xff] %v343_v41  ;;  %v345_v42 = vld [vmem:[%s1789_s27 + $0x2a0] sm:$0xff]  ;;  %v347_v43 = vld [vmem:[%s1789_s27 + $0x2a8] sm:$0xff] }
  0x3d   : > { %v349_v44 = vld [vmem:[%s1789_s27 + $0x2c0] sm:$0xff]  ;;  %346 = vst [vmem:[%s1794_s30 + $0x150] sm:$0xff] %v345_v42  ;;  %348 = vst [vmem:[%s1794_s30 + $0x158] sm:$0xff] %v347_v43  ;;  %v351_v45 = vld [vmem:[%s1789_s27 + $0x2c8] sm:$0xff] }
  0x3e   : > { %350 = vst [vmem:[%s1794_s30 + $0x160] sm:$0xff] %v349_v44  ;;  %v353_v46 = vld [vmem:[%s1789_s27 + $0x2e0] sm:$0xff]  ;;  %v355_v47 = vld [vmem:[%s1789_s27 + $0x2e8] sm:$0xff]  ;;  %352 = vst [vmem:[%s1794_s30 + $0x168] sm:$0xff] %v351_v45 }
  0x3f   : > { %354 = vst [vmem:[%s1794_s30 + $0x170] sm:$0xff] %v353_v46  ;;  %356 = vst [vmem:[%s1794_s30 + $0x178] sm:$0xff] %v355_v47  ;;  %v357_v48 = vld [vmem:[%s1789_s27 + $0x300] sm:$0xff]  ;;  %v359_v49 = vld [vmem:[%s1789_s27 + $0x308] sm:$0xff] }
  0x40   : > { %v361_v50 = vld [vmem:[%s1789_s27 + $0x320] sm:$0xff]  ;;  %358 = vst [vmem:[%s1794_s30 + $0x180] sm:$0xff] %v357_v48  ;;  %360 = vst [vmem:[%s1794_s30 + $0x188] sm:$0xff] %v359_v49  ;;  %v363_v51 = vld [vmem:[%s1789_s27 + $0x328] sm:$0xff] }
  0x41   : > { %362 = vst [vmem:[%s1794_s30 + $0x190] sm:$0xff] %v361_v50  ;;  %v365_v52 = vld [vmem:[%s1789_s27 + $0x340] sm:$0xff]  ;;  %v367_v53 = vld [vmem:[%s1789_s27 + $0x348] sm:$0xff]  ;;  %364 = vst [vmem:[%s1794_s30 + $0x198] sm:$0xff] %v363_v51 }
  0x42   : > { %366 = vst [vmem:[%s1794_s30 + $0x1a0] sm:$0xff] %v365_v52  ;;  %368 = vst [vmem:[%s1794_s30 + $0x1a8] sm:$0xff] %v367_v53  ;;  %v369_v54 = vld [vmem:[%s1789_s27 + $0x360] sm:$0xff]  ;;  %v371_v55 = vld [vmem:[%s1789_s27 + $0x368] sm:$0xff] }
  0x43   : > { %v373_v56 = vld [vmem:[%s1789_s27 + $0x380] sm:$0xff]  ;;  %370 = vst [vmem:[%s1794_s30 + $0x1b0] sm:$0xff] %v369_v54  ;;  %372 = vst [vmem:[%s1794_s30 + $0x1b8] sm:$0xff] %v371_v55  ;;  %v375_v57 = vld [vmem:[%s1789_s27 + $0x388] sm:$0xff] }
  0x44   : > { %374 = vst [vmem:[%s1794_s30 + $0x1c0] sm:$0xff] %v373_v56  ;;  %v377_v58 = vld [vmem:[%s1789_s27 + $0x3a0] sm:$0xff]  ;;  %v379_v59 = vld [vmem:[%s1789_s27 + $0x3a8] sm:$0xff]  ;;  %376 = vst [vmem:[%s1794_s30 + $0x1c8] sm:$0xff] %v375_v57 }
  0x45   : > { %378 = vst [vmem:[%s1794_s30 + $0x1d0] sm:$0xff] %v377_v58  ;;  %380 = vst [vmem:[%s1794_s30 + $0x1d8] sm:$0xff] %v379_v59  ;;  %v381_v60 = vld [vmem:[%s1789_s27 + $0x3c0] sm:$0xff]  ;;  %v383_v61 = vld [vmem:[%s1789_s27 + $0x3c8] sm:$0xff] }
  0x46   : > { %v385_v62 = vld [vmem:[%s1789_s27 + $0x3e0] sm:$0xff]  ;;  %382 = vst [vmem:[%s1794_s30 + $0x1e0] sm:$0xff] %v381_v60  ;;  %384 = vst [vmem:[%s1794_s30 + $0x1e8] sm:$0xff] %v383_v61  ;;  %v387_v63 = vld [vmem:[%s1789_s27 + $0x3e8] sm:$0xff] }
  0x47   : > { %386 = vst [vmem:[%s1794_s30 + $0x1f0] sm:$0xff] %v385_v62  ;;  %388 = vst [vmem:[%s1794_s30 + $0x1f8] sm:$0xff] %v387_v63 }
  0x48 PF: > { %p1330_p11 = scmp.ge.s32.totalorder %s1677_s26, 1  ;;  %p401_p12 = scmp.lt.s32.totalorder %s1677_s26, 5 }
  0x4a   : > { %p402_p13 = pnand %p1330_p11, %p401_p12 }
  0x4b   : > { %s408_s6 = sand.u32 (!%p402_p13), 1, %s1653_s20   ;;  %s453_s7 = sand.u32 (!%p402_p13), 1, %s1645_s18  }
  0x4c   : > { %405 = sbr.rel (%p402_p13) target bundleno = 732 (0x2dc), region = 59  ;;  %s1331_s9 = sshll.u32 (!%p402_p13), %s408_s6, 9 }
  0x4d   : > { %s1332_s10 = sshll.u32 (!%p402_p13), %s453_s7, 5  ;;  %p457_p0 = scmp.lt.s32.totalorder (!%p402_p13), %s1665_s23, 1 }
  0x4e   : > { %s1927_s13 = sshll.u32 (!%p402_p13), %s1661_s22, 2  ;;  %s1951_s21 = scalar_lea.vmem (!%p402_p13), [#allocation3], %s1331_s9 }
  0x4f   : > { %p477_p1 = scmp.lt.s32.totalorder (!%p402_p13), %s1927_s13, 7  ;;  %p1338_p2 = scmp.ne.s32.totalorder (!%p402_p13), %s1661_s22, 0 }
  0x53   : > { %s458_s14 = scalar_select %p457_p0, %s1665_s23, 1 }
  0x54   : > { %s1932_s15 = scalar_select %p477_p1, %s1927_s13, 7 }
  0x55   : > { %s1414_s16 = sshll.u32 %s458_s14, 5  ;;  %s1335_s17 = sshll.u32 %s458_s14, 1  ;;  %v527_v23 = vlaneseq (!%p1338_p2) }
  0x56   : > { %s465_s3 = scalar_lea.vmem %s2125_s0, %s1414_s16  ;;  %s1940_s6 = scalar_lea.vmem %s2126_s1, %s1335_s17 }
  0x57   : > { %s1945_s28 = scalar_lea.vmem %s2127_s2, %s1335_s17  ;;  %s479_s8 = scalar_lea.vmem %s2129_s4, %s1932_s15  ;;  %v487_v0 = vld [vmem:[%s465_s3] sm:$0xff] (!%p1338_p2)  ;;  %v488_v1 = vld [vmem:[%s465_s3 + $0x8] sm:$0xff] (!%p1338_p2)  ;;  %v489_v2 = vld [vmem:[%s465_s3 + $0x10] sm:$0xff] (!%p1338_p2)  ;;  %v528_v27 = vshrl.u32 (!%p1338_p2), %v527_v23, 7 }
  0x58   : > { %s1953_s14 = scalar_lea.vmem [#allocation4], %s1332_s10  ;;  %486 = sbr.rel (%p1338_p2) target bundleno = 410 (0x19a), region = 67  ;;  %v491_v3 = vadd.f32 (!%p1338_p2), %v488_v1, %v487_v0  ;;  %v490_v4 = vld [vmem:[%s465_s3 + $0x18] sm:$0xff] (!%p1338_p2)  ;;  %v524_v28 = vld [vmem:[%s1940_s6] sm:$0x3] (!%p1338_p2) }
  0x59   : > { %v494_v5 = vadd.f32 (!%p1338_p2), %v490_v4, %v489_v2  ;;  %v525_v29 = vadd.f32 (!%p1338_p2), 1.0, %v524_v28  ;;  %v529_v30 = vsub.s32 (!%p1338_p2), 0, %v528_v27  ;;  %v533_v31 = vsub.s32 (!%p1338_p2), 1, %v528_v27  ;;  %v541_v35 = vld [vmem:[%s1945_s28] sm:$0x3] (!%p1338_p2) }
  0x5a   : > { %492 = vadd.xlane.f32.xlu0 (!%p1338_p2), %v491_v3 }
  0x5b   : > { %v530_v33 = vrot.slane (!%p1338_p2), %v525_v29, %v529_v30  ;;  %v534_v34 = vrot.slane (!%p1338_p2), %v525_v29, %v533_v31  ;;  %v546_v39 = vrot.slane (!%p1338_p2), %v541_v35, %v529_v30  ;;  %v550_v40 = vrot.slane (!%p1338_p2), %v541_v35, %v533_v31 }
  0x5e   : > { %495 = vadd.xlane.f32.xlu0 (!%p1338_p2), %v494_v5 }
  0xe7   : > { %v493_v6 = vpop.xlane.xlu0 %492 }
  0xe8   : > { %v498_v7 = vmul.f32 0.00390625, %v493_v6 }
  0xea   : > { %v500_v8 = vsub.f32 %v487_v0, %v498_v7  ;;  %v501_v9 = vsub.f32 %v488_v1, %v498_v7 }
  0xeb   : > { %v496_v10 = vpop.xlane.xlu0 %495 }
  0xec   : > { %v499_v11 = vmul.f32 0.00390625, %v496_v10  ;;  %v504_v12 = vmul.f32 %v500_v8, %v500_v8  ;;  %v505_v13 = vmul.f32 %v501_v9, %v501_v9 }
  0xee   : > { %v502_v14 = vsub.f32 %v489_v2, %v499_v11  ;;  %v503_v15 = vsub.f32 %v490_v4, %v499_v11  ;;  %v508_v16 = vadd.f32 %v505_v13, %v504_v12 }
  0xf0   : > { %509 = vadd.xlane.f32.xlu1 %v508_v16  ;;  %v506_v17 = vmul.f32 %v502_v14, %v502_v14  ;;  %v507_v18 = vmul.f32 %v503_v15, %v503_v15 }
  0xf2   : > { %v511_v19 = vadd.f32 %v507_v18, %v506_v17 }
  0xf4   : > { %512 = vadd.xlane.f32.xlu1 %v511_v19 }
 0x17d   : > { %v510_v20 = vpop.xlane.xlu1 %509 }
 0x17e   : > { %v514_v21 = vmul.f32 0.00390625, %v510_v20 }
 0x180   : > { %v516_v22 = vadd.f32 1e-06, %v514_v21 }
 0x181   : > { %v513_v24 = vpop.xlane.xlu1 %512 }
 0x182   : > { %1491 = vrsqrt.f32 %v516_v22  ;;  %v515_v25 = vmul.f32 0.00390625, %v513_v24 }
 0x184   : > { %v517_v26 = vadd.f32 1e-06, %v515_v25 }
 0x186   : > { %1493 = vrsqrt.f32 %v517_v26 }
 0x18c   : > { %v1492_v32 = vpop.eup %1491 }
 0x18d   : > { %v520_v36 = vmul.f32 %v1492_v32, %v500_v8  ;;  %v521_v37 = vmul.f32 %v1492_v32, %v501_v9 }
 0x18f   : > { %v537_v41 = vmul.f32 %v530_v33, %v520_v36  ;;  %v538_v42 = vmul.f32 %v534_v34, %v521_v37 }
 0x190   : > { %v1494_v38 = vpop.eup %1493 }
 0x191   : > { %v522_v43 = vmul.f32 %v1494_v38, %v502_v14  ;;  %v523_v44 = vmul.f32 %v1494_v38, %v503_v15  ;;  %v553_v47 = vadd.f32 %v546_v39, %v537_v41  ;;  %v554_v48 = vadd.f32 %v550_v40, %v538_v42 }
 0x193   : > { %v539_v45 = vmul.f32 %v530_v33, %v522_v43  ;;  %v540_v46 = vmul.f32 %v534_v34, %v523_v44 }
 0x195   : > { %v555_v49 = vadd.f32 %v546_v39, %v539_v45  ;;  %v556_v50 = vadd.f32 %v550_v40, %v540_v46 }
 0x197   : > { %v557_v51 = vpack.c.bf16 %v555_v49, %v553_v47  ;;  %v558_v52 = vpack.c.bf16 %v556_v50, %v554_v48 }
 0x199   : > { %559 = vst [vmem:[#allocation2] sm:$0xff] %v557_v51  ;;  %560 = vst [vmem:[#allocation2 + $0x8] sm:$0xff] %v558_v52 }
 0x19a PF: > { %v1495_v53 = vld [vmem:[%s1951_s21 + $0x4] ss:$16 sps:$4 sm:$0xff]   ;;  %v1497_v54 = vld [vmem:[%s1951_s21 + $0xc] ss:$16 sps:$4 sm:$0xff]   ;;  %v1499_v55 = vld [vmem:[%s1951_s21] ss:$16 sps:$4 sm:$0xff]  }
 0x19b   : > { %969 = vmatprep.subr.bf16.mxu0 %v1495_v53  ;;  %v1500_v56 = vld [vmem:[%s1951_s21 + $0x8] ss:$16 sps:$4 sm:$0xff]   ;;  %1012 = vmatprep.subr.bf16.mxu1 %v1497_v54  ;;  %v1501_v57 = vld [vmem:[%s1951_s21 + $0x24] ss:$16 sps:$4 sm:$0xff]   ;;  %v1503_v58 = vld [vmem:[%s1951_s21 + $0x2c] ss:$16 sps:$4 sm:$0xff]  }
 0x19c   : > { %970 = vmatpush1.bf16.msra.mxu0 %v1499_v55  ;;  %1013 = vmatpush1.bf16.msra.mxu1 %v1500_v56  ;;  %v1505_v59 = vld [vmem:[%s1951_s21 + $0x20] ss:$16 sps:$4 sm:$0xff]   ;;  %v1506_v60 = vld [vmem:[%s1951_s21 + $0x28] ss:$16 sps:$4 sm:$0xff]   ;;  %v1507_v61 = vld [vmem:[%s1951_s21 + $0x44] ss:$16 sps:$4 sm:$0xff]   ;;  %v629_v55 = vlaneseq }
 0x19d   : > { %971 = vmatprep.subr.bf16.mxu0 %v1501_v57  ;;  %1014 = vmatprep.subr.bf16.mxu1 %v1503_v58  ;;  %v1509_v62 = vld [vmem:[%s1951_s21 + $0x4c] ss:$16 sps:$4 sm:$0xff]   ;;  %v1511_v63 = vld [vmem:[%s1951_s21 + $0x40] ss:$16 sps:$4 sm:$0xff]   ;;  %v1512_v0 = vld [vmem:[%s1951_s21 + $0x48] ss:$16 sps:$4 sm:$0xff]  }
 0x19e   : > { %v1513_v1 = vld [vmem:[%s1951_s21 + $0x64] ss:$16 sps:$4 sm:$0xff]   ;;  %v1515_v2 = vld [vmem:[%s1951_s21 + $0x6c] ss:$16 sps:$4 sm:$0xff]   ;;  %v1517_v3 = vld [vmem:[%s1951_s21 + $0x60] ss:$16 sps:$4 sm:$0xff]  }
 0x19f   : > { %v1518_v4 = vld [vmem:[%s1951_s21 + $0x68] ss:$16 sps:$4 sm:$0xff]   ;;  %v1519_v5 = vld [vmem:[%s1951_s21 + $0x84] ss:$16 sps:$4 sm:$0xff]   ;;  %v1521_v6 = vld [vmem:[%s1951_s21 + $0x8c] ss:$16 sps:$4 sm:$0xff]  }
 0x1a0   : > { %972 = vmatpush1.bf16.msra.mxu0 %v1505_v59  ;;  %1015 = vmatpush1.bf16.msra.mxu1 %v1506_v60  ;;  %v1523_v7 = vld [vmem:[%s1951_s21 + $0x80] ss:$16 sps:$4 sm:$0xff]   ;;  %v1524_v8 = vld [vmem:[%s1951_s21 + $0x88] ss:$16 sps:$4 sm:$0xff]   ;;  %v1525_v9 = vld [vmem:[%s1951_s21 + $0xa4] ss:$16 sps:$4 sm:$0xff]  }
 0x1a1   : > { %973 = vmatprep.subr.bf16.mxu0 %v1507_v61  ;;  %1016 = vmatprep.subr.bf16.mxu1 %v1509_v62  ;;  %v1527_v10 = vld [vmem:[%s1951_s21 + $0xac] ss:$16 sps:$4 sm:$0xff]   ;;  %v1529_v11 = vld [vmem:[%s1951_s21 + $0xa0] ss:$16 sps:$4 sm:$0xff]   ;;  %v1530_v12 = vld [vmem:[%s1951_s21 + $0xa8] ss:$16 sps:$4 sm:$0xff]  }
 0x1a2   : > { %v1531_v13 = vld [vmem:[%s1951_s21 + $0xc4] ss:$16 sps:$4 sm:$0xff]   ;;  %v1533_v14 = vld [vmem:[%s1951_s21 + $0xcc] ss:$16 sps:$4 sm:$0xff]   ;;  %v1535_v15 = vld [vmem:[%s1951_s21 + $0xc0] ss:$16 sps:$4 sm:$0xff]  }
 0x1a3   : > { %v1536_v16 = vld [vmem:[%s1951_s21 + $0xc8] ss:$16 sps:$4 sm:$0xff]   ;;  %v1537_v17 = vld [vmem:[%s1951_s21 + $0xe4] ss:$16 sps:$4 sm:$0xff]   ;;  %v1539_v18 = vld [vmem:[%s1951_s21 + $0xec] ss:$16 sps:$4 sm:$0xff]  }
 0x1a4   : > { %974 = vmatpush1.bf16.msra.mxu0 %v1511_v63  ;;  %1017 = vmatpush1.bf16.msra.mxu1 %v1512_v0  ;;  %v1541_v19 = vld [vmem:[%s1951_s21 + $0xe0] ss:$16 sps:$4 sm:$0xff]   ;;  %v1542_v20 = vld [vmem:[%s1951_s21 + $0xe8] ss:$16 sps:$4 sm:$0xff]   ;;  %v1543_v21 = vld [vmem:[%s1951_s21 + $0x104] ss:$16 sps:$4 sm:$0xff]  }
 0x1a5   : > { %975 = vmatprep.subr.bf16.mxu0 %v1513_v1  ;;  %1018 = vmatprep.subr.bf16.mxu1 %v1515_v2  ;;  %v1545_v22 = vld [vmem:[%s1951_s21 + $0x10c] ss:$16 sps:$4 sm:$0xff]   ;;  %v1547_v23 = vld [vmem:[%s1951_s21 + $0x100] ss:$16 sps:$4 sm:$0xff]   ;;  %v1548_v24 = vld [vmem:[%s1951_s21 + $0x108] ss:$16 sps:$4 sm:$0xff]  }
 0x1a6   : > { %v1549_v25 = vld [vmem:[%s1951_s21 + $0x124] ss:$16 sps:$4 sm:$0xff]   ;;  %v1551_v26 = vld [vmem:[%s1951_s21 + $0x12c] ss:$16 sps:$4 sm:$0xff]   ;;  %v1553_v27 = vld [vmem:[%s1951_s21 + $0x120] ss:$16 sps:$4 sm:$0xff]  }
 0x1a7   : > { %v1554_v28 = vld [vmem:[%s1951_s21 + $0x128] ss:$16 sps:$4 sm:$0xff]   ;;  %v1555_v29 = vld [vmem:[%s1951_s21 + $0x144] ss:$16 sps:$4 sm:$0xff]   ;;  %v1557_v30 = vld [vmem:[%s1951_s21 + $0x14c] ss:$16 sps:$4 sm:$0xff]  }
 0x1a8   : > { %976 = vmatpush1.bf16.msra.mxu0 %v1517_v3  ;;  %1019 = vmatpush1.bf16.msra.mxu1 %v1518_v4  ;;  %v1559_v31 = vld [vmem:[%s1951_s21 + $0x140] ss:$16 sps:$4 sm:$0xff]   ;;  %v1560_v32 = vld [vmem:[%s1951_s21 + $0x148] ss:$16 sps:$4 sm:$0xff]   ;;  %v1561_v33 = vld [vmem:[%s1951_s21 + $0x164] ss:$16 sps:$4 sm:$0xff]  }
 0x1a9   : > { %977 = vmatprep.subr.bf16.mxu0 %v1519_v5  ;;  %1020 = vmatprep.subr.bf16.mxu1 %v1521_v6  ;;  %v1563_v34 = vld [vmem:[%s1951_s21 + $0x16c] ss:$16 sps:$4 sm:$0xff]   ;;  %v1565_v36 = vld [vmem:[%s1951_s21 + $0x160] ss:$16 sps:$4 sm:$0xff]   ;;  %v1566_v37 = vld [vmem:[%s1951_s21 + $0x168] ss:$16 sps:$4 sm:$0xff]  }
 0x1aa   : > { %v562_v35 = vld [vmem:[#allocation2 + $0x8] sm:$0xff]  ;;  %v1567_v38 = vld [vmem:[%s1951_s21 + $0x184] ss:$16 sps:$4 sm:$0xff]   ;;  %v1571_v40 = vld [vmem:[%s1951_s21 + $0x180] ss:$16 sps:$4 sm:$0xff]   ;;  %v630_v56 = vshrl.u32 %v629_v55, 7 }
 0x1ab   : > { %1001 = vmatprep.mubr.bf16.mxu0 %v562_v35  ;;  %1044 = vmatprep.mubr.bf16.mxu1 %v562_v35  ;;  %v1569_v39 = vld [vmem:[%s1951_s21 + $0x18c] ss:$16 sps:$4 sm:$0xff]   ;;  %v1572_v41 = vld [vmem:[%s1951_s21 + $0x188] ss:$16 sps:$4 sm:$0xff]   ;;  %v1573_v42 = vld [vmem:[%s1951_s21 + $0x1a4] ss:$16 sps:$4 sm:$0xff]  }
 0x1ac   : > { %978 = vmatpush1.bf16.msra.mxu0 %v1523_v7  ;;  %1021 = vmatpush1.bf16.msra.mxu1 %v1524_v8  ;;  %v1575_v43 = vld [vmem:[%s1951_s21 + $0x1ac] ss:$16 sps:$4 sm:$0xff]   ;;  %v1577_v44 = vld [vmem:[%s1951_s21 + $0x1a0] ss:$16 sps:$4 sm:$0xff]   ;;  %v1578_v45 = vld [vmem:[%s1951_s21 + $0x1a8] ss:$16 sps:$4 sm:$0xff]  }
 0x1ad   : > { %979 = vmatprep.subr.bf16.mxu0 %v1525_v9  ;;  %1022 = vmatprep.subr.bf16.mxu1 %v1527_v10  ;;  %v1579_v46 = vld [vmem:[%s1951_s21 + $0x1c4] ss:$16 sps:$4 sm:$0xff]   ;;  %v1581_v47 = vld [vmem:[%s1951_s21 + $0x1cc] ss:$16 sps:$4 sm:$0xff]   ;;  %v1583_v48 = vld [vmem:[%s1951_s21 + $0x1c0] ss:$16 sps:$4 sm:$0xff]  }
 0x1ae   : > { %v1584_v49 = vld [vmem:[%s1951_s21 + $0x1c8] ss:$16 sps:$4 sm:$0xff]   ;;  %v1585_v50 = vld [vmem:[%s1951_s21 + $0x1e4] ss:$16 sps:$4 sm:$0xff]   ;;  %v1587_v51 = vld [vmem:[%s1951_s21 + $0x1ec] ss:$16 sps:$4 sm:$0xff]  }
 0x1af   : > { %v1589_v52 = vld [vmem:[%s1951_s21 + $0x1e0] ss:$16 sps:$4 sm:$0xff]   ;;  %v1590_v53 = vld [vmem:[%s1951_s21 + $0x1e8] ss:$16 sps:$4 sm:$0xff]   ;;  %v631_v57 = vsub.s32 0, %v630_v56  ;;  %v639_v58 = vsub.s32 2, %v630_v56 }
 0x1b0   : > { %980 = vmatpush1.bf16.msra.mxu0 %v1529_v11  ;;  %1023 = vmatpush1.bf16.msra.mxu1 %v1530_v12  ;;  %v561_v54 = vld [vmem:[#allocation2] sm:$0xff]  ;;  %v635_v60 = vsub.s32 1, %v630_v56  ;;  %v643_v61 = vsub.s32 3, %v630_v56  ;;  %s1409_s21 = sshll.u32 (%p1776_p9), %s1665_s23, 4 }
 0x1b1   : > { %981 = vmatprep.subr.bf16.mxu0 %v1531_v13  ;;  %1024 = vmatprep.subr.bf16.mxu1 %v1533_v14  ;;  %v627_v59 = vld [vmem:[%s479_s8] sm:$0xf]  ;;  %s1167_s24 = sadd.s32 (%p1776_p9), %s1409_s21, %s1927_s13 }
 0x1b2   : > { %v632_v62 = vrot.slane %v627_v59, %v631_v57  ;;  %v640_v63 = vrot.slane %v627_v59, %v639_v58  ;;  %v636_v0 = vrot.slane %v627_v59, %v635_v60  ;;  %v644_v1 = vrot.slane %v627_v59, %v643_v61  ;;  %s1410_s25 = sshll.u32 (%p1776_p9), %s1167_s24, 2 }
 0x1b3   : > { %s1169_s8 = scalar_lea.vmem (%p1776_p9), %s2130_s5, %s1410_s25 }
 0x1b4   : > { %982 = vmatpush1.bf16.msra.mxu0 %v1535_v15  ;;  %1025 = vmatpush1.bf16.msra.mxu1 %v1536_v16 }
 0x1b5   : > { %983 = vmatprep.subr.bf16.mxu0 %v1537_v17  ;;  %1026 = vmatprep.subr.bf16.mxu1 %v1539_v18 }
 0x1b8   : > { %984 = vmatpush1.bf16.msra.mxu0 %v1541_v19  ;;  %1027 = vmatpush1.bf16.msra.mxu1 %v1542_v20 }
 0x1b9   : > { %985 = vmatprep.subr.bf16.mxu0 %v1543_v21  ;;  %1028 = vmatprep.subr.bf16.mxu1 %v1545_v22 }
 0x1bc   : > { %986 = vmatpush1.bf16.msra.mxu0 %v1547_v23  ;;  %1029 = vmatpush1.bf16.msra.mxu1 %v1548_v24 }
 0x1bd   : > { %987 = vmatprep.subr.bf16.mxu0 %v1549_v25  ;;  %1030 = vmatprep.subr.bf16.mxu1 %v1551_v26 }
 0x1c0   : > { %988 = vmatpush1.bf16.msra.mxu0 %v1553_v27  ;;  %1031 = vmatpush1.bf16.msra.mxu1 %v1554_v28 }
 0x1c1   : > { %989 = vmatprep.subr.bf16.mxu0 %v1555_v29  ;;  %1032 = vmatprep.subr.bf16.mxu1 %v1557_v30 }
 0x1c4   : > { %990 = vmatpush1.bf16.msra.mxu0 %v1559_v31  ;;  %1033 = vmatpush1.bf16.msra.mxu1 %v1560_v32 }
 0x1c5   : > { %991 = vmatprep.subr.bf16.mxu0 %v1561_v33  ;;  %1034 = vmatprep.subr.bf16.mxu1 %v1563_v34 }
 0x1c8   : > { %992 = vmatpush1.bf16.msra.mxu0 %v1565_v36  ;;  %1035 = vmatpush1.bf16.msra.mxu1 %v1566_v37 }
 0x1c9   : > { %993 = vmatprep.subr.bf16.mxu0 %v1567_v38  ;;  %1036 = vmatprep.subr.bf16.mxu1 %v1569_v39 }
 0x1cc   : > { %994 = vmatpush1.bf16.msra.mxu0 %v1571_v40  ;;  %1037 = vmatpush1.bf16.msra.mxu1 %v1572_v41 }
 0x1cd   : > { %995 = vmatprep.subr.bf16.mxu0 %v1573_v42  ;;  %1038 = vmatprep.subr.bf16.mxu1 %v1575_v43 }
 0x1d0   : > { %996 = vmatpush1.bf16.msra.mxu0 %v1577_v44  ;;  %1039 = vmatpush1.bf16.msra.mxu1 %v1578_v45 }
 0x1d1   : > { %997 = vmatprep.subr.bf16.mxu0 %v1579_v46  ;;  %1040 = vmatprep.subr.bf16.mxu1 %v1581_v47 }
 0x1d4   : > { %998 = vmatpush1.bf16.msra.mxu0 %v1583_v48  ;;  %1041 = vmatpush1.bf16.msra.mxu1 %v1584_v49 }
 0x1d5   : > { %999 = vmatprep.subr.bf16.mxu0 %v1585_v50  ;;  %1042 = vmatprep.subr.bf16.mxu1 %v1587_v51 }
 0x1d8   : > { %1000 = vmatpush1.bf16.msra.mxu0 %v1589_v52  ;;  %1043 = vmatpush1.bf16.msra.mxu1 %v1590_v53 }
 0x1db   : > { %1002 = vmatmul.mubr.bf16.vlgmr.msra.gmra.mrb[0].mxu0 %v561_v54  ;;  %1045 = vmatmul.mubr.bf16.vlgmr.msra.gmra.mrb[0].mxu1 %v561_v54 }
 0x2ae   : > { %v1003_v2 = vpop.f32.mrb[0].mxu0  ;;  %v1046_v3 = vpop.f32.mrb[0].mxu1 }
 0x2af   : > { %v2027_v4 = vadd.f32 %v1003_v2, %v632_v62  ;;  %v2029_v5 = vadd.f32 %v1046_v3, %v640_v63  ;;  %v1005_v6 = vpop.f32.mrb[1].mxu0  ;;  %v1048_v7 = vpop.f32.mrb[1].mxu1 }
 0x2b0   : > { %v2031_v8 = vadd.f32 %v1005_v6, %v636_v0  ;;  %v2033_v9 = vadd.f32 %v1048_v7, %v644_v1  ;;  %v1007_v10 = vpop.f32.mrb[2].mxu0  ;;  %v1050_v11 = vpop.f32.mrb[2].mxu1 }
 0x2b1   : > { %v1063_v12 = vmul.f32 0.044715, %v2027_v4  ;;  %v1065_v13 = vmul.f32 0.044715, %v2029_v5  ;;  %v2041_v18 = vadd.f32 %v1007_v10, %v632_v62  ;;  %v2043_v19 = vadd.f32 %v1050_v11, %v640_v63  ;;  %v1009_v20 = vpop.f32.mrb[3].mxu0  ;;  %v1052_v21 = vpop.f32.mrb[3].mxu1 }
 0x2b2   : > { %v1064_v14 = vmul.f32 0.044715, %v2031_v8  ;;  %v1066_v15 = vmul.f32 0.044715, %v2033_v9  ;;  %v2047_v24 = vadd.f32 %v1009_v20, %v636_v0  ;;  %v2058_v34 = vadd.f32 %v1052_v21, %v644_v1 }
 0x2b3   : > { %v1071_v16 = vmul.f32 %v1063_v12, %v2027_v4  ;;  %v1073_v17 = vmul.f32 %v1065_v13, %v2029_v5  ;;  %v1067_v27 = vmul.f32 0.044715, %v2041_v18  ;;  %v1069_v30 = vmul.f32 0.044715, %v2043_v19 }
 0x2b4   : > { %v1072_v22 = vmul.f32 %v1064_v14, %v2031_v8  ;;  %v1074_v23 = vmul.f32 %v1066_v15, %v2033_v9  ;;  %v1068_v38 = vmul.f32 0.044715, %v2047_v24  ;;  %v1070_v47 = vmul.f32 0.044715, %v2058_v34 }
 0x2b5   : > { %v1079_v25 = vmul.f32 %v1071_v16, %v2027_v4  ;;  %v1081_v26 = vmul.f32 %v1073_v17, %v2029_v5  ;;  %v1075_v33 = vmul.f32 %v1067_v27, %v2041_v18  ;;  %v1077_v37 = vmul.f32 %v1069_v30, %v2043_v19 }
 0x2b6   : > { %v1080_v28 = vmul.f32 %v1072_v22, %v2031_v8  ;;  %v1082_v29 = vmul.f32 %v1074_v23, %v2033_v9  ;;  %v1076_v45 = vmul.f32 %v1068_v38, %v2047_v24  ;;  %v1078_v51 = vmul.f32 %v1070_v47, %v2058_v34 }
 0x2b7   : > { %v1087_v31 = vadd.f32 %v1079_v25, %v2027_v4  ;;  %v1089_v32 = vadd.f32 %v1081_v26, %v2029_v5  ;;  %v1083_v41 = vmul.f32 %v1075_v33, %v2041_v18  ;;  %v1085_v44 = vmul.f32 %v1077_v37, %v2043_v19 }
 0x2b8   : > { %v1088_v35 = vadd.f32 %v1080_v28, %v2031_v8  ;;  %v1090_v36 = vadd.f32 %v1082_v29, %v2033_v9  ;;  %v1084_v49 = vmul.f32 %v1076_v45, %v2047_v24  ;;  %v1086_v54 = vmul.f32 %v1078_v51, %v2058_v34 }
 0x2b9   : > { %v1095_v39 = vmul.f32 0.7978846, %v1087_v31  ;;  %v1097_v40 = vmul.f32 0.7978846, %v1089_v32  ;;  %v1091_v46 = vadd.f32 %v1083_v41, %v2041_v18  ;;  %v1093_v48 = vadd.f32 %v1085_v44, %v2043_v19 }
 0x2ba   : > { %v1096_v42 = vmul.f32 0.7978846, %v1088_v35  ;;  %v1098_v43 = vmul.f32 0.7978846, %v1090_v36  ;;  %v1092_v53 = vadd.f32 %v1084_v49, %v2047_v24  ;;  %v1094_v56 = vadd.f32 %v1086_v54, %v2058_v34 }
 0x2bb   : > { %1591 = vtanh.f32 %v1095_v39  ;;  %v1099_v50 = vmul.f32 0.7978846, %v1091_v46  ;;  %v1101_v52 = vmul.f32 0.7978846, %v1093_v48  ;;  %v1055_v60 = vmul.f32 0.5, %v2027_v4 }
 0x2bc   : > { %1593 = vtanh.f32 %v1097_v40  ;;  %v1100_v55 = vmul.f32 0.7978846, %v1092_v53  ;;  %v1102_v57 = vmul.f32 0.7978846, %v1094_v56  ;;  %v1057_v63 = vmul.f32 0.5, %v2029_v5 }
 0x2bd   : > { %1595 = vtanh.f32 %v1096_v42  ;;  %v1056_v3 = vmul.f32 0.5, %v2031_v8  ;;  %v1058_v11 = vmul.f32 0.5, %v2033_v9  ;;  %v1059_v16 = vmul.f32 0.5, %v2041_v18 }
 0x2be   : > { %1597 = vtanh.f32 %v1098_v43  ;;  %v1060_v22 = vmul.f32 0.5, %v2047_v24  ;;  %v1061_v9 = vmul.f32 0.5, %v2043_v19  ;;  %v1062_v28 = vmul.f32 0.5, %v2058_v34 }
 0x2bf   : > { %1599 = vtanh.f32 %v1099_v50 }
 0x2c0   : > { %1601 = vtanh.f32 %v1101_v52 }
 0x2c1   : > { %1603 = vtanh.f32 %v1100_v55 }
 0x2c2   : > { %1605 = vtanh.f32 %v1102_v57 }
 0x2c5   : > { %v1592_v58 = vpop.eup %1591 }
 0x2c6   : > { %v1594_v59 = vpop.eup %1593  ;;  %v1111_v61 = vadd.f32 1.0, %v1592_v58 }
 0x2c7   : > { %v1596_v62 = vpop.eup %1595  ;;  %v1113_v0 = vadd.f32 1.0, %v1594_v59 }
 0x2c8   : > { %v1598_v1 = vpop.eup %1597  ;;  %v1119_v2 = vmul.f32 %v1111_v61, %v1055_v60  ;;  %v1112_v6 = vadd.f32 1.0, %v1596_v62 }
 0x2c9   : > { %v1600_v7 = vpop.eup %1599  ;;  %v1121_v10 = vmul.f32 %v1113_v0, %v1057_v63  ;;  %v1114_v12 = vadd.f32 1.0, %v1598_v1 }
 0x2ca   : > { %v1602_v13 = vpop.eup %1601  ;;  %v1120_v14 = vmul.f32 %v1112_v6, %v1056_v3  ;;  %v1115_v4 = vadd.f32 1.0, %v1600_v7 }
 0x2cb   : > { %v1122_v15 = vmul.f32 %v1114_v12, %v1058_v11  ;;  %v1604_v5 = vpop.eup %1603  ;;  %v1117_v20 = vadd.f32 1.0, %v1602_v13 }
 0x2cc   : > { %v1415_v17 = vpack.c.bf16 %v1120_v14, %v1119_v2  ;;  %v1123_v8 = vmul.f32 %v1115_v4, %v1059_v16  ;;  %v1116_v23 = vadd.f32 1.0, %v1604_v5  ;;  %v1606_v25 = vpop.eup %1605 }
 0x2cd   : > { %v1416_v21 = vpack.c.bf16 %v1122_v15, %v1121_v10  ;;  %v1125_v27 = vmul.f32 %v1117_v20, %v1061_v9  ;;  %v1118_v18 = vadd.f32 1.0, %v1606_v25  ;;  %1161 = sbr.rel (!%p1776_p9) target bundleno = 732 (0x2dc), region = 71 }
 0x2ce   : > { %1151 = vst [vmem:[%s1953_s14] sm:$0xff] %v1415_v17  ;;  %v1124_v26 = vmul.f32 %v1116_v23, %v1060_v22 }
 0x2cf   : > { %1152 = vst [vmem:[%s1953_s14 + $0x8] sm:$0xff] %v1416_v21  ;;  %v1126_v30 = vmul.f32 %v1118_v18, %v1062_v28 }
 0x2d0   : > { %v1417_v29 = vpack.c.bf16 %v1124_v26, %v1123_v8 }
 0x2d1   : > { %v1418_v31 = vpack.c.bf16 %v1126_v30, %v1125_v27 }
 0x2d2   : > { %1153 = vst [vmem:[%s1953_s14 + $0x10] sm:$0xff] %v1417_v29 }
 0x2d3   : > { %1154 = vst [vmem:[%s1953_s14 + $0x18] sm:$0xff] %v1418_v31 }
 0x2d5   : > { %v1182_v19 = vld [vmem:[%s1953_s14] sm:$0xff] }
 0x2d6   : > { %v1184_v24 = vld [vmem:[%s1953_s14 + $0x8] sm:$0xff]  ;;  %1183 = vst [vmem:[%s1169_s8] sm:$0xff] %v1182_v19 }
 0x2d7   : > { %1185 = vst [vmem:[%s1169_s8 + $0x8] sm:$0xff] %v1184_v24 }
 0x2d9   : > { %v1186_v32 = vld [vmem:[%s1953_s14 + $0x10] sm:$0xff] }
 0x2da   : > { %v1188_v33 = vld [vmem:[%s1953_s14 + $0x18] sm:$0xff]  ;;  %1187 = vst [vmem:[%s1169_s8 + $0x20] sm:$0xff] %v1186_v32 }
 0x2db   : > { %1189 = vst [vmem:[%s1169_s8 + $0x28] sm:$0xff] %v1188_v33 }
 0x2dc PF: > { %s15_s26 = sadd.s32 1, %s1677_s26   ;;  %s2145_s20 = sld [smem:[#allocation5_spill]] }
 0x2dd   : > { %p12_p3 = scmp.ge.s32.totalorder %s15_s26, 6   ;;  %s2146_s21 = sld [smem:[#allocation10_spill]] }
 0x2de   : > { %s2147_s22 = sld [smem:[#allocation6_spill]]  ;;  %s2148_s23 = sld [smem:[#allocation7_spill]] }
 0x2df   : > { %s2149_s24 = sld [smem:[#allocation8_spill]]  ;;  %s2150_s25 = sld [smem:[#allocation9_spill]] }
 0x2e0   : > { %s2151_s18 = smov %s1649_s19  ;;  %s2152_s19 = smov %s1781_s12 }
 0x2e1   :  { %14 = sbr.rel (!%p12_p3) target bundleno = 7 (0x7), region = 137 }

// kernel: pixart_controlnet_adapter_block.19
= control target key start
LH: loop header
LB: loop body
LE: loop exit
PB: predicated region body
PF: predicated region fallthrough
CT: control target
= control target key end

     0   :  { %s2497_s0 = inlined_call_operand.vmem [shape: bf16[2,16,1024], index: 0, kind: input, shape index: {}]   ;;  %s2498_s1 = inlined_call_operand.vmem [shape: bf16[1024,256], index: 1, kind: input, shape index: {}]   ;;  %s2499_s2 = inlined_call_operand.vmem [shape: f32[1,256], index: 2, kind: input, shape index: {}]   ;;  %s2500_s3 = inlined_call_operand.vmem [shape: f32[2,1,256], index: 3, kind: input, shape index: {}]   ;;  %s2501_s4 = inlined_call_operand.vmem [shape: f32[2,16,256], index: 4, kind: input, shape index: {}]   ;;  %s2502_s5 = inlined_call_operand.vmem [shape: bf16[256,256], index: 5, kind: input, shape index: {}]   ;;  %s2503_s6 = inlined_call_operand.vmem [shape: f32[1,256], index: 6, kind: input, shape index: {}]   ;;  %s2504_s7 = inlined_call_operand.hbm [shape: f32[2,16,256], index: 7, kind: output, shape index: {0}]   ;;  %s2505_s8 = inlined_call_operand.hbm [shape: f32[2,16,256], index: 8, kind: output, shape index: {1}]  }
   0x1   :  { %2515 = sst [smem:[#allocation21_spill]] %s2497_s0 }
   0x2   :  { %14 = vsyncpa [#allocation5], 0 }
   0x3   :  { %16 = vsyncpa [#allocation5 + $0x1], 0 }
   0x4   :  { %17 = vsyncpa [#allocation7], 0 }
   0x5   :  { %19 = vsyncpa [#allocation7 + $0x1], 0  ;;  %s2063_s27 = smov 0   ;;  %s2065_s28 = smov 0  }
   0x6   :  { %s2067_s29 = smov 0   ;;  %s2069_s30 = smov 0  }
   0x7   :  { %s2071_s9 = smov 0   ;;  %s2073_s10 = smov 0  }
   0x8   :  { %s2075_s11 = smov 0   ;;  %s2077_s12 = smov 0  }
   0x9   :  { %s2079_s13 = smov 0   ;;  %s2081_s14 = smov 0  }
   0xa LB: > { %2516 = sst [smem:[#allocation10_spill]] %s1975_s27  ;;  %s1488_s15 = sadd.s32 4294967295, %s2011_s14   ;;  %s2011_s14 = sphi %s2081_s14, %s25_s14   ;;  %s2007_s13 = sphi %s2079_s13, %s2541_s13   ;;  %s2003_s12 = sphi %s2077_s12, %s2540_s12   ;;  %s1999_s11 = sphi %s2075_s11, %s2539_s11   ;;  %s1995_s10 = sphi %s2073_s10, %s2538_s10   ;;  %s1991_s9 = sphi %s2071_s9, %s2537_s9   ;;  %s1987_s30 = sphi %s2069_s30, %s2536_s30   ;;  %s1983_s29 = sphi %s2067_s29, %s2535_s29   ;;  %s1979_s28 = sphi %s2065_s28, %s2534_s28   ;;  %s1975_s27 = sphi %s2063_s27, %s2533_s27  }
   0xb   : > { %2517 = sst [smem:[#allocation11_spill]] %s1979_s28  ;;  %s1489_s16 = sadd.s32 4294967294, %s2011_s14  }
   0xc   : > { %2518 = sst [smem:[#allocation12_spill]] %s1983_s29  ;;  %s37_s17 = sadd.s32 1, %s2003_s12 }
   0xd   : > { %2519 = sst [smem:[#allocation13_spill]] %s1991_s9  ;;  %s44_s18 = sadd.s32 1, %s2007_s13 }
   0xe   : > { %2520 = sst [smem:[#allocation14_spill]] %s2003_s12  ;;  %p38_p0 = scmp.ge.s32.totalorder %s37_s17, 2 }
   0xf   : > { %2521 = sst [smem:[#allocation15_spill]] %s2007_s13  ;;  %s55_s19 = sadd.s32 1, %s1991_s9 }
  0x10   : > { %p62_p1 = scmp.ne.s32.totalorder %s1991_s9, %s1987_s30  ;;  %p63_p2 = scmp.eq.s32.totalorder %s2011_s14, 0 }
  0x11   : > { %s2543_s17 = smov (%p38_p0, %s37_s17), 0  ;;  %s2545_s18 = smov (!%p38_p0, %s44_s18), %s2007_s13 }
  0x12   : > { %2522 = sst [smem:[#allocation16_spill]] %s2543_s17  ;;  %s51_s20 = ssub.s32 %s2003_s12, %s2543_s17 }
  0x13   : > { %p2126_p3 = por %p63_p2, %p62_p1  ;;  %p46_p4 = scmp.ge.s32.totalorder %s2545_s18, 2 }
  0x14   : > { %s226_s22 = sadd.s32 1, %s1983_s29  ;;  %p236_p5 = scmp.ne.s32.totalorder %s1983_s29, %s1979_s28 }
  0x15   : > { %p237_p6 = scmp.eq.s32.totalorder %s1488_s15, 3  ;;  %s2547_s18 = smov (%p46_p4, %s2545_s18), 0 }
  0x16   : > { %2524 = sst [smem:[#allocation17_spill]] %s2547_s18  ;;  %p242_p8 = scmp.ne.s32.totalorder %s1979_s28, %s1975_s27 }
  0x17   : > { %p2135_p7 = por %p237_p6, %p236_p5  ;;  %s48_s24 = ssub.s32 %s2007_s13, %s2547_s18 }
  0x18   : > { %p243_p9 = scmp.eq.s32.totalorder %s1489_s16, 3  ;;  %s52_s25 = sor.u32 %s51_s20, %s48_s24 }
  0x19   : > { %p224_p10 = scmp.eq.s32.totalorder %s48_s24, 0  ;;  %p53_p11 = scmp.eq.s32.totalorder %s52_s25, 0 }
  0x1a   : > { %p2143_p12 = por %p243_p9, %p242_p8  ;;  %p1491_p13 = scmp.ge.s32.totalorder %s2011_s14, 4 }
  0x1b   : > { %s2148_s17 = scalar_select %p224_p10, %s1983_s29, %s226_s22  }
  0x1c   : > { %s2526_s26 = scalar_select %p2143_p12, 1, 0 }
  0x1d   : > { %2528 = sst [smem:[#allocation19_spill]] %s2148_s17  ;;  %296 = sbr.rel (%p1491_p13) target bundleno = 48 (0x30), region = 28 }
  0x1e   : > { %2527 = sst [smem:[#allocation18_spill]] %s2526_s26 }
  0x1f   : > { %s2151_s15 = scalar_select %p53_p11, %s1991_s9, %s55_s19  }
  0x21   : > { %2529 = sst [smem:[#allocation20_spill]] %s2151_s15 }
  0x24   : > { %299 = sbr.rel (!%p2126_p3) target bundleno = 48 (0x30), region = 32  ;;  %s301_s16 = sand.u32 (%p2126_p3), 1, %s1991_s9  }
  0x25   : > { %s1493_s20 = sshll.u32 (%p2126_p3), %s2003_s12, 2  ;;  %s1492_s24 = sshll.u32 (%p2126_p3), %s301_s16, 5 }
  0x26   : > { %s1494_s25 = sshll.u32 (%p2126_p3), %s2007_s13, 4  ;;  %s2530_s0 = sld [smem:[#allocation21_spill]] (%p2126_p3) }
  0x27   : > { %s309_s18 = sadd.s32 (%p2126_p3), %s1494_s25, %s1493_s20  ;;  %s303_s15 = scalar_lea.vmem (%p2126_p3), [#allocation3], %s1492_s24 }
  0x28   : > { %s1495_s27 = sshll.u32 (%p2126_p3), %s309_s18, 2 }
  0x2c   : > { %s311_s19 = scalar_lea.vmem %s2530_s0, %s1495_s27 }
  0x2d   : > { %v324_v0 = vld [vmem:[%s311_s19] sm:$0xff]  ;;  %v326_v1 = vld [vmem:[%s311_s19 + $0x8] sm:$0xff] }
  0x2e   : > { %v328_v2 = vld [vmem:[%s311_s19 + $0x20] sm:$0xff]  ;;  %325 = vst [vmem:[%s303_s15] sm:$0xff] %v324_v0  ;;  %327 = vst [vmem:[%s303_s15 + $0x8] sm:$0xff] %v326_v1  ;;  %v330_v3 = vld [vmem:[%s311_s19 + $0x28] sm:$0xff] }
  0x2f   : > { %329 = vst [vmem:[%s303_s15 + $0x10] sm:$0xff] %v328_v2  ;;  %331 = vst [vmem:[%s303_s15 + $0x18] sm:$0xff] %v330_v3 }
  0x30 PF: > { %p1496_p0 = scmp.ge.s32.totalorder %s2011_s14, 1  ;;  %p367_p1 = scmp.lt.s32.totalorder %s2011_s14, 5 }
  0x32   : > { %p368_p2 = pnand %p1496_p0, %p367_p1 }
  0x33   : > { %s374_s27 = sand.u32 (!%p368_p2), 1, %s1987_s30   ;;  %s2166_s18 = sand.u32 (!%p368_p2), 1, %s1979_s28  }
  0x34   : > { %371 = sbr.rel (%p368_p2) target bundleno = 645 (0x285), region = 67  ;;  %s1497_s21 = sshll.u32 (!%p368_p2), %s374_s27, 5 }
  0x35   : > { %s1498_s26 = sshll.u32 (!%p368_p2), %s2166_s18, 5  ;;  %s1500_s15 = sshll.u32 (!%p368_p2), %s1995_s10, 6 }
  0x36   : > { %p435_p3 = scmp.lt.s32.totalorder (!%p368_p2), %s1500_s15, 127  ;;  %p441_p4 = scmp.lt.s32.totalorder (!%p368_p2), %s1999_s11, 1 }
  0x37   : > { %s2187_s29 = scalar_lea.vmem (!%p368_p2), [#allocation3], %s1497_s21  ;;  %s2191_s28 = scalar_lea.vmem (!%p368_p2), [#allocation6], %s1498_s26 }
  0x38   : > { %p1506_p5 = scmp.ne.s32.totalorder (!%p368_p2), %s1995_s10, 0 }
  0x3b   : > { %s2549_s15 = smov (!%p435_p3, %s1500_s15), 127  ;;  %461 = sbr.rel (%p1506_p5) target bundleno = 66 (0x42), region = 75 }
  0x3c   : > { %s442_s16 = scalar_select %p441_p4, %s1999_s11, 1 }
  0x3d   : > { %s1616_s20 = sshll.u32 %s2549_s15, 3  ;;  %s2189_s15 = scalar_lea.vmem [#allocation4], %s1498_s26  ;;  %v2013_v4 = vmov (!%p1506_p5), 0.0  }
  0x3e   : > { %s2175_s22 = scalar_lea.vmem %s2498_s1, %s1616_s20  ;;  %s1503_s19 = sshll.u32 %s442_s16, 1  ;;  %462 = vst [vmem:[#allocation2] sm:$0xff] (!%p1506_p5), %v2013_v4  ;;  %463 = vst [vmem:[#allocation2 + $0x8] sm:$0xff] (!%p1506_p5), %v2013_v4 }
  0x3f   : > { %s2180_s30 = scalar_lea.vmem %s2500_s3, %s1503_s19  ;;  %s1617_s12 = sshll.u32 %s442_s16, 5  ;;  %464 = vst [vmem:[#allocation2 + $0x10] sm:$0xff] (!%p1506_p5), %v2013_v4  ;;  %465 = vst [vmem:[#allocation2 + $0x18] sm:$0xff] (!%p1506_p5), %v2013_v4 }
  0x40   : > { %s2185_s17 = scalar_lea.vmem %s2501_s4, %s1617_s12 }
  0x42 PF: > { %v1719_v5 = vld [vmem:[%s2175_s22 + $0x4] ss:$8 sps:$4 sm:$0xff]   ;;  %v1723_v7 = vld [vmem:[%s2175_s22] ss:$8 sps:$4 sm:$0xff]   ;;  %v1725_v9 = vld [vmem:[%s2175_s22 + $0x14] ss:$8 sps:$4 sm:$0xff]  }
  0x43   : > { %v1721_v6 = vld [vmem:[%s2175_s22 + $0x104] ss:$8 sps:$4 sm:$0xff]   ;;  %878 = vmatprep.subr.bf16.mxu1 %v1719_v5  ;;  %v1724_v8 = vld [vmem:[%s2175_s22 + $0x100] ss:$8 sps:$4 sm:$0xff]   ;;  %v1727_v10 = vld [vmem:[%s2175_s22 + $0x114] ss:$8 sps:$4 sm:$0xff]  }
  0x44   : > { %921 = vmatprep.subr.bf16.mxu0 %v1721_v6  ;;  %879 = vmatpush1.bf16.msra.mxu1 %v1723_v7  ;;  %v1729_v11 = vld [vmem:[%s2175_s22 + $0x10] ss:$8 sps:$4 sm:$0xff]   ;;  %v1731_v13 = vld [vmem:[%s2175_s22 + $0x24] ss:$8 sps:$4 sm:$0xff]   ;;  %v1735_v15 = vld [vmem:[%s2175_s22 + $0x20] ss:$8 sps:$4 sm:$0xff]  }
  0x45   : > { %922 = vmatpush1.bf16.msra.mxu0 %v1724_v8  ;;  %880 = vmatprep.subr.bf16.mxu1 %v1725_v9  ;;  %v1730_v12 = vld [vmem:[%s2175_s22 + $0x110] ss:$8 sps:$4 sm:$0xff]   ;;  %v1733_v14 = vld [vmem:[%s2175_s22 + $0x124] ss:$8 sps:$4 sm:$0xff]   ;;  %v1736_v16 = vld [vmem:[%s2175_s22 + $0x120] ss:$8 sps:$4 sm:$0xff]  }
  0x46   : > { %923 = vmatprep.subr.bf16.mxu0 %v1727_v10  ;;  %v1737_v17 = vld [vmem:[%s2175_s22 + $0x34] ss:$8 sps:$4 sm:$0xff]   ;;  %v1741_v19 = vld [vmem:[%s2175_s22 + $0x30] ss:$8 sps:$4 sm:$0xff]   ;;  %v1743_v21 = vld [vmem:[%s2175_s22 + $0x44] ss:$8 sps:$4 sm:$0xff]  }
  0x47   : > { %v1739_v18 = vld [vmem:[%s2175_s22 + $0x134] ss:$8 sps:$4 sm:$0xff]   ;;  %v1742_v20 = vld [vmem:[%s2175_s22 + $0x130] ss:$8 sps:$4 sm:$0xff]   ;;  %v1745_v22 = vld [vmem:[%s2175_s22 + $0x144] ss:$8 sps:$4 sm:$0xff]  }
  0x48   : > { %881 = vmatpush1.bf16.msra.mxu1 %v1729_v11  ;;  %v1747_v23 = vld [vmem:[%s2175_s22 + $0x40] ss:$8 sps:$4 sm:$0xff]   ;;  %v1749_v25 = vld [vmem:[%s2175_s22 + $0x54] ss:$8 sps:$4 sm:$0xff]   ;;  %v1753_v27 = vld [vmem:[%s2175_s22 + $0x50] ss:$8 sps:$4 sm:$0xff]  }
  0x49   : > { %924 = vmatpush1.bf16.msra.mxu0 %v1730_v12  ;;  %882 = vmatprep.subr.bf16.mxu1 %v1731_v13  ;;  %v1748_v24 = vld [vmem:[%s2175_s22 + $0x140] ss:$8 sps:$4 sm:$0xff]   ;;  %v1751_v26 = vld [vmem:[%s2175_s22 + $0x154] ss:$8 sps:$4 sm:$0xff]   ;;  %v1754_v28 = vld [vmem:[%s2175_s22 + $0x150] ss:$8 sps:$4 sm:$0xff]  }
  0x4a   : > { %925 = vmatprep.subr.bf16.mxu0 %v1733_v14  ;;  %v1755_v29 = vld [vmem:[%s2175_s22 + $0x64] ss:$8 sps:$4 sm:$0xff]   ;;  %v1759_v31 = vld [vmem:[%s2175_s22 + $0x60] ss:$8 sps:$4 sm:$0xff]   ;;  %v1761_v33 = vld [vmem:[%s2175_s22 + $0x74] ss:$8 sps:$4 sm:$0xff]  }
  0x4b   : > { %v1757_v30 = vld [vmem:[%s2175_s22 + $0x164] ss:$8 sps:$4 sm:$0xff]   ;;  %v1760_v32 = vld [vmem:[%s2175_s22 + $0x160] ss:$8 sps:$4 sm:$0xff]   ;;  %v1763_v34 = vld [vmem:[%s2175_s22 + $0x174] ss:$8 sps:$4 sm:$0xff]  }
  0x4c   : > { %883 = vmatpush1.bf16.msra.mxu1 %v1735_v15  ;;  %v1765_v35 = vld [vmem:[%s2175_s22 + $0x70] ss:$8 sps:$4 sm:$0xff]   ;;  %v1767_v37 = vld [vmem:[%s2175_s22 + $0x84] ss:$8 sps:$4 sm:$0xff]   ;;  %v1771_v39 = vld [vmem:[%s2175_s22 + $0x80] ss:$8 sps:$4 sm:$0xff]  }
  0x4d   : > { %926 = vmatpush1.bf16.msra.mxu0 %v1736_v16  ;;  %884 = vmatprep.subr.bf16.mxu1 %v1737_v17  ;;  %v1766_v36 = vld [vmem:[%s2175_s22 + $0x170] ss:$8 sps:$4 sm:$0xff]   ;;  %v1769_v38 = vld [vmem:[%s2175_s22 + $0x184] ss:$8 sps:$4 sm:$0xff]   ;;  %v1772_v40 = vld [vmem:[%s2175_s22 + $0x180] ss:$8 sps:$4 sm:$0xff]  }
  0x4e   : > { %927 = vmatprep.subr.bf16.mxu0 %v1739_v18  ;;  %v1773_v41 = vld [vmem:[%s2175_s22 + $0x94] ss:$8 sps:$4 sm:$0xff]   ;;  %v1777_v43 = vld [vmem:[%s2175_s22 + $0x90] ss:$8 sps:$4 sm:$0xff]   ;;  %v1779_v45 = vld [vmem:[%s2175_s22 + $0xa4] ss:$8 sps:$4 sm:$0xff]  }
  0x4f   : > { %v1775_v42 = vld [vmem:[%s2175_s22 + $0x194] ss:$8 sps:$4 sm:$0xff]   ;;  %v1778_v44 = vld [vmem:[%s2175_s22 + $0x190] ss:$8 sps:$4 sm:$0xff]   ;;  %v1781_v46 = vld [vmem:[%s2175_s22 + $0x1a4] ss:$8 sps:$4 sm:$0xff]  }
  0x50   : > { %885 = vmatpush1.bf16.msra.mxu1 %v1741_v19  ;;  %v1783_v47 = vld [vmem:[%s2175_s22 + $0xa0] ss:$8 sps:$4 sm:$0xff]   ;;  %v1785_v49 = vld [vmem:[%s2175_s22 + $0xb4] ss:$8 sps:$4 sm:$0xff]   ;;  %v1789_v51 = vld [vmem:[%s2175_s22 + $0xb0] ss:$8 sps:$4 sm:$0xff]  }
  0x51   : > { %928 = vmatpush1.bf16.msra.mxu0 %v1742_v20  ;;  %886 = vmatprep.subr.bf16.mxu1 %v1743_v21  ;;  %v1784_v48 = vld [vmem:[%s2175_s22 + $0x1a0] ss:$8 sps:$4 sm:$0xff]   ;;  %v1787_v50 = vld [vmem:[%s2175_s22 + $0x1b4] ss:$8 sps:$4 sm:$0xff]   ;;  %v1790_v53 = vld [vmem:[%s2175_s22 + $0x1b0] ss:$8 sps:$4 sm:$0xff]  }
  0x52   : > { %929 = vmatprep.subr.bf16.mxu0 %v1745_v22  ;;  %v1817_v52 = vld [vmem:[%s2187_s29 + $0x4] ss:$16 sps:$4 sm:$0xff]   ;;  %v1820_v56 = vld [vmem:[%s2187_s29 + $0xc] ss:$16 sps:$4 sm:$0xff]   ;;  %v1795_v57 = vld [vmem:[%s2175_s22 + $0xc0] ss:$8 sps:$4 sm:$0xff]  }
  0x53   : > { %v1791_v54 = vld [vmem:[%s2175_s22 + $0xc4] ss:$8 sps:$4 sm:$0xff]   ;;  %910 = vmatprep.mubr.bf16.mxu1 %v1817_v52  ;;  %953 = vmatprep.mubr.bf16.mxu0 %v1820_v56  ;;  %v1796_v58 = vld [vmem:[%s2175_s22 + $0x1c0] ss:$8 sps:$4 sm:$0xff]   ;;  %v1797_v59 = vld [vmem:[%s2175_s22 + $0xd4] ss:$8 sps:$4 sm:$0xff]  }
  0x54   : > { %887 = vmatpush1.bf16.msra.mxu1 %v1747_v23  ;;  %v1793_v55 = vld [vmem:[%s2175_s22 + $0x1c4] ss:$8 sps:$4 sm:$0xff]   ;;  %v1799_v60 = vld [vmem:[%s2175_s22 + $0x1d4] ss:$8 sps:$4 sm:$0xff]   ;;  %v1801_v61 = vld [vmem:[%s2175_s22 + $0xd0] ss:$8 sps:$4 sm:$0xff]  }
  0x55   : > { %930 = vmatpush1.bf16.msra.mxu0 %v1748_v24  ;;  %888 = vmatprep.subr.bf16.mxu1 %v1749_v25  ;;  %v1802_v62 = vld [vmem:[%s2175_s22 + $0x1d0] ss:$8 sps:$4 sm:$0xff]   ;;  %v1803_v63 = vld [vmem:[%s2175_s22 + $0xe4] ss:$8 sps:$4 sm:$0xff]   ;;  %v1807_v1 = vld [vmem:[%s2175_s22 + $0xe0] ss:$8 sps:$4 sm:$0xff]  }
  0x56   : > { %931 = vmatprep.subr.bf16.mxu0 %v1751_v26  ;;  %v1805_v0 = vld [vmem:[%s2175_s22 + $0x1e4] ss:$8 sps:$4 sm:$0xff]   ;;  %v1808_v2 = vld [vmem:[%s2175_s22 + $0x1e0] ss:$8 sps:$4 sm:$0xff]   ;;  %v1809_v3 = vld [vmem:[%s2175_s22 + $0xf4] ss:$8 sps:$4 sm:$0xff]  }
  0x57   : > { %v1811_v4 = vld [vmem:[%s2175_s22 + $0x1f4] ss:$8 sps:$4 sm:$0xff]   ;;  %v1813_v5 = vld [vmem:[%s2175_s22 + $0xf0] ss:$8 sps:$4 sm:$0xff]   ;;  %v466_v10 = vld [vmem:[#allocation2] sm:$0xff]  ;;  %p1575_p6 = scmp.ne.s32.totalorder %s1995_s10, 1 }
  0x58   : > { %889 = vmatpush1.bf16.msra.mxu1 %v1753_v27  ;;  %v1814_v6 = vld [vmem:[%s2175_s22 + $0x1f0] ss:$8 sps:$4 sm:$0xff]   ;;  %v467_v14 = vld [vmem:[#allocation2 + $0x8] sm:$0xff] }
  0x59   : > { %932 = vmatpush1.bf16.msra.mxu0 %v1754_v28  ;;  %890 = vmatprep.subr.bf16.mxu1 %v1755_v29  ;;  %v1815_v7 = vld [vmem:[%s2187_s29] ss:$16 sps:$4 sm:$0xff]   ;;  %v1818_v8 = vld [vmem:[%s2187_s29 + $0x8] ss:$16 sps:$4 sm:$0xff]   ;;  %v1821_v29 = vld [vmem:[%s2502_s5 + $0x4] ss:$8 sps:$4 sm:$0xff] (!%p1575_p6)  }
  0x5a   : > { %933 = vmatprep.subr.bf16.mxu0 %v1757_v30  ;;  %v468_v18 = vld [vmem:[#allocation2 + $0x10] sm:$0xff]  ;;  %v469_v23 = vld [vmem:[#allocation2 + $0x18] sm:$0xff]  ;;  %v1823_v30 = vld [vmem:[%s2502_s5] ss:$8 sps:$4 sm:$0xff] (!%p1575_p6)  }
  0x5c   : > { %891 = vmatpush1.bf16.msra.mxu1 %v1759_v31  ;;  %v1824_v31 = vld [vmem:[%s2502_s5 + $0x14] ss:$8 sps:$4 sm:$0xff] (!%p1575_p6)  }
  0x5d   : > { %934 = vmatpush1.bf16.msra.mxu0 %v1760_v32  ;;  %892 = vmatprep.subr.bf16.mxu1 %v1761_v33  ;;  %v1826_v32 = vld [vmem:[%s2502_s5 + $0x10] ss:$8 sps:$4 sm:$0xff] (!%p1575_p6)   ;;  %v1827_v33 = vld [vmem:[%s2502_s5 + $0x24] ss:$8 sps:$4 sm:$0xff] (!%p1575_p6)  }
  0x5e   : > { %935 = vmatprep.subr.bf16.mxu0 %v1763_v34  ;;  %v1829_v34 = vld [vmem:[%s2502_s5 + $0x20] ss:$8 sps:$4 sm:$0xff] (!%p1575_p6)  }
  0x60   : > { %893 = vmatpush1.bf16.msra.mxu1 %v1765_v35  ;;  %v1830_v35 = vld [vmem:[%s2502_s5 + $0x34] ss:$8 sps:$4 sm:$0xff] (!%p1575_p6)  }
  0x61   : > { %936 = vmatpush1.bf16.msra.mxu0 %v1766_v36  ;;  %894 = vmatprep.subr.bf16.mxu1 %v1767_v37  ;;  %v1832_v36 = vld [vmem:[%s2502_s5 + $0x30] ss:$8 sps:$4 sm:$0xff] (!%p1575_p6)   ;;  %v982_v37 = vlaneseq (!%p1575_p6) }
  0x62   : > { %937 = vmatprep.subr.bf16.mxu0 %v1769_v38  ;;  %v1833_v38 = vld [vmem:[%s2502_s5 + $0x44] ss:$8 sps:$4 sm:$0xff] (!%p1575_p6)  }
  0x64   : > { %895 = vmatpush1.bf16.msra.mxu1 %v1771_v39  ;;  %v1835_v39 = vld [vmem:[%s2502_s5 + $0x40] ss:$8 sps:$4 sm:$0xff] (!%p1575_p6)  }
  0x65   : > { %938 = vmatpush1.bf16.msra.mxu0 %v1772_v40  ;;  %896 = vmatprep.subr.bf16.mxu1 %v1773_v41  ;;  %v983_v40 = vshrl.u32 (!%p1575_p6), %v982_v37, 7  ;;  %v1836_v41 = vld [vmem:[%s2502_s5 + $0x54] ss:$8 sps:$4 sm:$0xff] (!%p1575_p6)  }
  0x66   : > { %939 = vmatprep.subr.bf16.mxu0 %v1775_v42  ;;  %v1838_v42 = vld [vmem:[%s2502_s5 + $0x50] ss:$8 sps:$4 sm:$0xff] (!%p1575_p6)  }
  0x68   : > { %897 = vmatpush1.bf16.msra.mxu1 %v1777_v43  ;;  %v2299_v43 = vsub.s32 (!%p1575_p6), 0, %v983_v40 }
  0x69   : > { %940 = vmatpush1.bf16.msra.mxu0 %v1778_v44  ;;  %898 = vmatprep.subr.bf16.mxu1 %v1779_v45  ;;  %v2301_v44 = vsub.s32 (!%p1575_p6), 1, %v983_v40  ;;  %v1839_v45 = vld [vmem:[%s2502_s5 + $0x64] ss:$8 sps:$4 sm:$0xff] (!%p1575_p6)  }
  0x6a   : > { %941 = vmatprep.subr.bf16.mxu0 %v1781_v46 }
  0x6c   : > { %899 = vmatpush1.bf16.msra.mxu1 %v1783_v47 }
  0x6d   : > { %942 = vmatpush1.bf16.msra.mxu0 %v1784_v48  ;;  %900 = vmatprep.subr.bf16.mxu1 %v1785_v49  ;;  %v980_v48 = vld [vmem:[%s2499_s2] sm:$0x3] (!%p1575_p6) }
  0x6e   : > { %943 = vmatprep.subr.bf16.mxu0 %v1787_v50  ;;  %v996_v49 = vld [vmem:[%s2180_s30] sm:$0x3] (!%p1575_p6)  ;;  %v989_v52 = vrot.slane (!%p1575_p6), %v980_v48, %v2301_v44 }
  0x6f   : > { %v1841_v50 = vld [vmem:[%s2502_s5 + $0x60] ss:$8 sps:$4 sm:$0xff] (!%p1575_p6)  }
  0x70   : > { %901 = vmatpush1.bf16.msra.mxu1 %v1789_v51  ;;  %v985_v51 = vrot.slane (!%p1575_p6), %v980_v48, %v2299_v43 }
  0x71   : > { %944 = vmatpush1.bf16.msra.mxu0 %v1790_v53  ;;  %902 = vmatprep.subr.bf16.mxu1 %v1791_v54  ;;  %v1001_v53 = vrot.slane (!%p1575_p6), %v996_v49, %v2299_v43  ;;  %v1005_v54 = vrot.slane (!%p1575_p6), %v996_v49, %v2301_v44 }
  0x72   : > { %945 = vmatprep.subr.bf16.mxu0 %v1793_v55 }
  0x74   : > { %903 = vmatpush1.bf16.msra.mxu1 %v1795_v57  ;;  %v1842_v57 = vld [vmem:[%s2502_s5 + $0x74] ss:$8 sps:$4 sm:$0xff] (!%p1575_p6)  }
  0x75   : > { %946 = vmatpush1.bf16.msra.mxu0 %v1796_v58  ;;  %904 = vmatprep.subr.bf16.mxu1 %v1797_v59 }
  0x76   : > { %947 = vmatprep.subr.bf16.mxu0 %v1799_v60  ;;  %v1013_v60 = vld [vmem:[%s2185_s17 + $0x8] sm:$0xff] (!%p1575_p6) }
  0x78   : > { %905 = vmatpush1.bf16.msra.mxu1 %v1801_v61 }
  0x79   : > { %948 = vmatpush1.bf16.msra.mxu0 %v1802_v62  ;;  %906 = vmatprep.subr.bf16.mxu1 %v1803_v63  ;;  %v1015_v63 = vld [vmem:[%s2185_s17 + $0x18] sm:$0xff] (!%p1575_p6) }
  0x7a   : > { %949 = vmatprep.subr.bf16.mxu0 %v1805_v0  ;;  %v1012_v0 = vld [vmem:[%s2185_s17] sm:$0xff] (!%p1575_p6) }
  0x7c   : > { %907 = vmatpush1.bf16.msra.mxu1 %v1807_v1  ;;  %v1014_v1 = vld [vmem:[%s2185_s17 + $0x10] sm:$0xff] (!%p1575_p6) }
  0x7d   : > { %950 = vmatpush1.bf16.msra.mxu0 %v1808_v2  ;;  %908 = vmatprep.subr.bf16.mxu1 %v1809_v3  ;;  %v1844_v2 = vld [vmem:[%s2502_s5 + $0x70] ss:$8 sps:$4 sm:$0xff] (!%p1575_p6)  }
  0x7e   : > { %951 = vmatprep.subr.bf16.mxu0 %v1811_v4 }
  0x80   : > { %909 = vmatpush1.bf16.msra.mxu1 %v1813_v5 }
  0x81   : > { %952 = vmatpush1.bf16.msra.mxu0 %v1814_v6 }
  0x82   : > { %1230 = vmatprep.subr.bf16.mxu0 (!%p1575_p6), %v1821_v29  ;;  %v1058_v29 = vld [vmem:[%s2503_s6] sm:$0x3] (!%p1575_p6) }
  0x83   : > { %911 = vmatmul.mubr.bf16.vlgmr.msra.gmra.mrb[0].mxu1 %v1815_v7  ;;  %v1845_v7 = vld [vmem:[%s2502_s5 + $0x84] ss:$8 sps:$4 sm:$0xff] (!%p1575_p6)  }
  0x84   : > { %954 = vmatmul.mubr.bf16.vlgmr.msra.gmra.mrb[0].mxu0 %v1818_v8 }
  0x85   : > { %1231 = vmatpush1.bf16.msra.mxu0 (!%p1575_p6), %v1823_v30  ;;  %v1063_v30 = vrot.slane (!%p1575_p6), %v1058_v29, %v2299_v43 }
  0x86   : > { %1232 = vmatprep.subr.bf16.mxu0 (!%p1575_p6), %v1824_v31  ;;  %v1067_v31 = vrot.slane (!%p1575_p6), %v1058_v29, %v2301_v44 }
  0x89   : > { %1233 = vmatpush1.bf16.msra.mxu0 (!%p1575_p6), %v1826_v32 }
  0x8a   : > { %1234 = vmatprep.subr.bf16.mxu0 (!%p1575_p6), %v1827_v33 }
  0x8d   : > { %1235 = vmatpush1.bf16.msra.mxu0 (!%p1575_p6), %v1829_v34 }
  0x8e   : > { %1236 = vmatprep.subr.bf16.mxu0 (!%p1575_p6), %v1830_v35 }
  0x91   : > { %1237 = vmatpush1.bf16.msra.mxu0 (!%p1575_p6), %v1832_v36 }
  0x92   : > { %1238 = vmatprep.subr.bf16.mxu0 (!%p1575_p6), %v1833_v38 }
  0x95   : > { %1239 = vmatpush1.bf16.msra.mxu0 (!%p1575_p6), %v1835_v39 }
  0x96   : > { %1240 = vmatprep.subr.bf16.mxu0 (!%p1575_p6), %v1836_v41 }
  0x99   : > { %1241 = vmatpush1.bf16.msra.mxu0 (!%p1575_p6), %v1838_v42 }
  0x9a   : > { %1242 = vmatprep.subr.bf16.mxu0 (!%p1575_p6), %v1839_v45 }
  0x9d   : > { %1243 = vmatpush1.bf16.msra.mxu0 (!%p1575_p6), %v1841_v50 }
  0x9e   : > { %1244 = vmatprep.subr.bf16.mxu0 (!%p1575_p6), %v1842_v57 }
  0xa1   : > { %1245 = vmatpush1.bf16.msra.mxu0 (!%p1575_p6), %v1844_v2 }
  0xa2   : > { %1246 = vmatprep.subr.bf16.mxu0 (!%p1575_p6), %v1845_v7 }
 0x156   : > { %v912_v9 = vpop.f32.mrb[0].mxu1 }
 0x157   : > { %v955_v11 = vpop.f32.mrb[0].mxu0  ;;  %v914_v13 = vpop.f32.mrb[1].mxu1 }
 0x158   : > { %v956_v12 = vadd.f32 %v955_v11, %v912_v9  ;;  %v957_v15 = vpop.f32.mrb[1].mxu0  ;;  %v916_v17 = vpop.f32.mrb[2].mxu1 }
 0x159   : > { %v958_v16 = vadd.f32 %v957_v15, %v914_v13  ;;  %v959_v19 = vpop.f32.mrb[2].mxu0  ;;  %v918_v22 = vpop.f32.mrb[3].mxu1  ;;  %975 = sbr.rel (%p1575_p6) target bundleno = 596 (0x254), region = 79  ;;  %v1850_v15 = vld [vmem:[%s2502_s5 + $0x90] ss:$8 sps:$4 sm:$0xff] (!%p1575_p6)  }
 0x15a   : > { %v964_v20 = vadd.f32 %v956_v12, %v466_v10  ;;  %v960_v21 = vadd.f32 %v959_v19, %v916_v17  ;;  %v961_v24 = vpop.f32.mrb[3].mxu0  ;;  %v1847_v12 = vld [vmem:[%s2502_s5 + $0x80] ss:$8 sps:$4 sm:$0xff] (!%p1575_p6)   ;;  %v1856_v19 = vld [vmem:[%s2502_s5 + $0xb0] ss:$8 sps:$4 sm:$0xff] (!%p1575_p6)  }
 0x15b   : > { %v965_v25 = vadd.f32 %v958_v16, %v467_v14  ;;  %v962_v26 = vadd.f32 %v961_v24, %v918_v22  ;;  %v1848_v14 = vld [vmem:[%s2502_s5 + $0x94] ss:$8 sps:$4 sm:$0xff] (!%p1575_p6)   ;;  %1247 = vmatpush1.bf16.msra.mxu0 (!%p1575_p6), %v1847_v12  ;;  %v1851_v16 = vld [vmem:[%s2502_s5 + $0xa4] ss:$8 sps:$4 sm:$0xff] (!%p1575_p6)   ;;  %v1853_v17 = vld [vmem:[%s2502_s5 + $0xa0] ss:$8 sps:$4 sm:$0xff] (!%p1575_p6)  }
 0x15c   : > { %968 = vst [vmem:[#allocation2] sm:$0xff] %v964_v20  ;;  %v966_v27 = vadd.f32 %v960_v21, %v468_v18  ;;  %1248 = vmatprep.subr.bf16.mxu0 (!%p1575_p6), %v1848_v14  ;;  %v1854_v18 = vld [vmem:[%s2502_s5 + $0xb4] ss:$8 sps:$4 sm:$0xff] (!%p1575_p6)   ;;  %v1857_v20 = vld [vmem:[%s2502_s5 + $0xc4] ss:$8 sps:$4 sm:$0xff] (!%p1575_p6)  }
 0x15d   : > { %969 = vst [vmem:[#allocation2 + $0x8] sm:$0xff] %v965_v25  ;;  %v967_v28 = vadd.f32 %v962_v26, %v469_v23  ;;  %v1859_v21 = vld [vmem:[%s2502_s5 + $0xc0] ss:$8 sps:$4 sm:$0xff] (!%p1575_p6)   ;;  %v1860_v22 = vld [vmem:[%s2502_s5 + $0xd4] ss:$8 sps:$4 sm:$0xff] (!%p1575_p6)  }
 0x15e   : > { %970 = vst [vmem:[#allocation2 + $0x10] sm:$0xff] %v966_v27  ;;  %v1862_v23 = vld [vmem:[%s2502_s5 + $0xd0] ss:$8 sps:$4 sm:$0xff] (!%p1575_p6)   ;;  %v1863_v24 = vld [vmem:[%s2502_s5 + $0xe4] ss:$8 sps:$4 sm:$0xff] (!%p1575_p6)  }
 0x15f   : > { %971 = vst [vmem:[#allocation2 + $0x18] sm:$0xff] %v967_v28  ;;  %1249 = vmatpush1.bf16.msra.mxu0 (!%p1575_p6), %v1850_v15  ;;  %v1865_v25 = vld [vmem:[%s2502_s5 + $0xe0] ss:$8 sps:$4 sm:$0xff] (!%p1575_p6)   ;;  %v1866_v26 = vld [vmem:[%s2502_s5 + $0xf4] ss:$8 sps:$4 sm:$0xff] (!%p1575_p6)  }
 0x160   : > { %1250 = vmatprep.subr.bf16.mxu0 %v1851_v16  ;;  %v1868_v27 = vld [vmem:[%s2502_s5 + $0xf0] ss:$8 sps:$4 sm:$0xff]  }
 0x163   : > { %v976_v55 = vld [vmem:[#allocation2] sm:$0xff]  ;;  %1251 = vmatpush1.bf16.msra.mxu0 %v1853_v17 }
 0x164   : > { %v977_v46 = vld [vmem:[#allocation2 + $0x8] sm:$0xff]  ;;  %v992_v61 = vadd.f32 %v985_v51, %v976_v55  ;;  %1252 = vmatprep.subr.bf16.mxu0 %v1854_v18 }
 0x165   : > { %v978_v56 = vld [vmem:[#allocation2 + $0x10] sm:$0xff]  ;;  %v993_v58 = vadd.f32 %v989_v52, %v977_v46 }
 0x166   : > { %v979_v47 = vld [vmem:[#allocation2 + $0x18] sm:$0xff]  ;;  %v994_v62 = vadd.f32 %v985_v51, %v978_v56  ;;  %v1008_v5 = vmul.f32 %v1001_v53, %v992_v61 }
 0x167   : > { %v995_v59 = vadd.f32 %v989_v52, %v979_v47  ;;  %v1009_v3 = vmul.f32 %v1005_v54, %v993_v58  ;;  %1253 = vmatpush1.bf16.msra.mxu0 %v1856_v19 }
 0x168   : > { %v1010_v6 = vmul.f32 %v1001_v53, %v994_v62  ;;  %v1016_v10 = vadd.f32 %v1012_v0, %v1008_v5  ;;  %1254 = vmatprep.subr.bf16.mxu0 %v1857_v20 }
 0x169   : > { %v1011_v4 = vmul.f32 %v1005_v54, %v995_v59  ;;  %v1017_v8 = vadd.f32 %v1013_v60, %v1009_v3 }
 0x16a   : > { %v1018_v11 = vadd.f32 %v1014_v1, %v1010_v6  ;;  %1020 = vst [vmem:[%s2189_s15] sm:$0xff] %v1016_v10 }
 0x16b   : > { %v1019_v9 = vadd.f32 %v1015_v63, %v1011_v4  ;;  %1021 = vst [vmem:[%s2189_s15 + $0x8] sm:$0xff] %v1017_v8  ;;  %1255 = vmatpush1.bf16.msra.mxu0 %v1859_v21 }
 0x16c   : > { %1022 = vst [vmem:[%s2189_s15 + $0x10] sm:$0xff] %v1018_v11  ;;  %1256 = vmatprep.subr.bf16.mxu0 %v1860_v22  ;;  %v1024_v28 = vpack.c.bf16 %v1018_v11, %v1016_v10 }
 0x16d   : > { %1023 = vst [vmem:[%s2189_s15 + $0x18] sm:$0xff] %v1019_v9  ;;  %v1025_v13 = vpack.c.bf16 %v1019_v9, %v1017_v8 }
 0x16f   : > { %1262 = vmatprep.mubr.bf16.mxu0 %v1025_v13  ;;  %1257 = vmatpush1.bf16.msra.mxu0 %v1862_v23 }
 0x170   : > { %1258 = vmatprep.subr.bf16.mxu0 %v1863_v24 }
 0x173   : > { %1259 = vmatpush1.bf16.msra.mxu0 %v1865_v25 }
 0x174   : > { %1260 = vmatprep.subr.bf16.mxu0 %v1866_v26 }
 0x177   : > { %1261 = vmatpush1.bf16.msra.mxu0 %v1868_v27 }
 0x17a   : > { %1263 = vmatmul.mubr.bf16.vlgmr.msra.gmra.mrb[0].mxu0 %v1024_v28 }
 0x24d   : > { %v1264_v32 = vpop.f32.mrb[0].mxu0 }
 0x24e   : > { %v1265_v33 = vadd.f32 %v1264_v32, %v1063_v30  ;;  %v1266_v34 = vpop.f32.mrb[1].mxu0 }
 0x24f   : > { %v1267_v35 = vadd.f32 %v1266_v34, %v1067_v31  ;;  %v1268_v36 = vpop.f32.mrb[2].mxu0 }
 0x250   : > { %1273 = vst [vmem:[%s2191_s28] sm:$0xff] %v1265_v33  ;;  %v1269_v37 = vadd.f32 %v1268_v36, %v1063_v30  ;;  %v1270_v38 = vpop.f32.mrb[3].mxu0 }
 0x251   : > { %1274 = vst [vmem:[%s2191_s28 + $0x8] sm:$0xff] %v1267_v35  ;;  %v1271_v39 = vadd.f32 %v1270_v38, %v1067_v31 }
 0x252   : > { %1275 = vst [vmem:[%s2191_s28 + $0x10] sm:$0xff] %v1269_v37 }
 0x253   : > { %1276 = vst [vmem:[%s2191_s28 + $0x18] sm:$0xff] %v1271_v39 }
 0x254 PF: > { %s1618_s12 = sshll.u32 %s1999_s11, 9  ;;  %s1299_s26 = sshll.u32 %s2189_s15, 4  ;;  %s2397_s26 = int_to_ptr.vmem [resolvable:$true] %s1299_s26 }
 0x255   : > { %s2394_s21 = scalar_lea.hbm %s2504_s7, %s1618_s12  ;;  %s1278_s16 = scalar_lea.sflag [#allocation5], %s2166_s18 }
 0x256   : > { %s1869_s10 = scalar_lea.vmem %s2397_s26, 512  ;;  %s2014_s20 = smov [#allocation4]  }
 0x257   : > { %p1870_p8 = scmp.ne.s32.totalorder %s2397_s26, %s1869_s10  ;;  %s1873_s24 = sshll.u32 %s2014_s20, 4  ;;  %s1874_s24 = int_to_ptr.vmem [resolvable:$false] %s1873_s24 }
 0x258   : > { %s1875_s25 = scalar_lea.vmem %s1874_s24, 1024  ;;  %p1876_p11 = scmp.lt.s32.totalorder %s2397_s26, %s1874_s24 }
 0x259   : > { %p1871_p9 = pnand %p1870_p8, %p2135_p7  ;;  %p1877_p13 = scmp.lt.s32.totalorder %s1875_s25, %s1869_s10 }
 0x25b   : > { %p1872_p10 = pneg %p1871_p9  ;;  %p1878_p0 = por %p1877_p13, %p1876_p11 }
 0x25d   : > { %p1879_p1 = pnand %p1878_p0, %p1872_p10 }
 0x25f   : > { %1882 = shalt.err (!%p1879_p1)
}
 0x260   : > { %s1883_s15 = scalar_lea.hbm %s2394_s21, 512  ;;  %s1887_s27 = scalar_lea.hbm %s2504_s7, 1024 }
 0x261   : > { %p1884_p2 = scmp.ne.s32.totalorder %s2394_s21, %s1883_s15  ;;  %p1888_p5 = scmp.lt.u32.totalorder %s2394_s21, %s2504_s7 }
 0x262   : > { %p1889_p6 = scmp.lt.u32.totalorder %s1887_s27, %s1883_s15  ;;  %p1891_p9 = scmp.lt.u32.totalorder %s1883_s15, %s2394_s21 }
 0x263   : > { %p1885_p3 = pnand %p1884_p2, %p2135_p7 }
 0x264   : > { %p1890_p8 = por %p1889_p6, %p1888_p5 }
 0x265   : > { %p1886_p4 = pneg %p1885_p3 }
 0x266   : > { %p1892_p10 = por %p1891_p9, %p1890_p8 }
 0x268   : > { %p1893_p11 = pnand %p1892_p10, %p1886_p4 }
 0x26a   : > { %1896 = shalt.err (!%p1893_p11)
}
 0x26b   : > { %s2015_s29 = smov 256   ;;  %s2016_s9 = smov 16  }
 0x26c   : > { %1624 = dma.vmem_to_hbm [thread:$0]  (%p2135_p7), %s2397_s26, 512, %s2394_s21, %s1278_s16, %s2015_s29, %s2015_s29, %s2016_s9  }
 0x26d   : > { %s2431_s10 = scalar_lea.hbm %s2505_s8, %s1618_s12  ;;  %s1318_s20 = sshll.u32 %s2191_s28, 4  ;;  %s2434_s20 = int_to_ptr.vmem [resolvable:$true] %s1318_s20 }
 0x26e   : > { %s1283_s24 = scalar_lea.sflag [#allocation7], %s2166_s18  ;;  %s1897_s25 = scalar_lea.vmem %s2434_s20, 512 }
 0x26f   : > { %p1898_p13 = scmp.ne.s32.totalorder %s2434_s20, %s1897_s25  ;;  %s2017_s15 = smov [#allocation6]  }
 0x270   : > { %s1901_s21 = sshll.u32 %s2017_s15, 4  ;;  %s1902_s21 = int_to_ptr.vmem [resolvable:$false] %s1901_s21 }
 0x271   : > { %p1899_p0 = pnand %p1898_p13, %p2135_p7  ;;  %s1903_s11 = scalar_lea.vmem %s1902_s21, 1024 }
 0x272   : > { %p1904_p2 = scmp.lt.s32.totalorder %s2434_s20, %s1902_s21  ;;  %p1905_p3 = scmp.lt.s32.totalorder %s1903_s11, %s1897_s25 }
 0x273   : > { %p1900_p1 = pneg %p1899_p0 }
 0x274   : > { %p1906_p4 = por %p1905_p3, %p1904_p2 }
 0x276   : > { %p1907_p5 = pnand %p1906_p4, %p1900_p1 }
 0x278   : > { %1910 = shalt.err (!%p1907_p5)
}
 0x279   : > { %s1911_s28 = scalar_lea.hbm %s2431_s10, 512  ;;  %s1915_s16 = scalar_lea.hbm %s2505_s8, 1024 }
 0x27a   : > { %p1912_p6 = scmp.ne.s32.totalorder %s2431_s10, %s1911_s28  ;;  %p1916_p10 = scmp.lt.u32.totalorder %s2431_s10, %s2505_s8 }
 0x27b   : > { %p1917_p11 = scmp.lt.u32.totalorder %s1915_s16, %s1911_s28  ;;  %p1919_p0 = scmp.lt.u32.totalorder %s1911_s28, %s2431_s10 }
 0x27c   : > { %p1913_p8 = pnand %p1912_p6, %p2135_p7 }
 0x27d   : > { %p1918_p13 = por %p1917_p11, %p1916_p10 }
 0x27e   : > { %p1914_p9 = pneg %p1913_p8 }
 0x27f   : > { %p1920_p1 = por %p1919_p0, %p1918_p13 }
 0x281   : > { %p1921_p2 = pnand %p1920_p1, %p1914_p9 }
 0x283   : > { %1924 = shalt.err (!%p1921_p2)
}
 0x284   : > { %1625 = dma.vmem_to_hbm [thread:$0]  (%p2135_p7), %s2434_s20, 512, %s2431_s10, %s1283_s24, %s2015_s29, %s2015_s29, %s2016_s9  }
 0x285 PF: > { %s2531_s27 = sld [smem:[#allocation10_spill]]  ;;  %p1635_p3 = scmp.ge.s32.totalorder %s2011_s14, 2 }
 0x287   : > { %p1629_p4 = pnand %p1635_p3, %p2143_p12 }
 0x28b   : > { %s1333_s0 = sand.u32 1, %s2531_s27  }
 0x28c   : > { %s1334_s13 = scalar_lea.sflag [#allocation5], %s1333_s0 }
 0x28d   : > { %1966 = dma.done.wait (!%p1629_p4), %s1334_s13, 512  }
 0x28e   : > { %1968 = vsyncadd (!%p1629_p4), %s1334_s13, 4294966784  ;;  %s1343_s23 = scalar_lea.sflag [#allocation7], %s1333_s0 }
 0x28f   : > { %1970 = dma.done.wait (!%p1629_p4), %s1343_s23, 512  }
 0x290   : > { %1972 = vsyncadd (!%p1629_p4), %s1343_s23, 4294966784  ;;  %s25_s14 = sadd.s32 1, %s2011_s14   ;;  %s2533_s27 = sld [smem:[#allocation11_spill]] }
 0x291   : > { %p22_p5 = scmp.ge.s32.totalorder %s25_s14, 6   ;;  %s2534_s28 = sld [smem:[#allocation12_spill]] }
 0x292   : > { %s2535_s29 = sld [smem:[#allocation19_spill]]  ;;  %s2536_s30 = sld [smem:[#allocation13_spill]] }
 0x293   : > { %s2537_s9 = sld [smem:[#allocation20_spill]]  ;;  %s2538_s10 = sld [smem:[#allocation14_spill]] }
 0x294   : > { %s2539_s11 = sld [smem:[#allocation15_spill]]  ;;  %s2540_s12 = sld [smem:[#allocation16_spill]] }
 0x295   : > { %s2541_s13 = sld [smem:[#allocation17_spill]]  ;;  %24 = sbr.rel (!%p22_p5) target bundleno = 10 (0xa), region = 145 }
 0x29c   :  { %1348 = vsyncpa [#allocation5], 1 }
 0x29d   :  { %1350 = vsyncpa [#allocation5 + $0x1], 1 }
 0x29e   :  { %1351 = vsyncpa [#allocation7], 1 }
 0x29f   :  { %1353 = vsyncpa [#allocation7 + $0x1], 1 }

</bundles_post_ra>
